<compile_context>
chip_gen: v7x
topology: tpu7x:2x2x1
jax: 0.10.0
libtpu: 0.0.40
codegen_flags: <defaults>
</compile_context>

<pallas_src>
import jax
import jax.numpy as jnp
from jax.experimental import pallas as pl
from jax.experimental.pallas import tpu as pltpu


def _make_text_mapper_kernel(S, B, L, D):
    """Build the kernel with static (S, B, L, D) baked in."""
    N = S * B * L  # total gathered rows

    def kernel(ids_ref, tab_ref, w_t_ref, b_ref, out_ref, gbuf, sem):
        # ids_ref: SMEM (N,)    int32 -- flattened, stream-offset token ids
        # tab_ref: HBM  (S*V,D) f32   -- all three embedding tables, flattened
        # w_t_ref: VMEM (D, D)  f32   -- projector weight transposed (in, out)
        # b_ref:   VMEM (1, D)  f32   -- projector bias
        # out_ref: VMEM (B,S,D) f32   -- final output block
        # gbuf:    VMEM (N, D)  f32   -- gathered embedding rows
        # sem:     DMA semaphore shared by all row copies

        # Gather only the S*B*L needed rows from HBM; all DMAs in flight at once.
        copies = []
        for i in range(N):
            row = ids_ref[i]
            cp = pltpu.make_async_copy(
                tab_ref.at[pl.ds(row, 1), :],
                gbuf.at[pl.ds(i, 1), :],
                sem,
            )
            cp.start()
            copies.append(cp)
        for cp in copies:
            cp.wait()

        # Mean over the sequence, shared projector matmul (MXU), bias add.
        g = gbuf[...].reshape(S * B, L, D)
        mean_emb = jnp.sum(g, axis=1) * (1.0 / L)                      # (S*B, D)
        proj = jnp.dot(mean_emb, w_t_ref[...],
                       preferred_element_type=jnp.float32) + b_ref[...]  # (S*B, D)

        # Write directly in torch.stack(dim=1) layout: (B, S, D).
        for s in range(S):
            out_ref[:, s, :] = proj[s * B:(s + 1) * B, :]

    return kernel


def text_mapper_forward(panoptic_ids, instance_ids, semantic_ids, params):
    tables = params["tables"].astype(jnp.float32)        # (3, V, D)
    w = params["w"].astype(jnp.float32)                  # (D, D) torch (out, in)
    b = params["b"].astype(jnp.float32)                  # (D,)
    S, V, D = tables.shape

    ids = jnp.stack([panoptic_ids, instance_ids, semantic_ids], axis=0).astype(jnp.int32)
    _, B, L = ids.shape

    # TODO(synk): torch raises on out-of-range ids; we clamp instead.
    ids = jnp.clip(ids, 0, V - 1)
    # Fold the per-stream table offset into the ids so the kernel gathers from a
    # single flat (S*V, D) table.
    flat_ids = (ids + jnp.arange(S, dtype=jnp.int32)[:, None, None] * V).reshape(-1)

    kernel = _make_text_mapper_kernel(S, B, L, D)
    N = S * B * L

    out = pl.pallas_call(
        kernel,
        out_shape=jax.ShapeDtypeStruct((B, S, D), jnp.float32),
        grid_spec=pltpu.PrefetchScalarGridSpec(
            num_scalar_prefetch=1,           # flat_ids -> SMEM, used for DMA addressing
            grid=(1,),                       # single step: work is tiny once gathered
            in_specs=[
                pl.BlockSpec(memory_space=pl.ANY),              # tables stay in HBM
                pl.BlockSpec((D, D), lambda i, ids: (0, 0)),    # W^T
                pl.BlockSpec((1, D), lambda i, ids: (0, 0)),    # bias
            ],
            out_specs=pl.BlockSpec((B, S, D), lambda i, ids: (0, 0, 0)),
            scratch_shapes=[
                pltpu.VMEM((N, D), jnp.float32),                # gather buffer
                pltpu.SemaphoreType.DMA(()),                    # shared DMA sem
            ],
        ),
        compiler_params=pltpu.CompilerParams(
            dimension_semantics=("arbitrary",),
        ),
    )(flat_ids, tables.reshape(S * V, D), w.T, b.reshape(1, D))

    return out  # (B, 3, D)


def _reference_forward(panoptic_ids, instance_ids, semantic_ids, params):
    tables, w, b = params["tables"], params["w"], params["b"]
    outs = []
    for s, ids in enumerate([panoptic_ids, instance_ids, semantic_ids]):
        emb = jnp.take(tables[s], ids, axis=0)                  # (B, L, D)
        mean_emb = emb.mean(axis=1)                             # (B, D)
        outs.append(jnp.dot(mean_emb, w.T,
                            precision=jax.lax.Precision.HIGHEST) + b)
    return jnp.stack(outs, axis=1)                              # (B, 3, D)


if __name__ == "__main__":
    # Small, TPU-friendly shapes consistent with the module's forward.
    VOCAB = 512
    EMBED = 256
    BATCH = 2
    SEQ = 8

    key = jax.random.PRNGKey(0)
    k_tab, k_w, k_b, k_p, k_i, k_s = jax.random.split(key, 6)

    # Deterministic parameter init (shapes follow TextMapper.__init__).
    params = {
        # 3 embedding tables (panoptic, instance, semantic): (V, D) each, N(0,1).
        "tables": jax.random.normal(k_tab, (3, VOCAB, EMBED), dtype=jnp.float32),
        # nn.Linear(embed, embed): weight (out, in), bias (out,)
        "w": jax.random.uniform(k_w, (EMBED, EMBED), dtype=jnp.float32,
                                minval=-1.0 / jnp.sqrt(EMBED), maxval=1.0 / jnp.sqrt(EMBED)),
        "b": jax.random.uniform(k_b, (EMBED,), dtype=jnp.float32,
                                minval=-1.0 / jnp.sqrt(EMBED), maxval=1.0 / jnp.sqrt(EMBED)),
    }

    panoptic_text = jax.random.randint(k_p, (BATCH, SEQ), 0, VOCAB, dtype=jnp.int32)
    instance_text = jax.random.randint(k_i, (BATCH, SEQ), 0, VOCAB, dtype=jnp.int32)
    semantic_text = jax.random.randint(k_s, (BATCH, SEQ), 0, VOCAB, dtype=jnp.int32)

    out = text_mapper_forward(panoptic_text, instance_text, semantic_text, params)
    out = jax.block_until_ready(out)

    ref = _reference_forward(panoptic_text, instance_text, semantic_text, params)
    assert out.shape == (BATCH, 3, EMBED), out.shape
    # Everything is f32 end-to-end now (no bf16 fused tables); 5e-3 comfortably
    # covers MXU matmul rounding while still catching wrong-row/scale bugs.
    assert jnp.allclose(out, ref, atol=5e-3, rtol=5e-3), "mismatch vs reference"

    print("KERNEL_OK")
</pallas_src>

<mosaic_0001>
module attributes {stable_mosaic.version = 11 : i64} {
  func.func @kernel(%arg0: i32, %arg1: memref<48xi32, #tpu.memory_space<smem>>, %arg2: memref<1536x256xf32, #tpu.memory_space<any>>, %arg3: memref<256x256xf32, #tpu.memory_space<vmem>>, %arg4: memref<1x256xf32, #tpu.memory_space<vmem>>, %arg5: memref<2x3x256xf32, #tpu.memory_space<vmem>>, %arg6: memref<48x256xf32, #tpu.memory_space<vmem>>, %arg7: memref<!tpu.dma_semaphore, #tpu.memory_space<semaphore_mem>>) attributes {dimension_semantics = [#tpu.dimension_semantics<arbitrary>], iteration_bounds = array<i64: 1>, scalar_prefetch = 1 : i64, scratch_operands = 2 : i64, tpu.core_type = #tpu.core_type<tc>, window_params = [{}, {pipeline_mode = #tpu.pipeline_mode<synchronous>, transform_indices = @transform_1, window_bounds = array<i64: 256, 256>}, {pipeline_mode = #tpu.pipeline_mode<synchronous>, transform_indices = @transform_2, window_bounds = array<i64: 1, 256>}, {pipeline_mode = #tpu.pipeline_mode<synchronous>, transform_indices = @transform_3, window_bounds = array<i64: 2, 3, 256>}]} {
    %c0 = arith.constant 0 : index
    %0 = memref.load %arg1[%c0] : memref<48xi32, #tpu.memory_space<smem>>
    %c0_i32 = arith.constant 0 : i32
    %1 = tpu.memref_slice %arg2[%0, %c0_i32] : memref<1536x256xf32, #tpu.memory_space<any>> -> memref<1x256xf32, #tpu.memory_space<any>>
    %c0_i32_0 = arith.constant 0 : i32
    %c0_i32_1 = arith.constant 0 : i32
    %2 = tpu.memref_slice %arg6[%c0_i32_0, %c0_i32_1] : memref<48x256xf32, #tpu.memory_space<vmem>> -> memref<1x256xf32, #tpu.memory_space<vmem>>
    tpu.enqueue_dma source(%1 : memref<1x256xf32, #tpu.memory_space<any>>) target(%2 : memref<1x256xf32, #tpu.memory_space<vmem>>) target_semaphore(%arg7 : memref<!tpu.dma_semaphore, #tpu.memory_space<semaphore_mem>>)
    %c1 = arith.constant 1 : index
    %3 = memref.load %arg1[%c1] : memref<48xi32, #tpu.memory_space<smem>>
    %c0_i32_2 = arith.constant 0 : i32
    %4 = tpu.memref_slice %arg2[%3, %c0_i32_2] : memref<1536x256xf32, #tpu.memory_space<any>> -> memref<1x256xf32, #tpu.memory_space<any>>
    %c1_i32 = arith.constant 1 : i32
    %c0_i32_3 = arith.constant 0 : i32
    %5 = tpu.memref_slice %arg6[%c1_i32, %c0_i32_3] : memref<48x256xf32, #tpu.memory_space<vmem>> -> memref<1x256xf32, #tpu.memory_space<vmem>>
    tpu.enqueue_dma source(%4 : memref<1x256xf32, #tpu.memory_space<any>>) target(%5 : memref<1x256xf32, #tpu.memory_space<vmem>>) target_semaphore(%arg7 : memref<!tpu.dma_semaphore, #tpu.memory_space<semaphore_mem>>)
    %c2 = arith.constant 2 : index
    %6 = memref.load %arg1[%c2] : memref<48xi32, #tpu.memory_space<smem>>
    %c0_i32_4 = arith.constant 0 : i32
    %7 = tpu.memref_slice %arg2[%6, %c0_i32_4] : memref<1536x256xf32, #tpu.memory_space<any>> -> memref<1x256xf32, #tpu.memory_space<any>>
    %c2_i32 = arith.constant 2 : i32
    %c0_i32_5 = arith.constant 0 : i32
    %8 = tpu.memref_slice %arg6[%c2_i32, %c0_i32_5] : memref<48x256xf32, #tpu.memory_space<vmem>> -> memref<1x256xf32, #tpu.memory_space<vmem>>
    tpu.enqueue_dma source(%7 : memref<1x256xf32, #tpu.memory_space<any>>) target(%8 : memref<1x256xf32, #tpu.memory_space<vmem>>) target_semaphore(%arg7 : memref<!tpu.dma_semaphore, #tpu.memory_space<semaphore_mem>>)
    %c3 = arith.constant 3 : index
    %9 = memref.load %arg1[%c3] : memref<48xi32, #tpu.memory_space<smem>>
    %c0_i32_6 = arith.constant 0 : i32
    %10 = tpu.memref_slice %arg2[%9, %c0_i32_6] : memref<1536x256xf32, #tpu.memory_space<any>> -> memref<1x256xf32, #tpu.memory_space<any>>
    %c3_i32 = arith.constant 3 : i32
    %c0_i32_7 = arith.constant 0 : i32
    %11 = tpu.memref_slice %arg6[%c3_i32, %c0_i32_7] : memref<48x256xf32, #tpu.memory_space<vmem>> -> memref<1x256xf32, #tpu.memory_space<vmem>>
    tpu.enqueue_dma source(%10 : memref<1x256xf32, #tpu.memory_space<any>>) target(%11 : memref<1x256xf32, #tpu.memory_space<vmem>>) target_semaphore(%arg7 : memref<!tpu.dma_semaphore, #tpu.memory_space<semaphore_mem>>)
    %c4 = arith.constant 4 : index
    %12 = memref.load %arg1[%c4] : memref<48xi32, #tpu.memory_space<smem>>
    %c0_i32_8 = arith.constant 0 : i32
    %13 = tpu.memref_slice %arg2[%12, %c0_i32_8] : memref<1536x256xf32, #tpu.memory_space<any>> -> memref<1x256xf32, #tpu.memory_space<any>>
    %c4_i32 = arith.constant 4 : i32
    %c0_i32_9 = arith.constant 0 : i32
    %14 = tpu.memref_slice %arg6[%c4_i32, %c0_i32_9] : memref<48x256xf32, #tpu.memory_space<vmem>> -> memref<1x256xf32, #tpu.memory_space<vmem>>
    tpu.enqueue_dma source(%13 : memref<1x256xf32, #tpu.memory_space<any>>) target(%14 : memref<1x256xf32, #tpu.memory_space<vmem>>) target_semaphore(%arg7 : memref<!tpu.dma_semaphore, #tpu.memory_space<semaphore_mem>>)
    %c5 = arith.constant 5 : index
    %15 = memref.load %arg1[%c5] : memref<48xi32, #tpu.memory_space<smem>>
    %c0_i32_10 = arith.constant 0 : i32
    %16 = tpu.memref_slice %arg2[%15, %c0_i32_10] : memref<1536x256xf32, #tpu.memory_space<any>> -> memref<1x256xf32, #tpu.memory_space<any>>
    %c5_i32 = arith.constant 5 : i32
    %c0_i32_11 = arith.constant 0 : i32
    %17 = tpu.memref_slice %arg6[%c5_i32, %c0_i32_11] : memref<48x256xf32, #tpu.memory_space<vmem>> -> memref<1x256xf32, #tpu.memory_space<vmem>>
    tpu.enqueue_dma source(%16 : memref<1x256xf32, #tpu.memory_space<any>>) target(%17 : memref<1x256xf32, #tpu.memory_space<vmem>>) target_semaphore(%arg7 : memref<!tpu.dma_semaphore, #tpu.memory_space<semaphore_mem>>)
    %c6 = arith.constant 6 : index
    %18 = memref.load %arg1[%c6] : memref<48xi32, #tpu.memory_space<smem>>
    %c0_i32_12 = arith.constant 0 : i32
    %19 = tpu.memref_slice %arg2[%18, %c0_i32_12] : memref<1536x256xf32, #tpu.memory_space<any>> -> memref<1x256xf32, #tpu.memory_space<any>>
    %c6_i32 = arith.constant 6 : i32
    %c0_i32_13 = arith.constant 0 : i32
    %20 = tpu.memref_slice %arg6[%c6_i32, %c0_i32_13] : memref<48x256xf32, #tpu.memory_space<vmem>> -> memref<1x256xf32, #tpu.memory_space<vmem>>
    tpu.enqueue_dma source(%19 : memref<1x256xf32, #tpu.memory_space<any>>) target(%20 : memref<1x256xf32, #tpu.memory_space<vmem>>) target_semaphore(%arg7 : memref<!tpu.dma_semaphore, #tpu.memory_space<semaphore_mem>>)
    %c7 = arith.constant 7 : index
    %21 = memref.load %arg1[%c7] : memref<48xi32, #tpu.memory_space<smem>>
    %c0_i32_14 = arith.constant 0 : i32
    %22 = tpu.memref_slice %arg2[%21, %c0_i32_14] : memref<1536x256xf32, #tpu.memory_space<any>> -> memref<1x256xf32, #tpu.memory_space<any>>
    %c7_i32 = arith.constant 7 : i32
    %c0_i32_15 = arith.constant 0 : i32
    %23 = tpu.memref_slice %arg6[%c7_i32, %c0_i32_15] : memref<48x256xf32, #tpu.memory_space<vmem>> -> memref<1x256xf32, #tpu.memory_space<vmem>>
    tpu.enqueue_dma source(%22 : memref<1x256xf32, #tpu.memory_space<any>>) target(%23 : memref<1x256xf32, #tpu.memory_space<vmem>>) target_semaphore(%arg7 : memref<!tpu.dma_semaphore, #tpu.memory_space<semaphore_mem>>)
    %c8 = arith.constant 8 : index
    %24 = memref.load %arg1[%c8] : memref<48xi32, #tpu.memory_space<smem>>
    %c0_i32_16 = arith.constant 0 : i32
    %25 = tpu.memref_slice %arg2[%24, %c0_i32_16] : memref<1536x256xf32, #tpu.memory_space<any>> -> memref<1x256xf32, #tpu.memory_space<any>>
    %c8_i32 = arith.constant 8 : i32
    %c0_i32_17 = arith.constant 0 : i32
    %26 = tpu.memref_slice %arg6[%c8_i32, %c0_i32_17] : memref<48x256xf32, #tpu.memory_space<vmem>> -> memref<1x256xf32, #tpu.memory_space<vmem>>
    tpu.enqueue_dma source(%25 : memref<1x256xf32, #tpu.memory_space<any>>) target(%26 : memref<1x256xf32, #tpu.memory_space<vmem>>) target_semaphore(%arg7 : memref<!tpu.dma_semaphore, #tpu.memory_space<semaphore_mem>>)
    %c9 = arith.constant 9 : index
    %27 = memref.load %arg1[%c9] : memref<48xi32, #tpu.memory_space<smem>>
    %c0_i32_18 = arith.constant 0 : i32
    %28 = tpu.memref_slice %arg2[%27, %c0_i32_18] : memref<1536x256xf32, #tpu.memory_space<any>> -> memref<1x256xf32, #tpu.memory_space<any>>
    %c9_i32 = arith.constant 9 : i32
    %c0_i32_19 = arith.constant 0 : i32
    %29 = tpu.memref_slice %arg6[%c9_i32, %c0_i32_19] : memref<48x256xf32, #tpu.memory_space<vmem>> -> memref<1x256xf32, #tpu.memory_space<vmem>>
    tpu.enqueue_dma source(%28 : memref<1x256xf32, #tpu.memory_space<any>>) target(%29 : memref<1x256xf32, #tpu.memory_space<vmem>>) target_semaphore(%arg7 : memref<!tpu.dma_semaphore, #tpu.memory_space<semaphore_mem>>)
    %c10 = arith.constant 10 : index
    %30 = memref.load %arg1[%c10] : memref<48xi32, #tpu.memory_space<smem>>
    %c0_i32_20 = arith.constant 0 : i32
    %31 = tpu.memref_slice %arg2[%30, %c0_i32_20] : memref<1536x256xf32, #tpu.memory_space<any>> -> memref<1x256xf32, #tpu.memory_space<any>>
    %c10_i32 = arith.constant 10 : i32
    %c0_i32_21 = arith.constant 0 : i32
    %32 = tpu.memref_slice %arg6[%c10_i32, %c0_i32_21] : memref<48x256xf32, #tpu.memory_space<vmem>> -> memref<1x256xf32, #tpu.memory_space<vmem>>
    tpu.enqueue_dma source(%31 : memref<1x256xf32, #tpu.memory_space<any>>) target(%32 : memref<1x256xf32, #tpu.memory_space<vmem>>) target_semaphore(%arg7 : memref<!tpu.dma_semaphore, #tpu.memory_space<semaphore_mem>>)
    %c11 = arith.constant 11 : index
    %33 = memref.load %arg1[%c11] : memref<48xi32, #tpu.memory_space<smem>>
    %c0_i32_22 = arith.constant 0 : i32
    %34 = tpu.memref_slice %arg2[%33, %c0_i32_22] : memref<1536x256xf32, #tpu.memory_space<any>> -> memref<1x256xf32, #tpu.memory_space<any>>
    %c11_i32 = arith.constant 11 : i32
    %c0_i32_23 = arith.constant 0 : i32
    %35 = tpu.memref_slice %arg6[%c11_i32, %c0_i32_23] : memref<48x256xf32, #tpu.memory_space<vmem>> -> memref<1x256xf32, #tpu.memory_space<vmem>>
    tpu.enqueue_dma source(%34 : memref<1x256xf32, #tpu.memory_space<any>>) target(%35 : memref<1x256xf32, #tpu.memory_space<vmem>>) target_semaphore(%arg7 : memref<!tpu.dma_semaphore, #tpu.memory_space<semaphore_mem>>)
    %c12 = arith.constant 12 : index
    %36 = memref.load %arg1[%c12] : memref<48xi32, #tpu.memory_space<smem>>
    %c0_i32_24 = arith.constant 0 : i32
    %37 = tpu.memref_slice %arg2[%36, %c0_i32_24] : memref<1536x256xf32, #tpu.memory_space<any>> -> memref<1x256xf32, #tpu.memory_space<any>>
    %c12_i32 = arith.constant 12 : i32
    %c0_i32_25 = arith.constant 0 : i32
    %38 = tpu.memref_slice %arg6[%c12_i32, %c0_i32_25] : memref<48x256xf32, #tpu.memory_space<vmem>> -> memref<1x256xf32, #tpu.memory_space<vmem>>
    tpu.enqueue_dma source(%37 : memref<1x256xf32, #tpu.memory_space<any>>) target(%38 : memref<1x256xf32, #tpu.memory_space<vmem>>) target_semaphore(%arg7 : memref<!tpu.dma_semaphore, #tpu.memory_space<semaphore_mem>>)
    %c13 = arith.constant 13 : index
    %39 = memref.load %arg1[%c13] : memref<48xi32, #tpu.memory_space<smem>>
    %c0_i32_26 = arith.constant 0 : i32
    %40 = tpu.memref_slice %arg2[%39, %c0_i32_26] : memref<1536x256xf32, #tpu.memory_space<any>> -> memref<1x256xf32, #tpu.memory_space<any>>
    %c13_i32 = arith.constant 13 : i32
    %c0_i32_27 = arith.constant 0 : i32
    %41 = tpu.memref_slice %arg6[%c13_i32, %c0_i32_27] : memref<48x256xf32, #tpu.memory_space<vmem>> -> memref<1x256xf32, #tpu.memory_space<vmem>>
    tpu.enqueue_dma source(%40 : memref<1x256xf32, #tpu.memory_space<any>>) target(%41 : memref<1x256xf32, #tpu.memory_space<vmem>>) target_semaphore(%arg7 : memref<!tpu.dma_semaphore, #tpu.memory_space<semaphore_mem>>)
    %c14 = arith.constant 14 : index
    %42 = memref.load %arg1[%c14] : memref<48xi32, #tpu.memory_space<smem>>
    %c0_i32_28 = arith.constant 0 : i32
    %43 = tpu.memref_slice %arg2[%42, %c0_i32_28] : memref<1536x256xf32, #tpu.memory_space<any>> -> memref<1x256xf32, #tpu.memory_space<any>>
    %c14_i32 = arith.constant 14 : i32
    %c0_i32_29 = arith.constant 0 : i32
    %44 = tpu.memref_slice %arg6[%c14_i32, %c0_i32_29] : memref<48x256xf32, #tpu.memory_space<vmem>> -> memref<1x256xf32, #tpu.memory_space<vmem>>
    tpu.enqueue_dma source(%43 : memref<1x256xf32, #tpu.memory_space<any>>) target(%44 : memref<1x256xf32, #tpu.memory_space<vmem>>) target_semaphore(%arg7 : memref<!tpu.dma_semaphore, #tpu.memory_space<semaphore_mem>>)
    %c15 = arith.constant 15 : index
    %45 = memref.load %arg1[%c15] : memref<48xi32, #tpu.memory_space<smem>>
    %c0_i32_30 = arith.constant 0 : i32
    %46 = tpu.memref_slice %arg2[%45, %c0_i32_30] : memref<1536x256xf32, #tpu.memory_space<any>> -> memref<1x256xf32, #tpu.memory_space<any>>
    %c15_i32 = arith.constant 15 : i32
    %c0_i32_31 = arith.constant 0 : i32
    %47 = tpu.memref_slice %arg6[%c15_i32, %c0_i32_31] : memref<48x256xf32, #tpu.memory_space<vmem>> -> memref<1x256xf32, #tpu.memory_space<vmem>>
    tpu.enqueue_dma source(%46 : memref<1x256xf32, #tpu.memory_space<any>>) target(%47 : memref<1x256xf32, #tpu.memory_space<vmem>>) target_semaphore(%arg7 : memref<!tpu.dma_semaphore, #tpu.memory_space<semaphore_mem>>)
    %c16 = arith.constant 16 : index
    %48 = memref.load %arg1[%c16] : memref<48xi32, #tpu.memory_space<smem>>
    %c0_i32_32 = arith.constant 0 : i32
    %49 = tpu.memref_slice %arg2[%48, %c0_i32_32] : memref<1536x256xf32, #tpu.memory_space<any>> -> memref<1x256xf32, #tpu.memory_space<any>>
    %c16_i32 = arith.constant 16 : i32
    %c0_i32_33 = arith.constant 0 : i32
    %50 = tpu.memref_slice %arg6[%c16_i32, %c0_i32_33] : memref<48x256xf32, #tpu.memory_space<vmem>> -> memref<1x256xf32, #tpu.memory_space<vmem>>
    tpu.enqueue_dma source(%49 : memref<1x256xf32, #tpu.memory_space<any>>) target(%50 : memref<1x256xf32, #tpu.memory_space<vmem>>) target_semaphore(%arg7 : memref<!tpu.dma_semaphore, #tpu.memory_space<semaphore_mem>>)
    %c17 = arith.constant 17 : index
    %51 = memref.load %arg1[%c17] : memref<48xi32, #tpu.memory_space<smem>>
    %c0_i32_34 = arith.constant 0 : i32
    %52 = tpu.memref_slice %arg2[%51, %c0_i32_34] : memref<1536x256xf32, #tpu.memory_space<any>> -> memref<1x256xf32, #tpu.memory_space<any>>
    %c17_i32 = arith.constant 17 : i32
    %c0_i32_35 = arith.constant 0 : i32
    %53 = tpu.memref_slice %arg6[%c17_i32, %c0_i32_35] : memref<48x256xf32, #tpu.memory_space<vmem>> -> memref<1x256xf32, #tpu.memory_space<vmem>>
    tpu.enqueue_dma source(%52 : memref<1x256xf32, #tpu.memory_space<any>>) target(%53 : memref<1x256xf32, #tpu.memory_space<vmem>>) target_semaphore(%arg7 : memref<!tpu.dma_semaphore, #tpu.memory_space<semaphore_mem>>)
    %c18 = arith.constant 18 : index
    %54 = memref.load %arg1[%c18] : memref<48xi32, #tpu.memory_space<smem>>
    %c0_i32_36 = arith.constant 0 : i32
    %55 = tpu.memref_slice %arg2[%54, %c0_i32_36] : memref<1536x256xf32, #tpu.memory_space<any>> -> memref<1x256xf32, #tpu.memory_space<any>>
    %c18_i32 = arith.constant 18 : i32
    %c0_i32_37 = arith.constant 0 : i32
    %56 = tpu.memref_slice %arg6[%c18_i32, %c0_i32_37] : memref<48x256xf32, #tpu.memory_space<vmem>> -> memref<1x256xf32, #tpu.memory_space<vmem>>
    tpu.enqueue_dma source(%55 : memref<1x256xf32, #tpu.memory_space<any>>) target(%56 : memref<1x256xf32, #tpu.memory_space<vmem>>) target_semaphore(%arg7 : memref<!tpu.dma_semaphore, #tpu.memory_space<semaphore_mem>>)
    %c19 = arith.constant 19 : index
    %57 = memref.load %arg1[%c19] : memref<48xi32, #tpu.memory_space<smem>>
    %c0_i32_38 = arith.constant 0 : i32
    %58 = tpu.memref_slice %arg2[%57, %c0_i32_38] : memref<1536x256xf32, #tpu.memory_space<any>> -> memref<1x256xf32, #tpu.memory_space<any>>
    %c19_i32 = arith.constant 19 : i32
    %c0_i32_39 = arith.constant 0 : i32
    %59 = tpu.memref_slice %arg6[%c19_i32, %c0_i32_39] : memref<48x256xf32, #tpu.memory_space<vmem>> -> memref<1x256xf32, #tpu.memory_space<vmem>>
    tpu.enqueue_dma source(%58 : memref<1x256xf32, #tpu.memory_space<any>>) target(%59 : memref<1x256xf32, #tpu.memory_space<vmem>>) target_semaphore(%arg7 : memref<!tpu.dma_semaphore, #tpu.memory_space<semaphore_mem>>)
    %c20 = arith.constant 20 : index
    %60 = memref.load %arg1[%c20] : memref<48xi32, #tpu.memory_space<smem>>
    %c0_i32_40 = arith.constant 0 : i32
    %61 = tpu.memref_slice %arg2[%60, %c0_i32_40] : memref<1536x256xf32, #tpu.memory_space<any>> -> memref<1x256xf32, #tpu.memory_space<any>>
    %c20_i32 = arith.constant 20 : i32
    %c0_i32_41 = arith.constant 0 : i32
    %62 = tpu.memref_slice %arg6[%c20_i32, %c0_i32_41] : memref<48x256xf32, #tpu.memory_space<vmem>> -> memref<1x256xf32, #tpu.memory_space<vmem>>
    tpu.enqueue_dma source(%61 : memref<1x256xf32, #tpu.memory_space<any>>) target(%62 : memref<1x256xf32, #tpu.memory_space<vmem>>) target_semaphore(%arg7 : memref<!tpu.dma_semaphore, #tpu.memory_space<semaphore_mem>>)
    %c21 = arith.constant 21 : index
    %63 = memref.load %arg1[%c21] : memref<48xi32, #tpu.memory_space<smem>>
    %c0_i32_42 = arith.constant 0 : i32
    %64 = tpu.memref_slice %arg2[%63, %c0_i32_42] : memref<1536x256xf32, #tpu.memory_space<any>> -> memref<1x256xf32, #tpu.memory_space<any>>
    %c21_i32 = arith.constant 21 : i32
    %c0_i32_43 = arith.constant 0 : i32
    %65 = tpu.memref_slice %arg6[%c21_i32, %c0_i32_43] : memref<48x256xf32, #tpu.memory_space<vmem>> -> memref<1x256xf32, #tpu.memory_space<vmem>>
    tpu.enqueue_dma source(%64 : memref<1x256xf32, #tpu.memory_space<any>>) target(%65 : memref<1x256xf32, #tpu.memory_space<vmem>>) target_semaphore(%arg7 : memref<!tpu.dma_semaphore, #tpu.memory_space<semaphore_mem>>)
    %c22 = arith.constant 22 : index
    %66 = memref.load %arg1[%c22] : memref<48xi32, #tpu.memory_space<smem>>
    %c0_i32_44 = arith.constant 0 : i32
    %67 = tpu.memref_slice %arg2[%66, %c0_i32_44] : memref<1536x256xf32, #tpu.memory_space<any>> -> memref<1x256xf32, #tpu.memory_space<any>>
    %c22_i32 = arith.constant 22 : i32
    %c0_i32_45 = arith.constant 0 : i32
    %68 = tpu.memref_slice %arg6[%c22_i32, %c0_i32_45] : memref<48x256xf32, #tpu.memory_space<vmem>> -> memref<1x256xf32, #tpu.memory_space<vmem>>
    tpu.enqueue_dma source(%67 : memref<1x256xf32, #tpu.memory_space<any>>) target(%68 : memref<1x256xf32, #tpu.memory_space<vmem>>) target_semaphore(%arg7 : memref<!tpu.dma_semaphore, #tpu.memory_space<semaphore_mem>>)
    %c23 = arith.constant 23 : index
    %69 = memref.load %arg1[%c23] : memref<48xi32, #tpu.memory_space<smem>>
    %c0_i32_46 = arith.constant 0 : i32
    %70 = tpu.memref_slice %arg2[%69, %c0_i32_46] : memref<1536x256xf32, #tpu.memory_space<any>> -> memref<1x256xf32, #tpu.memory_space<any>>
    %c23_i32 = arith.constant 23 : i32
    %c0_i32_47 = arith.constant 0 : i32
    %71 = tpu.memref_slice %arg6[%c23_i32, %c0_i32_47] : memref<48x256xf32, #tpu.memory_space<vmem>> -> memref<1x256xf32, #tpu.memory_space<vmem>>
    tpu.enqueue_dma source(%70 : memref<1x256xf32, #tpu.memory_space<any>>) target(%71 : memref<1x256xf32, #tpu.memory_space<vmem>>) target_semaphore(%arg7 : memref<!tpu.dma_semaphore, #tpu.memory_space<semaphore_mem>>)
    %c24 = arith.constant 24 : index
    %72 = memref.load %arg1[%c24] : memref<48xi32, #tpu.memory_space<smem>>
    %c0_i32_48 = arith.constant 0 : i32
    %73 = tpu.memref_slice %arg2[%72, %c0_i32_48] : memref<1536x256xf32, #tpu.memory_space<any>> -> memref<1x256xf32, #tpu.memory_space<any>>
    %c24_i32 = arith.constant 24 : i32
    %c0_i32_49 = arith.constant 0 : i32
    %74 = tpu.memref_slice %arg6[%c24_i32, %c0_i32_49] : memref<48x256xf32, #tpu.memory_space<vmem>> -> memref<1x256xf32, #tpu.memory_space<vmem>>
    tpu.enqueue_dma source(%73 : memref<1x256xf32, #tpu.memory_space<any>>) target(%74 : memref<1x256xf32, #tpu.memory_space<vmem>>) target_semaphore(%arg7 : memref<!tpu.dma_semaphore, #tpu.memory_space<semaphore_mem>>)
    %c25 = arith.constant 25 : index
    %75 = memref.load %arg1[%c25] : memref<48xi32, #tpu.memory_space<smem>>
    %c0_i32_50 = arith.constant 0 : i32
    %76 = tpu.memref_slice %arg2[%75, %c0_i32_50] : memref<1536x256xf32, #tpu.memory_space<any>> -> memref<1x256xf32, #tpu.memory_space<any>>
    %c25_i32 = arith.constant 25 : i32
    %c0_i32_51 = arith.constant 0 : i32
    %77 = tpu.memref_slice %arg6[%c25_i32, %c0_i32_51] : memref<48x256xf32, #tpu.memory_space<vmem>> -> memref<1x256xf32, #tpu.memory_space<vmem>>
    tpu.enqueue_dma source(%76 : memref<1x256xf32, #tpu.memory_space<any>>) target(%77 : memref<1x256xf32, #tpu.memory_space<vmem>>) target_semaphore(%arg7 : memref<!tpu.dma_semaphore, #tpu.memory_space<semaphore_mem>>)
    %c26 = arith.constant 26 : index
    %78 = memref.load %arg1[%c26] : memref<48xi32, #tpu.memory_space<smem>>
    %c0_i32_52 = arith.constant 0 : i32
    %79 = tpu.memref_slice %arg2[%78, %c0_i32_52] : memref<1536x256xf32, #tpu.memory_space<any>> -> memref<1x256xf32, #tpu.memory_space<any>>
    %c26_i32 = arith.constant 26 : i32
    %c0_i32_53 = arith.constant 0 : i32
    %80 = tpu.memref_slice %arg6[%c26_i32, %c0_i32_53] : memref<48x256xf32, #tpu.memory_space<vmem>> -> memref<1x256xf32, #tpu.memory_space<vmem>>
    tpu.enqueue_dma source(%79 : memref<1x256xf32, #tpu.memory_space<any>>) target(%80 : memref<1x256xf32, #tpu.memory_space<vmem>>) target_semaphore(%arg7 : memref<!tpu.dma_semaphore, #tpu.memory_space<semaphore_mem>>)
    %c27 = arith.constant 27 : index
    %81 = memref.load %arg1[%c27] : memref<48xi32, #tpu.memory_space<smem>>
    %c0_i32_54 = arith.constant 0 : i32
    %82 = tpu.memref_slice %arg2[%81, %c0_i32_54] : memref<1536x256xf32, #tpu.memory_space<any>> -> memref<1x256xf32, #tpu.memory_space<any>>
    %c27_i32 = arith.constant 27 : i32
    %c0_i32_55 = arith.constant 0 : i32
    %83 = tpu.memref_slice %arg6[%c27_i32, %c0_i32_55] : memref<48x256xf32, #tpu.memory_space<vmem>> -> memref<1x256xf32, #tpu.memory_space<vmem>>
    tpu.enqueue_dma source(%82 : memref<1x256xf32, #tpu.memory_space<any>>) target(%83 : memref<1x256xf32, #tpu.memory_space<vmem>>) target_semaphore(%arg7 : memref<!tpu.dma_semaphore, #tpu.memory_space<semaphore_mem>>)
    %c28 = arith.constant 28 : index
    %84 = memref.load %arg1[%c28] : memref<48xi32, #tpu.memory_space<smem>>
    %c0_i32_56 = arith.constant 0 : i32
    %85 = tpu.memref_slice %arg2[%84, %c0_i32_56] : memref<1536x256xf32, #tpu.memory_space<any>> -> memref<1x256xf32, #tpu.memory_space<any>>
    %c28_i32 = arith.constant 28 : i32
    %c0_i32_57 = arith.constant 0 : i32
    %86 = tpu.memref_slice %arg6[%c28_i32, %c0_i32_57] : memref<48x256xf32, #tpu.memory_space<vmem>> -> memref<1x256xf32, #tpu.memory_space<vmem>>
    tpu.enqueue_dma source(%85 : memref<1x256xf32, #tpu.memory_space<any>>) target(%86 : memref<1x256xf32, #tpu.memory_space<vmem>>) target_semaphore(%arg7 : memref<!tpu.dma_semaphore, #tpu.memory_space<semaphore_mem>>)
    %c29 = arith.constant 29 : index
    %87 = memref.load %arg1[%c29] : memref<48xi32, #tpu.memory_space<smem>>
    %c0_i32_58 = arith.constant 0 : i32
    %88 = tpu.memref_slice %arg2[%87, %c0_i32_58] : memref<1536x256xf32, #tpu.memory_space<any>> -> memref<1x256xf32, #tpu.memory_space<any>>
    %c29_i32 = arith.constant 29 : i32
    %c0_i32_59 = arith.constant 0 : i32
    %89 = tpu.memref_slice %arg6[%c29_i32, %c0_i32_59] : memref<48x256xf32, #tpu.memory_space<vmem>> -> memref<1x256xf32, #tpu.memory_space<vmem>>
    tpu.enqueue_dma source(%88 : memref<1x256xf32, #tpu.memory_space<any>>) target(%89 : memref<1x256xf32, #tpu.memory_space<vmem>>) target_semaphore(%arg7 : memref<!tpu.dma_semaphore, #tpu.memory_space<semaphore_mem>>)
    %c30 = arith.constant 30 : index
    %90 = memref.load %arg1[%c30] : memref<48xi32, #tpu.memory_space<smem>>
    %c0_i32_60 = arith.constant 0 : i32
    %91 = tpu.memref_slice %arg2[%90, %c0_i32_60] : memref<1536x256xf32, #tpu.memory_space<any>> -> memref<1x256xf32, #tpu.memory_space<any>>
    %c30_i32 = arith.constant 30 : i32
    %c0_i32_61 = arith.constant 0 : i32
    %92 = tpu.memref_slice %arg6[%c30_i32, %c0_i32_61] : memref<48x256xf32, #tpu.memory_space<vmem>> -> memref<1x256xf32, #tpu.memory_space<vmem>>
    tpu.enqueue_dma source(%91 : memref<1x256xf32, #tpu.memory_space<any>>) target(%92 : memref<1x256xf32, #tpu.memory_space<vmem>>) target_semaphore(%arg7 : memref<!tpu.dma_semaphore, #tpu.memory_space<semaphore_mem>>)
    %c31 = arith.constant 31 : index
    %93 = memref.load %arg1[%c31] : memref<48xi32, #tpu.memory_space<smem>>
    %c0_i32_62 = arith.constant 0 : i32
    %94 = tpu.memref_slice %arg2[%93, %c0_i32_62] : memref<1536x256xf32, #tpu.memory_space<any>> -> memref<1x256xf32, #tpu.memory_space<any>>
    %c31_i32 = arith.constant 31 : i32
    %c0_i32_63 = arith.constant 0 : i32
    %95 = tpu.memref_slice %arg6[%c31_i32, %c0_i32_63] : memref<48x256xf32, #tpu.memory_space<vmem>> -> memref<1x256xf32, #tpu.memory_space<vmem>>
    tpu.enqueue_dma source(%94 : memref<1x256xf32, #tpu.memory_space<any>>) target(%95 : memref<1x256xf32, #tpu.memory_space<vmem>>) target_semaphore(%arg7 : memref<!tpu.dma_semaphore, #tpu.memory_space<semaphore_mem>>)
    %c32 = arith.constant 32 : index
    %96 = memref.load %arg1[%c32] : memref<48xi32, #tpu.memory_space<smem>>
    %c0_i32_64 = arith.constant 0 : i32
    %97 = tpu.memref_slice %arg2[%96, %c0_i32_64] : memref<1536x256xf32, #tpu.memory_space<any>> -> memref<1x256xf32, #tpu.memory_space<any>>
    %c32_i32 = arith.constant 32 : i32
    %c0_i32_65 = arith.constant 0 : i32
    %98 = tpu.memref_slice %arg6[%c32_i32, %c0_i32_65] : memref<48x256xf32, #tpu.memory_space<vmem>> -> memref<1x256xf32, #tpu.memory_space<vmem>>
    tpu.enqueue_dma source(%97 : memref<1x256xf32, #tpu.memory_space<any>>) target(%98 : memref<1x256xf32, #tpu.memory_space<vmem>>) target_semaphore(%arg7 : memref<!tpu.dma_semaphore, #tpu.memory_space<semaphore_mem>>)
    %c33 = arith.constant 33 : index
    %99 = memref.load %arg1[%c33] : memref<48xi32, #tpu.memory_space<smem>>
    %c0_i32_66 = arith.constant 0 : i32
    %100 = tpu.memref_slice %arg2[%99, %c0_i32_66] : memref<1536x256xf32, #tpu.memory_space<any>> -> memref<1x256xf32, #tpu.memory_space<any>>
    %c33_i32 = arith.constant 33 : i32
    %c0_i32_67 = arith.constant 0 : i32
    %101 = tpu.memref_slice %arg6[%c33_i32, %c0_i32_67] : memref<48x256xf32, #tpu.memory_space<vmem>> -> memref<1x256xf32, #tpu.memory_space<vmem>>
    tpu.enqueue_dma source(%100 : memref<1x256xf32, #tpu.memory_space<any>>) target(%101 : memref<1x256xf32, #tpu.memory_space<vmem>>) target_semaphore(%arg7 : memref<!tpu.dma_semaphore, #tpu.memory_space<semaphore_mem>>)
    %c34 = arith.constant 34 : index
    %102 = memref.load %arg1[%c34] : memref<48xi32, #tpu.memory_space<smem>>
    %c0_i32_68 = arith.constant 0 : i32
    %103 = tpu.memref_slice %arg2[%102, %c0_i32_68] : memref<1536x256xf32, #tpu.memory_space<any>> -> memref<1x256xf32, #tpu.memory_space<any>>
    %c34_i32 = arith.constant 34 : i32
    %c0_i32_69 = arith.constant 0 : i32
    %104 = tpu.memref_slice %arg6[%c34_i32, %c0_i32_69] : memref<48x256xf32, #tpu.memory_space<vmem>> -> memref<1x256xf32, #tpu.memory_space<vmem>>
    tpu.enqueue_dma source(%103 : memref<1x256xf32, #tpu.memory_space<any>>) target(%104 : memref<1x256xf32, #tpu.memory_space<vmem>>) target_semaphore(%arg7 : memref<!tpu.dma_semaphore, #tpu.memory_space<semaphore_mem>>)
    %c35 = arith.constant 35 : index
    %105 = memref.load %arg1[%c35] : memref<48xi32, #tpu.memory_space<smem>>
    %c0_i32_70 = arith.constant 0 : i32
    %106 = tpu.memref_slice %arg2[%105, %c0_i32_70] : memref<1536x256xf32, #tpu.memory_space<any>> -> memref<1x256xf32, #tpu.memory_space<any>>
    %c35_i32 = arith.constant 35 : i32
    %c0_i32_71 = arith.constant 0 : i32
    %107 = tpu.memref_slice %arg6[%c35_i32, %c0_i32_71] : memref<48x256xf32, #tpu.memory_space<vmem>> -> memref<1x256xf32, #tpu.memory_space<vmem>>
    tpu.enqueue_dma source(%106 : memref<1x256xf32, #tpu.memory_space<any>>) target(%107 : memref<1x256xf32, #tpu.memory_space<vmem>>) target_semaphore(%arg7 : memref<!tpu.dma_semaphore, #tpu.memory_space<semaphore_mem>>)
    %c36 = arith.constant 36 : index
    %108 = memref.load %arg1[%c36] : memref<48xi32, #tpu.memory_space<smem>>
    %c0_i32_72 = arith.constant 0 : i32
    %109 = tpu.memref_slice %arg2[%108, %c0_i32_72] : memref<1536x256xf32, #tpu.memory_space<any>> -> memref<1x256xf32, #tpu.memory_space<any>>
    %c36_i32 = arith.constant 36 : i32
    %c0_i32_73 = arith.constant 0 : i32
    %110 = tpu.memref_slice %arg6[%c36_i32, %c0_i32_73] : memref<48x256xf32, #tpu.memory_space<vmem>> -> memref<1x256xf32, #tpu.memory_space<vmem>>
    tpu.enqueue_dma source(%109 : memref<1x256xf32, #tpu.memory_space<any>>) target(%110 : memref<1x256xf32, #tpu.memory_space<vmem>>) target_semaphore(%arg7 : memref<!tpu.dma_semaphore, #tpu.memory_space<semaphore_mem>>)
    %c37 = arith.constant 37 : index
    %111 = memref.load %arg1[%c37] : memref<48xi32, #tpu.memory_space<smem>>
    %c0_i32_74 = arith.constant 0 : i32
    %112 = tpu.memref_slice %arg2[%111, %c0_i32_74] : memref<1536x256xf32, #tpu.memory_space<any>> -> memref<1x256xf32, #tpu.memory_space<any>>
    %c37_i32 = arith.constant 37 : i32
    %c0_i32_75 = arith.constant 0 : i32
    %113 = tpu.memref_slice %arg6[%c37_i32, %c0_i32_75] : memref<48x256xf32, #tpu.memory_space<vmem>> -> memref<1x256xf32, #tpu.memory_space<vmem>>
    tpu.enqueue_dma source(%112 : memref<1x256xf32, #tpu.memory_space<any>>) target(%113 : memref<1x256xf32, #tpu.memory_space<vmem>>) target_semaphore(%arg7 : memref<!tpu.dma_semaphore, #tpu.memory_space<semaphore_mem>>)
    %c38 = arith.constant 38 : index
    %114 = memref.load %arg1[%c38] : memref<48xi32, #tpu.memory_space<smem>>
    %c0_i32_76 = arith.constant 0 : i32
    %115 = tpu.memref_slice %arg2[%114, %c0_i32_76] : memref<1536x256xf32, #tpu.memory_space<any>> -> memref<1x256xf32, #tpu.memory_space<any>>
    %c38_i32 = arith.constant 38 : i32
    %c0_i32_77 = arith.constant 0 : i32
    %116 = tpu.memref_slice %arg6[%c38_i32, %c0_i32_77] : memref<48x256xf32, #tpu.memory_space<vmem>> -> memref<1x256xf32, #tpu.memory_space<vmem>>
    tpu.enqueue_dma source(%115 : memref<1x256xf32, #tpu.memory_space<any>>) target(%116 : memref<1x256xf32, #tpu.memory_space<vmem>>) target_semaphore(%arg7 : memref<!tpu.dma_semaphore, #tpu.memory_space<semaphore_mem>>)
    %c39 = arith.constant 39 : index
    %117 = memref.load %arg1[%c39] : memref<48xi32, #tpu.memory_space<smem>>
    %c0_i32_78 = arith.constant 0 : i32
    %118 = tpu.memref_slice %arg2[%117, %c0_i32_78] : memref<1536x256xf32, #tpu.memory_space<any>> -> memref<1x256xf32, #tpu.memory_space<any>>
    %c39_i32 = arith.constant 39 : i32
    %c0_i32_79 = arith.constant 0 : i32
    %119 = tpu.memref_slice %arg6[%c39_i32, %c0_i32_79] : memref<48x256xf32, #tpu.memory_space<vmem>> -> memref<1x256xf32, #tpu.memory_space<vmem>>
    tpu.enqueue_dma source(%118 : memref<1x256xf32, #tpu.memory_space<any>>) target(%119 : memref<1x256xf32, #tpu.memory_space<vmem>>) target_semaphore(%arg7 : memref<!tpu.dma_semaphore, #tpu.memory_space<semaphore_mem>>)
    %c40 = arith.constant 40 : index
    %120 = memref.load %arg1[%c40] : memref<48xi32, #tpu.memory_space<smem>>
    %c0_i32_80 = arith.constant 0 : i32
    %121 = tpu.memref_slice %arg2[%120, %c0_i32_80] : memref<1536x256xf32, #tpu.memory_space<any>> -> memref<1x256xf32, #tpu.memory_space<any>>
    %c40_i32 = arith.constant 40 : i32
    %c0_i32_81 = arith.constant 0 : i32
    %122 = tpu.memref_slice %arg6[%c40_i32, %c0_i32_81] : memref<48x256xf32, #tpu.memory_space<vmem>> -> memref<1x256xf32, #tpu.memory_space<vmem>>
    tpu.enqueue_dma source(%121 : memref<1x256xf32, #tpu.memory_space<any>>) target(%122 : memref<1x256xf32, #tpu.memory_space<vmem>>) target_semaphore(%arg7 : memref<!tpu.dma_semaphore, #tpu.memory_space<semaphore_mem>>)
    %c41 = arith.constant 41 : index
    %123 = memref.load %arg1[%c41] : memref<48xi32, #tpu.memory_space<smem>>
    %c0_i32_82 = arith.constant 0 : i32
    %124 = tpu.memref_slice %arg2[%123, %c0_i32_82] : memref<1536x256xf32, #tpu.memory_space<any>> -> memref<1x256xf32, #tpu.memory_space<any>>
    %c41_i32 = arith.constant 41 : i32
    %c0_i32_83 = arith.constant 0 : i32
    %125 = tpu.memref_slice %arg6[%c41_i32, %c0_i32_83] : memref<48x256xf32, #tpu.memory_space<vmem>> -> memref<1x256xf32, #tpu.memory_space<vmem>>
    tpu.enqueue_dma source(%124 : memref<1x256xf32, #tpu.memory_space<any>>) target(%125 : memref<1x256xf32, #tpu.memory_space<vmem>>) target_semaphore(%arg7 : memref<!tpu.dma_semaphore, #tpu.memory_space<semaphore_mem>>)
    %c42 = arith.constant 42 : index
    %126 = memref.load %arg1[%c42] : memref<48xi32, #tpu.memory_space<smem>>
    %c0_i32_84 = arith.constant 0 : i32
    %127 = tpu.memref_slice %arg2[%126, %c0_i32_84] : memref<1536x256xf32, #tpu.memory_space<any>> -> memref<1x256xf32, #tpu.memory_space<any>>
    %c42_i32 = arith.constant 42 : i32
    %c0_i32_85 = arith.constant 0 : i32
    %128 = tpu.memref_slice %arg6[%c42_i32, %c0_i32_85] : memref<48x256xf32, #tpu.memory_space<vmem>> -> memref<1x256xf32, #tpu.memory_space<vmem>>
    tpu.enqueue_dma source(%127 : memref<1x256xf32, #tpu.memory_space<any>>) target(%128 : memref<1x256xf32, #tpu.memory_space<vmem>>) target_semaphore(%arg7 : memref<!tpu.dma_semaphore, #tpu.memory_space<semaphore_mem>>)
    %c43 = arith.constant 43 : index
    %129 = memref.load %arg1[%c43] : memref<48xi32, #tpu.memory_space<smem>>
    %c0_i32_86 = arith.constant 0 : i32
    %130 = tpu.memref_slice %arg2[%129, %c0_i32_86] : memref<1536x256xf32, #tpu.memory_space<any>> -> memref<1x256xf32, #tpu.memory_space<any>>
    %c43_i32 = arith.constant 43 : i32
    %c0_i32_87 = arith.constant 0 : i32
    %131 = tpu.memref_slice %arg6[%c43_i32, %c0_i32_87] : memref<48x256xf32, #tpu.memory_space<vmem>> -> memref<1x256xf32, #tpu.memory_space<vmem>>
    tpu.enqueue_dma source(%130 : memref<1x256xf32, #tpu.memory_space<any>>) target(%131 : memref<1x256xf32, #tpu.memory_space<vmem>>) target_semaphore(%arg7 : memref<!tpu.dma_semaphore, #tpu.memory_space<semaphore_mem>>)
    %c44 = arith.constant 44 : index
    %132 = memref.load %arg1[%c44] : memref<48xi32, #tpu.memory_space<smem>>
    %c0_i32_88 = arith.constant 0 : i32
    %133 = tpu.memref_slice %arg2[%132, %c0_i32_88] : memref<1536x256xf32, #tpu.memory_space<any>> -> memref<1x256xf32, #tpu.memory_space<any>>
    %c44_i32 = arith.constant 44 : i32
    %c0_i32_89 = arith.constant 0 : i32
    %134 = tpu.memref_slice %arg6[%c44_i32, %c0_i32_89] : memref<48x256xf32, #tpu.memory_space<vmem>> -> memref<1x256xf32, #tpu.memory_space<vmem>>
    tpu.enqueue_dma source(%133 : memref<1x256xf32, #tpu.memory_space<any>>) target(%134 : memref<1x256xf32, #tpu.memory_space<vmem>>) target_semaphore(%arg7 : memref<!tpu.dma_semaphore, #tpu.memory_space<semaphore_mem>>)
    %c45 = arith.constant 45 : index
    %135 = memref.load %arg1[%c45] : memref<48xi32, #tpu.memory_space<smem>>
    %c0_i32_90 = arith.constant 0 : i32
    %136 = tpu.memref_slice %arg2[%135, %c0_i32_90] : memref<1536x256xf32, #tpu.memory_space<any>> -> memref<1x256xf32, #tpu.memory_space<any>>
    %c45_i32 = arith.constant 45 : i32
    %c0_i32_91 = arith.constant 0 : i32
    %137 = tpu.memref_slice %arg6[%c45_i32, %c0_i32_91] : memref<48x256xf32, #tpu.memory_space<vmem>> -> memref<1x256xf32, #tpu.memory_space<vmem>>
    tpu.enqueue_dma source(%136 : memref<1x256xf32, #tpu.memory_space<any>>) target(%137 : memref<1x256xf32, #tpu.memory_space<vmem>>) target_semaphore(%arg7 : memref<!tpu.dma_semaphore, #tpu.memory_space<semaphore_mem>>)
    %c46 = arith.constant 46 : index
    %138 = memref.load %arg1[%c46] : memref<48xi32, #tpu.memory_space<smem>>
    %c0_i32_92 = arith.constant 0 : i32
    %139 = tpu.memref_slice %arg2[%138, %c0_i32_92] : memref<1536x256xf32, #tpu.memory_space<any>> -> memref<1x256xf32, #tpu.memory_space<any>>
    %c46_i32 = arith.constant 46 : i32
    %c0_i32_93 = arith.constant 0 : i32
    %140 = tpu.memref_slice %arg6[%c46_i32, %c0_i32_93] : memref<48x256xf32, #tpu.memory_space<vmem>> -> memref<1x256xf32, #tpu.memory_space<vmem>>
    tpu.enqueue_dma source(%139 : memref<1x256xf32, #tpu.memory_space<any>>) target(%140 : memref<1x256xf32, #tpu.memory_space<vmem>>) target_semaphore(%arg7 : memref<!tpu.dma_semaphore, #tpu.memory_space<semaphore_mem>>)
    %c47 = arith.constant 47 : index
    %141 = memref.load %arg1[%c47] : memref<48xi32, #tpu.memory_space<smem>>
    %c0_i32_94 = arith.constant 0 : i32
    %142 = tpu.memref_slice %arg2[%141, %c0_i32_94] : memref<1536x256xf32, #tpu.memory_space<any>> -> memref<1x256xf32, #tpu.memory_space<any>>
    %c47_i32 = arith.constant 47 : i32
    %c0_i32_95 = arith.constant 0 : i32
    %143 = tpu.memref_slice %arg6[%c47_i32, %c0_i32_95] : memref<48x256xf32, #tpu.memory_space<vmem>> -> memref<1x256xf32, #tpu.memory_space<vmem>>
    tpu.enqueue_dma source(%142 : memref<1x256xf32, #tpu.memory_space<any>>) target(%143 : memref<1x256xf32, #tpu.memory_space<vmem>>) target_semaphore(%arg7 : memref<!tpu.dma_semaphore, #tpu.memory_space<semaphore_mem>>)
    %c0_i32_96 = arith.constant 0 : i32
    %144 = tpu.memref_slice %arg2[%0, %c0_i32_96] : memref<1536x256xf32, #tpu.memory_space<any>> -> memref<1x256xf32, #tpu.memory_space<any>>
    %c0_i32_97 = arith.constant 0 : i32
    %c0_i32_98 = arith.constant 0 : i32
    %145 = tpu.memref_slice %arg6[%c0_i32_97, %c0_i32_98] : memref<48x256xf32, #tpu.memory_space<vmem>> -> memref<1x256xf32, #tpu.memory_space<vmem>>
    tpu.wait_dma2 semaphore(%arg7 : memref<!tpu.dma_semaphore, #tpu.memory_space<semaphore_mem>>) src(%144 : memref<1x256xf32, #tpu.memory_space<any>>) dst(%145 : memref<1x256xf32, #tpu.memory_space<vmem>>)
    %c0_i32_99 = arith.constant 0 : i32
    %146 = tpu.memref_slice %arg2[%3, %c0_i32_99] : memref<1536x256xf32, #tpu.memory_space<any>> -> memref<1x256xf32, #tpu.memory_space<any>>
    %c1_i32_100 = arith.constant 1 : i32
    %c0_i32_101 = arith.constant 0 : i32
    %147 = tpu.memref_slice %arg6[%c1_i32_100, %c0_i32_101] : memref<48x256xf32, #tpu.memory_space<vmem>> -> memref<1x256xf32, #tpu.memory_space<vmem>>
    tpu.wait_dma2 semaphore(%arg7 : memref<!tpu.dma_semaphore, #tpu.memory_space<semaphore_mem>>) src(%146 : memref<1x256xf32, #tpu.memory_space<any>>) dst(%147 : memref<1x256xf32, #tpu.memory_space<vmem>>)
    %c0_i32_102 = arith.constant 0 : i32
    %148 = tpu.memref_slice %arg2[%6, %c0_i32_102] : memref<1536x256xf32, #tpu.memory_space<any>> -> memref<1x256xf32, #tpu.memory_space<any>>
    %c2_i32_103 = arith.constant 2 : i32
    %c0_i32_104 = arith.constant 0 : i32
    %149 = tpu.memref_slice %arg6[%c2_i32_103, %c0_i32_104] : memref<48x256xf32, #tpu.memory_space<vmem>> -> memref<1x256xf32, #tpu.memory_space<vmem>>
    tpu.wait_dma2 semaphore(%arg7 : memref<!tpu.dma_semaphore, #tpu.memory_space<semaphore_mem>>) src(%148 : memref<1x256xf32, #tpu.memory_space<any>>) dst(%149 : memref<1x256xf32, #tpu.memory_space<vmem>>)
    %c0_i32_105 = arith.constant 0 : i32
    %150 = tpu.memref_slice %arg2[%9, %c0_i32_105] : memref<1536x256xf32, #tpu.memory_space<any>> -> memref<1x256xf32, #tpu.memory_space<any>>
    %c3_i32_106 = arith.constant 3 : i32
    %c0_i32_107 = arith.constant 0 : i32
    %151 = tpu.memref_slice %arg6[%c3_i32_106, %c0_i32_107] : memref<48x256xf32, #tpu.memory_space<vmem>> -> memref<1x256xf32, #tpu.memory_space<vmem>>
    tpu.wait_dma2 semaphore(%arg7 : memref<!tpu.dma_semaphore, #tpu.memory_space<semaphore_mem>>) src(%150 : memref<1x256xf32, #tpu.memory_space<any>>) dst(%151 : memref<1x256xf32, #tpu.memory_space<vmem>>)
    %c0_i32_108 = arith.constant 0 : i32
    %152 = tpu.memref_slice %arg2[%12, %c0_i32_108] : memref<1536x256xf32, #tpu.memory_space<any>> -> memref<1x256xf32, #tpu.memory_space<any>>
    %c4_i32_109 = arith.constant 4 : i32
    %c0_i32_110 = arith.constant 0 : i32
    %153 = tpu.memref_slice %arg6[%c4_i32_109, %c0_i32_110] : memref<48x256xf32, #tpu.memory_space<vmem>> -> memref<1x256xf32, #tpu.memory_space<vmem>>
    tpu.wait_dma2 semaphore(%arg7 : memref<!tpu.dma_semaphore, #tpu.memory_space<semaphore_mem>>) src(%152 : memref<1x256xf32, #tpu.memory_space<any>>) dst(%153 : memref<1x256xf32, #tpu.memory_space<vmem>>)
    %c0_i32_111 = arith.constant 0 : i32
    %154 = tpu.memref_slice %arg2[%15, %c0_i32_111] : memref<1536x256xf32, #tpu.memory_space<any>> -> memref<1x256xf32, #tpu.memory_space<any>>
    %c5_i32_112 = arith.constant 5 : i32
    %c0_i32_113 = arith.constant 0 : i32
    %155 = tpu.memref_slice %arg6[%c5_i32_112, %c0_i32_113] : memref<48x256xf32, #tpu.memory_space<vmem>> -> memref<1x256xf32, #tpu.memory_space<vmem>>
    tpu.wait_dma2 semaphore(%arg7 : memref<!tpu.dma_semaphore, #tpu.memory_space<semaphore_mem>>) src(%154 : memref<1x256xf32, #tpu.memory_space<any>>) dst(%155 : memref<1x256xf32, #tpu.memory_space<vmem>>)
    %c0_i32_114 = arith.constant 0 : i32
    %156 = tpu.memref_slice %arg2[%18, %c0_i32_114] : memref<1536x256xf32, #tpu.memory_space<any>> -> memref<1x256xf32, #tpu.memory_space<any>>
    %c6_i32_115 = arith.constant 6 : i32
    %c0_i32_116 = arith.constant 0 : i32
    %157 = tpu.memref_slice %arg6[%c6_i32_115, %c0_i32_116] : memref<48x256xf32, #tpu.memory_space<vmem>> -> memref<1x256xf32, #tpu.memory_space<vmem>>
    tpu.wait_dma2 semaphore(%arg7 : memref<!tpu.dma_semaphore, #tpu.memory_space<semaphore_mem>>) src(%156 : memref<1x256xf32, #tpu.memory_space<any>>) dst(%157 : memref<1x256xf32, #tpu.memory_space<vmem>>)
    %c0_i32_117 = arith.constant 0 : i32
    %158 = tpu.memref_slice %arg2[%21, %c0_i32_117] : memref<1536x256xf32, #tpu.memory_space<any>> -> memref<1x256xf32, #tpu.memory_space<any>>
    %c7_i32_118 = arith.constant 7 : i32
    %c0_i32_119 = arith.constant 0 : i32
    %159 = tpu.memref_slice %arg6[%c7_i32_118, %c0_i32_119] : memref<48x256xf32, #tpu.memory_space<vmem>> -> memref<1x256xf32, #tpu.memory_space<vmem>>
    tpu.wait_dma2 semaphore(%arg7 : memref<!tpu.dma_semaphore, #tpu.memory_space<semaphore_mem>>) src(%158 : memref<1x256xf32, #tpu.memory_space<any>>) dst(%159 : memref<1x256xf32, #tpu.memory_space<vmem>>)
    %c0_i32_120 = arith.constant 0 : i32
    %160 = tpu.memref_slice %arg2[%24, %c0_i32_120] : memref<1536x256xf32, #tpu.memory_space<any>> -> memref<1x256xf32, #tpu.memory_space<any>>
    %c8_i32_121 = arith.constant 8 : i32
    %c0_i32_122 = arith.constant 0 : i32
    %161 = tpu.memref_slice %arg6[%c8_i32_121, %c0_i32_122] : memref<48x256xf32, #tpu.memory_space<vmem>> -> memref<1x256xf32, #tpu.memory_space<vmem>>
    tpu.wait_dma2 semaphore(%arg7 : memref<!tpu.dma_semaphore, #tpu.memory_space<semaphore_mem>>) src(%160 : memref<1x256xf32, #tpu.memory_space<any>>) dst(%161 : memref<1x256xf32, #tpu.memory_space<vmem>>)
    %c0_i32_123 = arith.constant 0 : i32
    %162 = tpu.memref_slice %arg2[%27, %c0_i32_123] : memref<1536x256xf32, #tpu.memory_space<any>> -> memref<1x256xf32, #tpu.memory_space<any>>
    %c9_i32_124 = arith.constant 9 : i32
    %c0_i32_125 = arith.constant 0 : i32
    %163 = tpu.memref_slice %arg6[%c9_i32_124, %c0_i32_125] : memref<48x256xf32, #tpu.memory_space<vmem>> -> memref<1x256xf32, #tpu.memory_space<vmem>>
    tpu.wait_dma2 semaphore(%arg7 : memref<!tpu.dma_semaphore, #tpu.memory_space<semaphore_mem>>) src(%162 : memref<1x256xf32, #tpu.memory_space<any>>) dst(%163 : memref<1x256xf32, #tpu.memory_space<vmem>>)
    %c0_i32_126 = arith.constant 0 : i32
    %164 = tpu.memref_slice %arg2[%30, %c0_i32_126] : memref<1536x256xf32, #tpu.memory_space<any>> -> memref<1x256xf32, #tpu.memory_space<any>>
    %c10_i32_127 = arith.constant 10 : i32
    %c0_i32_128 = arith.constant 0 : i32
    %165 = tpu.memref_slice %arg6[%c10_i32_127, %c0_i32_128] : memref<48x256xf32, #tpu.memory_space<vmem>> -> memref<1x256xf32, #tpu.memory_space<vmem>>
    tpu.wait_dma2 semaphore(%arg7 : memref<!tpu.dma_semaphore, #tpu.memory_space<semaphore_mem>>) src(%164 : memref<1x256xf32, #tpu.memory_space<any>>) dst(%165 : memref<1x256xf32, #tpu.memory_space<vmem>>)
    %c0_i32_129 = arith.constant 0 : i32
    %166 = tpu.memref_slice %arg2[%33, %c0_i32_129] : memref<1536x256xf32, #tpu.memory_space<any>> -> memref<1x256xf32, #tpu.memory_space<any>>
    %c11_i32_130 = arith.constant 11 : i32
    %c0_i32_131 = arith.constant 0 : i32
    %167 = tpu.memref_slice %arg6[%c11_i32_130, %c0_i32_131] : memref<48x256xf32, #tpu.memory_space<vmem>> -> memref<1x256xf32, #tpu.memory_space<vmem>>
    tpu.wait_dma2 semaphore(%arg7 : memref<!tpu.dma_semaphore, #tpu.memory_space<semaphore_mem>>) src(%166 : memref<1x256xf32, #tpu.memory_space<any>>) dst(%167 : memref<1x256xf32, #tpu.memory_space<vmem>>)
    %c0_i32_132 = arith.constant 0 : i32
    %168 = tpu.memref_slice %arg2[%36, %c0_i32_132] : memref<1536x256xf32, #tpu.memory_space<any>> -> memref<1x256xf32, #tpu.memory_space<any>>
    %c12_i32_133 = arith.constant 12 : i32
    %c0_i32_134 = arith.constant 0 : i32
    %169 = tpu.memref_slice %arg6[%c12_i32_133, %c0_i32_134] : memref<48x256xf32, #tpu.memory_space<vmem>> -> memref<1x256xf32, #tpu.memory_space<vmem>>
    tpu.wait_dma2 semaphore(%arg7 : memref<!tpu.dma_semaphore, #tpu.memory_space<semaphore_mem>>) src(%168 : memref<1x256xf32, #tpu.memory_space<any>>) dst(%169 : memref<1x256xf32, #tpu.memory_space<vmem>>)
    %c0_i32_135 = arith.constant 0 : i32
    %170 = tpu.memref_slice %arg2[%39, %c0_i32_135] : memref<1536x256xf32, #tpu.memory_space<any>> -> memref<1x256xf32, #tpu.memory_space<any>>
    %c13_i32_136 = arith.constant 13 : i32
    %c0_i32_137 = arith.constant 0 : i32
    %171 = tpu.memref_slice %arg6[%c13_i32_136, %c0_i32_137] : memref<48x256xf32, #tpu.memory_space<vmem>> -> memref<1x256xf32, #tpu.memory_space<vmem>>
    tpu.wait_dma2 semaphore(%arg7 : memref<!tpu.dma_semaphore, #tpu.memory_space<semaphore_mem>>) src(%170 : memref<1x256xf32, #tpu.memory_space<any>>) dst(%171 : memref<1x256xf32, #tpu.memory_space<vmem>>)
    %c0_i32_138 = arith.constant 0 : i32
    %172 = tpu.memref_slice %arg2[%42, %c0_i32_138] : memref<1536x256xf32, #tpu.memory_space<any>> -> memref<1x256xf32, #tpu.memory_space<any>>
    %c14_i32_139 = arith.constant 14 : i32
    %c0_i32_140 = arith.constant 0 : i32
    %173 = tpu.memref_slice %arg6[%c14_i32_139, %c0_i32_140] : memref<48x256xf32, #tpu.memory_space<vmem>> -> memref<1x256xf32, #tpu.memory_space<vmem>>
    tpu.wait_dma2 semaphore(%arg7 : memref<!tpu.dma_semaphore, #tpu.memory_space<semaphore_mem>>) src(%172 : memref<1x256xf32, #tpu.memory_space<any>>) dst(%173 : memref<1x256xf32, #tpu.memory_space<vmem>>)
    %c0_i32_141 = arith.constant 0 : i32
    %174 = tpu.memref_slice %arg2[%45, %c0_i32_141] : memref<1536x256xf32, #tpu.memory_space<any>> -> memref<1x256xf32, #tpu.memory_space<any>>
    %c15_i32_142 = arith.constant 15 : i32
    %c0_i32_143 = arith.constant 0 : i32
    %175 = tpu.memref_slice %arg6[%c15_i32_142, %c0_i32_143] : memref<48x256xf32, #tpu.memory_space<vmem>> -> memref<1x256xf32, #tpu.memory_space<vmem>>
    tpu.wait_dma2 semaphore(%arg7 : memref<!tpu.dma_semaphore, #tpu.memory_space<semaphore_mem>>) src(%174 : memref<1x256xf32, #tpu.memory_space<any>>) dst(%175 : memref<1x256xf32, #tpu.memory_space<vmem>>)
    %c0_i32_144 = arith.constant 0 : i32
    %176 = tpu.memref_slice %arg2[%48, %c0_i32_144] : memref<1536x256xf32, #tpu.memory_space<any>> -> memref<1x256xf32, #tpu.memory_space<any>>
    %c16_i32_145 = arith.constant 16 : i32
    %c0_i32_146 = arith.constant 0 : i32
    %177 = tpu.memref_slice %arg6[%c16_i32_145, %c0_i32_146] : memref<48x256xf32, #tpu.memory_space<vmem>> -> memref<1x256xf32, #tpu.memory_space<vmem>>
    tpu.wait_dma2 semaphore(%arg7 : memref<!tpu.dma_semaphore, #tpu.memory_space<semaphore_mem>>) src(%176 : memref<1x256xf32, #tpu.memory_space<any>>) dst(%177 : memref<1x256xf32, #tpu.memory_space<vmem>>)
    %c0_i32_147 = arith.constant 0 : i32
    %178 = tpu.memref_slice %arg2[%51, %c0_i32_147] : memref<1536x256xf32, #tpu.memory_space<any>> -> memref<1x256xf32, #tpu.memory_space<any>>
    %c17_i32_148 = arith.constant 17 : i32
    %c0_i32_149 = arith.constant 0 : i32
    %179 = tpu.memref_slice %arg6[%c17_i32_148, %c0_i32_149] : memref<48x256xf32, #tpu.memory_space<vmem>> -> memref<1x256xf32, #tpu.memory_space<vmem>>
    tpu.wait_dma2 semaphore(%arg7 : memref<!tpu.dma_semaphore, #tpu.memory_space<semaphore_mem>>) src(%178 : memref<1x256xf32, #tpu.memory_space<any>>) dst(%179 : memref<1x256xf32, #tpu.memory_space<vmem>>)
    %c0_i32_150 = arith.constant 0 : i32
    %180 = tpu.memref_slice %arg2[%54, %c0_i32_150] : memref<1536x256xf32, #tpu.memory_space<any>> -> memref<1x256xf32, #tpu.memory_space<any>>
    %c18_i32_151 = arith.constant 18 : i32
    %c0_i32_152 = arith.constant 0 : i32
    %181 = tpu.memref_slice %arg6[%c18_i32_151, %c0_i32_152] : memref<48x256xf32, #tpu.memory_space<vmem>> -> memref<1x256xf32, #tpu.memory_space<vmem>>
    tpu.wait_dma2 semaphore(%arg7 : memref<!tpu.dma_semaphore, #tpu.memory_space<semaphore_mem>>) src(%180 : memref<1x256xf32, #tpu.memory_space<any>>) dst(%181 : memref<1x256xf32, #tpu.memory_space<vmem>>)
    %c0_i32_153 = arith.constant 0 : i32
    %182 = tpu.memref_slice %arg2[%57, %c0_i32_153] : memref<1536x256xf32, #tpu.memory_space<any>> -> memref<1x256xf32, #tpu.memory_space<any>>
    %c19_i32_154 = arith.constant 19 : i32
    %c0_i32_155 = arith.constant 0 : i32
    %183 = tpu.memref_slice %arg6[%c19_i32_154, %c0_i32_155] : memref<48x256xf32, #tpu.memory_space<vmem>> -> memref<1x256xf32, #tpu.memory_space<vmem>>
    tpu.wait_dma2 semaphore(%arg7 : memref<!tpu.dma_semaphore, #tpu.memory_space<semaphore_mem>>) src(%182 : memref<1x256xf32, #tpu.memory_space<any>>) dst(%183 : memref<1x256xf32, #tpu.memory_space<vmem>>)
    %c0_i32_156 = arith.constant 0 : i32
    %184 = tpu.memref_slice %arg2[%60, %c0_i32_156] : memref<1536x256xf32, #tpu.memory_space<any>> -> memref<1x256xf32, #tpu.memory_space<any>>
    %c20_i32_157 = arith.constant 20 : i32
    %c0_i32_158 = arith.constant 0 : i32
    %185 = tpu.memref_slice %arg6[%c20_i32_157, %c0_i32_158] : memref<48x256xf32, #tpu.memory_space<vmem>> -> memref<1x256xf32, #tpu.memory_space<vmem>>
    tpu.wait_dma2 semaphore(%arg7 : memref<!tpu.dma_semaphore, #tpu.memory_space<semaphore_mem>>) src(%184 : memref<1x256xf32, #tpu.memory_space<any>>) dst(%185 : memref<1x256xf32, #tpu.memory_space<vmem>>)
    %c0_i32_159 = arith.constant 0 : i32
    %186 = tpu.memref_slice %arg2[%63, %c0_i32_159] : memref<1536x256xf32, #tpu.memory_space<any>> -> memref<1x256xf32, #tpu.memory_space<any>>
    %c21_i32_160 = arith.constant 21 : i32
    %c0_i32_161 = arith.constant 0 : i32
    %187 = tpu.memref_slice %arg6[%c21_i32_160, %c0_i32_161] : memref<48x256xf32, #tpu.memory_space<vmem>> -> memref<1x256xf32, #tpu.memory_space<vmem>>
    tpu.wait_dma2 semaphore(%arg7 : memref<!tpu.dma_semaphore, #tpu.memory_space<semaphore_mem>>) src(%186 : memref<1x256xf32, #tpu.memory_space<any>>) dst(%187 : memref<1x256xf32, #tpu.memory_space<vmem>>)
    %c0_i32_162 = arith.constant 0 : i32
    %188 = tpu.memref_slice %arg2[%66, %c0_i32_162] : memref<1536x256xf32, #tpu.memory_space<any>> -> memref<1x256xf32, #tpu.memory_space<any>>
    %c22_i32_163 = arith.constant 22 : i32
    %c0_i32_164 = arith.constant 0 : i32
    %189 = tpu.memref_slice %arg6[%c22_i32_163, %c0_i32_164] : memref<48x256xf32, #tpu.memory_space<vmem>> -> memref<1x256xf32, #tpu.memory_space<vmem>>
    tpu.wait_dma2 semaphore(%arg7 : memref<!tpu.dma_semaphore, #tpu.memory_space<semaphore_mem>>) src(%188 : memref<1x256xf32, #tpu.memory_space<any>>) dst(%189 : memref<1x256xf32, #tpu.memory_space<vmem>>)
    %c0_i32_165 = arith.constant 0 : i32
    %190 = tpu.memref_slice %arg2[%69, %c0_i32_165] : memref<1536x256xf32, #tpu.memory_space<any>> -> memref<1x256xf32, #tpu.memory_space<any>>
    %c23_i32_166 = arith.constant 23 : i32
    %c0_i32_167 = arith.constant 0 : i32
    %191 = tpu.memref_slice %arg6[%c23_i32_166, %c0_i32_167] : memref<48x256xf32, #tpu.memory_space<vmem>> -> memref<1x256xf32, #tpu.memory_space<vmem>>
    tpu.wait_dma2 semaphore(%arg7 : memref<!tpu.dma_semaphore, #tpu.memory_space<semaphore_mem>>) src(%190 : memref<1x256xf32, #tpu.memory_space<any>>) dst(%191 : memref<1x256xf32, #tpu.memory_space<vmem>>)
    %c0_i32_168 = arith.constant 0 : i32
    %192 = tpu.memref_slice %arg2[%72, %c0_i32_168] : memref<1536x256xf32, #tpu.memory_space<any>> -> memref<1x256xf32, #tpu.memory_space<any>>
    %c24_i32_169 = arith.constant 24 : i32
    %c0_i32_170 = arith.constant 0 : i32
    %193 = tpu.memref_slice %arg6[%c24_i32_169, %c0_i32_170] : memref<48x256xf32, #tpu.memory_space<vmem>> -> memref<1x256xf32, #tpu.memory_space<vmem>>
    tpu.wait_dma2 semaphore(%arg7 : memref<!tpu.dma_semaphore, #tpu.memory_space<semaphore_mem>>) src(%192 : memref<1x256xf32, #tpu.memory_space<any>>) dst(%193 : memref<1x256xf32, #tpu.memory_space<vmem>>)
    %c0_i32_171 = arith.constant 0 : i32
    %194 = tpu.memref_slice %arg2[%75, %c0_i32_171] : memref<1536x256xf32, #tpu.memory_space<any>> -> memref<1x256xf32, #tpu.memory_space<any>>
    %c25_i32_172 = arith.constant 25 : i32
    %c0_i32_173 = arith.constant 0 : i32
    %195 = tpu.memref_slice %arg6[%c25_i32_172, %c0_i32_173] : memref<48x256xf32, #tpu.memory_space<vmem>> -> memref<1x256xf32, #tpu.memory_space<vmem>>
    tpu.wait_dma2 semaphore(%arg7 : memref<!tpu.dma_semaphore, #tpu.memory_space<semaphore_mem>>) src(%194 : memref<1x256xf32, #tpu.memory_space<any>>) dst(%195 : memref<1x256xf32, #tpu.memory_space<vmem>>)
    %c0_i32_174 = arith.constant 0 : i32
    %196 = tpu.memref_slice %arg2[%78, %c0_i32_174] : memref<1536x256xf32, #tpu.memory_space<any>> -> memref<1x256xf32, #tpu.memory_space<any>>
    %c26_i32_175 = arith.constant 26 : i32
    %c0_i32_176 = arith.constant 0 : i32
    %197 = tpu.memref_slice %arg6[%c26_i32_175, %c0_i32_176] : memref<48x256xf32, #tpu.memory_space<vmem>> -> memref<1x256xf32, #tpu.memory_space<vmem>>
    tpu.wait_dma2 semaphore(%arg7 : memref<!tpu.dma_semaphore, #tpu.memory_space<semaphore_mem>>) src(%196 : memref<1x256xf32, #tpu.memory_space<any>>) dst(%197 : memref<1x256xf32, #tpu.memory_space<vmem>>)
    %c0_i32_177 = arith.constant 0 : i32
    %198 = tpu.memref_slice %arg2[%81, %c0_i32_177] : memref<1536x256xf32, #tpu.memory_space<any>> -> memref<1x256xf32, #tpu.memory_space<any>>
    %c27_i32_178 = arith.constant 27 : i32
    %c0_i32_179 = arith.constant 0 : i32
    %199 = tpu.memref_slice %arg6[%c27_i32_178, %c0_i32_179] : memref<48x256xf32, #tpu.memory_space<vmem>> -> memref<1x256xf32, #tpu.memory_space<vmem>>
    tpu.wait_dma2 semaphore(%arg7 : memref<!tpu.dma_semaphore, #tpu.memory_space<semaphore_mem>>) src(%198 : memref<1x256xf32, #tpu.memory_space<any>>) dst(%199 : memref<1x256xf32, #tpu.memory_space<vmem>>)
    %c0_i32_180 = arith.constant 0 : i32
    %200 = tpu.memref_slice %arg2[%84, %c0_i32_180] : memref<1536x256xf32, #tpu.memory_space<any>> -> memref<1x256xf32, #tpu.memory_space<any>>
    %c28_i32_181 = arith.constant 28 : i32
    %c0_i32_182 = arith.constant 0 : i32
    %201 = tpu.memref_slice %arg6[%c28_i32_181, %c0_i32_182] : memref<48x256xf32, #tpu.memory_space<vmem>> -> memref<1x256xf32, #tpu.memory_space<vmem>>
    tpu.wait_dma2 semaphore(%arg7 : memref<!tpu.dma_semaphore, #tpu.memory_space<semaphore_mem>>) src(%200 : memref<1x256xf32, #tpu.memory_space<any>>) dst(%201 : memref<1x256xf32, #tpu.memory_space<vmem>>)
    %c0_i32_183 = arith.constant 0 : i32
    %202 = tpu.memref_slice %arg2[%87, %c0_i32_183] : memref<1536x256xf32, #tpu.memory_space<any>> -> memref<1x256xf32, #tpu.memory_space<any>>
    %c29_i32_184 = arith.constant 29 : i32
    %c0_i32_185 = arith.constant 0 : i32
    %203 = tpu.memref_slice %arg6[%c29_i32_184, %c0_i32_185] : memref<48x256xf32, #tpu.memory_space<vmem>> -> memref<1x256xf32, #tpu.memory_space<vmem>>
    tpu.wait_dma2 semaphore(%arg7 : memref<!tpu.dma_semaphore, #tpu.memory_space<semaphore_mem>>) src(%202 : memref<1x256xf32, #tpu.memory_space<any>>) dst(%203 : memref<1x256xf32, #tpu.memory_space<vmem>>)
    %c0_i32_186 = arith.constant 0 : i32
    %204 = tpu.memref_slice %arg2[%90, %c0_i32_186] : memref<1536x256xf32, #tpu.memory_space<any>> -> memref<1x256xf32, #tpu.memory_space<any>>
    %c30_i32_187 = arith.constant 30 : i32
    %c0_i32_188 = arith.constant 0 : i32
    %205 = tpu.memref_slice %arg6[%c30_i32_187, %c0_i32_188] : memref<48x256xf32, #tpu.memory_space<vmem>> -> memref<1x256xf32, #tpu.memory_space<vmem>>
    tpu.wait_dma2 semaphore(%arg7 : memref<!tpu.dma_semaphore, #tpu.memory_space<semaphore_mem>>) src(%204 : memref<1x256xf32, #tpu.memory_space<any>>) dst(%205 : memref<1x256xf32, #tpu.memory_space<vmem>>)
    %c0_i32_189 = arith.constant 0 : i32
    %206 = tpu.memref_slice %arg2[%93, %c0_i32_189] : memref<1536x256xf32, #tpu.memory_space<any>> -> memref<1x256xf32, #tpu.memory_space<any>>
    %c31_i32_190 = arith.constant 31 : i32
    %c0_i32_191 = arith.constant 0 : i32
    %207 = tpu.memref_slice %arg6[%c31_i32_190, %c0_i32_191] : memref<48x256xf32, #tpu.memory_space<vmem>> -> memref<1x256xf32, #tpu.memory_space<vmem>>
    tpu.wait_dma2 semaphore(%arg7 : memref<!tpu.dma_semaphore, #tpu.memory_space<semaphore_mem>>) src(%206 : memref<1x256xf32, #tpu.memory_space<any>>) dst(%207 : memref<1x256xf32, #tpu.memory_space<vmem>>)
    %c0_i32_192 = arith.constant 0 : i32
    %208 = tpu.memref_slice %arg2[%96, %c0_i32_192] : memref<1536x256xf32, #tpu.memory_space<any>> -> memref<1x256xf32, #tpu.memory_space<any>>
    %c32_i32_193 = arith.constant 32 : i32
    %c0_i32_194 = arith.constant 0 : i32
    %209 = tpu.memref_slice %arg6[%c32_i32_193, %c0_i32_194] : memref<48x256xf32, #tpu.memory_space<vmem>> -> memref<1x256xf32, #tpu.memory_space<vmem>>
    tpu.wait_dma2 semaphore(%arg7 : memref<!tpu.dma_semaphore, #tpu.memory_space<semaphore_mem>>) src(%208 : memref<1x256xf32, #tpu.memory_space<any>>) dst(%209 : memref<1x256xf32, #tpu.memory_space<vmem>>)
    %c0_i32_195 = arith.constant 0 : i32
    %210 = tpu.memref_slice %arg2[%99, %c0_i32_195] : memref<1536x256xf32, #tpu.memory_space<any>> -> memref<1x256xf32, #tpu.memory_space<any>>
    %c33_i32_196 = arith.constant 33 : i32
    %c0_i32_197 = arith.constant 0 : i32
    %211 = tpu.memref_slice %arg6[%c33_i32_196, %c0_i32_197] : memref<48x256xf32, #tpu.memory_space<vmem>> -> memref<1x256xf32, #tpu.memory_space<vmem>>
    tpu.wait_dma2 semaphore(%arg7 : memref<!tpu.dma_semaphore, #tpu.memory_space<semaphore_mem>>) src(%210 : memref<1x256xf32, #tpu.memory_space<any>>) dst(%211 : memref<1x256xf32, #tpu.memory_space<vmem>>)
    %c0_i32_198 = arith.constant 0 : i32
    %212 = tpu.memref_slice %arg2[%102, %c0_i32_198] : memref<1536x256xf32, #tpu.memory_space<any>> -> memref<1x256xf32, #tpu.memory_space<any>>
    %c34_i32_199 = arith.constant 34 : i32
    %c0_i32_200 = arith.constant 0 : i32
    %213 = tpu.memref_slice %arg6[%c34_i32_199, %c0_i32_200] : memref<48x256xf32, #tpu.memory_space<vmem>> -> memref<1x256xf32, #tpu.memory_space<vmem>>
    tpu.wait_dma2 semaphore(%arg7 : memref<!tpu.dma_semaphore, #tpu.memory_space<semaphore_mem>>) src(%212 : memref<1x256xf32, #tpu.memory_space<any>>) dst(%213 : memref<1x256xf32, #tpu.memory_space<vmem>>)
    %c0_i32_201 = arith.constant 0 : i32
    %214 = tpu.memref_slice %arg2[%105, %c0_i32_201] : memref<1536x256xf32, #tpu.memory_space<any>> -> memref<1x256xf32, #tpu.memory_space<any>>
    %c35_i32_202 = arith.constant 35 : i32
    %c0_i32_203 = arith.constant 0 : i32
    %215 = tpu.memref_slice %arg6[%c35_i32_202, %c0_i32_203] : memref<48x256xf32, #tpu.memory_space<vmem>> -> memref<1x256xf32, #tpu.memory_space<vmem>>
    tpu.wait_dma2 semaphore(%arg7 : memref<!tpu.dma_semaphore, #tpu.memory_space<semaphore_mem>>) src(%214 : memref<1x256xf32, #tpu.memory_space<any>>) dst(%215 : memref<1x256xf32, #tpu.memory_space<vmem>>)
    %c0_i32_204 = arith.constant 0 : i32
    %216 = tpu.memref_slice %arg2[%108, %c0_i32_204] : memref<1536x256xf32, #tpu.memory_space<any>> -> memref<1x256xf32, #tpu.memory_space<any>>
    %c36_i32_205 = arith.constant 36 : i32
    %c0_i32_206 = arith.constant 0 : i32
    %217 = tpu.memref_slice %arg6[%c36_i32_205, %c0_i32_206] : memref<48x256xf32, #tpu.memory_space<vmem>> -> memref<1x256xf32, #tpu.memory_space<vmem>>
    tpu.wait_dma2 semaphore(%arg7 : memref<!tpu.dma_semaphore, #tpu.memory_space<semaphore_mem>>) src(%216 : memref<1x256xf32, #tpu.memory_space<any>>) dst(%217 : memref<1x256xf32, #tpu.memory_space<vmem>>)
    %c0_i32_207 = arith.constant 0 : i32
    %218 = tpu.memref_slice %arg2[%111, %c0_i32_207] : memref<1536x256xf32, #tpu.memory_space<any>> -> memref<1x256xf32, #tpu.memory_space<any>>
    %c37_i32_208 = arith.constant 37 : i32
    %c0_i32_209 = arith.constant 0 : i32
    %219 = tpu.memref_slice %arg6[%c37_i32_208, %c0_i32_209] : memref<48x256xf32, #tpu.memory_space<vmem>> -> memref<1x256xf32, #tpu.memory_space<vmem>>
    tpu.wait_dma2 semaphore(%arg7 : memref<!tpu.dma_semaphore, #tpu.memory_space<semaphore_mem>>) src(%218 : memref<1x256xf32, #tpu.memory_space<any>>) dst(%219 : memref<1x256xf32, #tpu.memory_space<vmem>>)
    %c0_i32_210 = arith.constant 0 : i32
    %220 = tpu.memref_slice %arg2[%114, %c0_i32_210] : memref<1536x256xf32, #tpu.memory_space<any>> -> memref<1x256xf32, #tpu.memory_space<any>>
    %c38_i32_211 = arith.constant 38 : i32
    %c0_i32_212 = arith.constant 0 : i32
    %221 = tpu.memref_slice %arg6[%c38_i32_211, %c0_i32_212] : memref<48x256xf32, #tpu.memory_space<vmem>> -> memref<1x256xf32, #tpu.memory_space<vmem>>
    tpu.wait_dma2 semaphore(%arg7 : memref<!tpu.dma_semaphore, #tpu.memory_space<semaphore_mem>>) src(%220 : memref<1x256xf32, #tpu.memory_space<any>>) dst(%221 : memref<1x256xf32, #tpu.memory_space<vmem>>)
    %c0_i32_213 = arith.constant 0 : i32
    %222 = tpu.memref_slice %arg2[%117, %c0_i32_213] : memref<1536x256xf32, #tpu.memory_space<any>> -> memref<1x256xf32, #tpu.memory_space<any>>
    %c39_i32_214 = arith.constant 39 : i32
    %c0_i32_215 = arith.constant 0 : i32
    %223 = tpu.memref_slice %arg6[%c39_i32_214, %c0_i32_215] : memref<48x256xf32, #tpu.memory_space<vmem>> -> memref<1x256xf32, #tpu.memory_space<vmem>>
    tpu.wait_dma2 semaphore(%arg7 : memref<!tpu.dma_semaphore, #tpu.memory_space<semaphore_mem>>) src(%222 : memref<1x256xf32, #tpu.memory_space<any>>) dst(%223 : memref<1x256xf32, #tpu.memory_space<vmem>>)
    %c0_i32_216 = arith.constant 0 : i32
    %224 = tpu.memref_slice %arg2[%120, %c0_i32_216] : memref<1536x256xf32, #tpu.memory_space<any>> -> memref<1x256xf32, #tpu.memory_space<any>>
    %c40_i32_217 = arith.constant 40 : i32
    %c0_i32_218 = arith.constant 0 : i32
    %225 = tpu.memref_slice %arg6[%c40_i32_217, %c0_i32_218] : memref<48x256xf32, #tpu.memory_space<vmem>> -> memref<1x256xf32, #tpu.memory_space<vmem>>
    tpu.wait_dma2 semaphore(%arg7 : memref<!tpu.dma_semaphore, #tpu.memory_space<semaphore_mem>>) src(%224 : memref<1x256xf32, #tpu.memory_space<any>>) dst(%225 : memref<1x256xf32, #tpu.memory_space<vmem>>)
    %c0_i32_219 = arith.constant 0 : i32
    %226 = tpu.memref_slice %arg2[%123, %c0_i32_219] : memref<1536x256xf32, #tpu.memory_space<any>> -> memref<1x256xf32, #tpu.memory_space<any>>
    %c41_i32_220 = arith.constant 41 : i32
    %c0_i32_221 = arith.constant 0 : i32
    %227 = tpu.memref_slice %arg6[%c41_i32_220, %c0_i32_221] : memref<48x256xf32, #tpu.memory_space<vmem>> -> memref<1x256xf32, #tpu.memory_space<vmem>>
    tpu.wait_dma2 semaphore(%arg7 : memref<!tpu.dma_semaphore, #tpu.memory_space<semaphore_mem>>) src(%226 : memref<1x256xf32, #tpu.memory_space<any>>) dst(%227 : memref<1x256xf32, #tpu.memory_space<vmem>>)
    %c0_i32_222 = arith.constant 0 : i32
    %228 = tpu.memref_slice %arg2[%126, %c0_i32_222] : memref<1536x256xf32, #tpu.memory_space<any>> -> memref<1x256xf32, #tpu.memory_space<any>>
    %c42_i32_223 = arith.constant 42 : i32
    %c0_i32_224 = arith.constant 0 : i32
    %229 = tpu.memref_slice %arg6[%c42_i32_223, %c0_i32_224] : memref<48x256xf32, #tpu.memory_space<vmem>> -> memref<1x256xf32, #tpu.memory_space<vmem>>
    tpu.wait_dma2 semaphore(%arg7 : memref<!tpu.dma_semaphore, #tpu.memory_space<semaphore_mem>>) src(%228 : memref<1x256xf32, #tpu.memory_space<any>>) dst(%229 : memref<1x256xf32, #tpu.memory_space<vmem>>)
    %c0_i32_225 = arith.constant 0 : i32
    %230 = tpu.memref_slice %arg2[%129, %c0_i32_225] : memref<1536x256xf32, #tpu.memory_space<any>> -> memref<1x256xf32, #tpu.memory_space<any>>
    %c43_i32_226 = arith.constant 43 : i32
    %c0_i32_227 = arith.constant 0 : i32
    %231 = tpu.memref_slice %arg6[%c43_i32_226, %c0_i32_227] : memref<48x256xf32, #tpu.memory_space<vmem>> -> memref<1x256xf32, #tpu.memory_space<vmem>>
    tpu.wait_dma2 semaphore(%arg7 : memref<!tpu.dma_semaphore, #tpu.memory_space<semaphore_mem>>) src(%230 : memref<1x256xf32, #tpu.memory_space<any>>) dst(%231 : memref<1x256xf32, #tpu.memory_space<vmem>>)
    %c0_i32_228 = arith.constant 0 : i32
    %232 = tpu.memref_slice %arg2[%132, %c0_i32_228] : memref<1536x256xf32, #tpu.memory_space<any>> -> memref<1x256xf32, #tpu.memory_space<any>>
    %c44_i32_229 = arith.constant 44 : i32
    %c0_i32_230 = arith.constant 0 : i32
    %233 = tpu.memref_slice %arg6[%c44_i32_229, %c0_i32_230] : memref<48x256xf32, #tpu.memory_space<vmem>> -> memref<1x256xf32, #tpu.memory_space<vmem>>
    tpu.wait_dma2 semaphore(%arg7 : memref<!tpu.dma_semaphore, #tpu.memory_space<semaphore_mem>>) src(%232 : memref<1x256xf32, #tpu.memory_space<any>>) dst(%233 : memref<1x256xf32, #tpu.memory_space<vmem>>)
    %c0_i32_231 = arith.constant 0 : i32
    %234 = tpu.memref_slice %arg2[%135, %c0_i32_231] : memref<1536x256xf32, #tpu.memory_space<any>> -> memref<1x256xf32, #tpu.memory_space<any>>
    %c45_i32_232 = arith.constant 45 : i32
    %c0_i32_233 = arith.constant 0 : i32
    %235 = tpu.memref_slice %arg6[%c45_i32_232, %c0_i32_233] : memref<48x256xf32, #tpu.memory_space<vmem>> -> memref<1x256xf32, #tpu.memory_space<vmem>>
    tpu.wait_dma2 semaphore(%arg7 : memref<!tpu.dma_semaphore, #tpu.memory_space<semaphore_mem>>) src(%234 : memref<1x256xf32, #tpu.memory_space<any>>) dst(%235 : memref<1x256xf32, #tpu.memory_space<vmem>>)
    %c0_i32_234 = arith.constant 0 : i32
    %236 = tpu.memref_slice %arg2[%138, %c0_i32_234] : memref<1536x256xf32, #tpu.memory_space<any>> -> memref<1x256xf32, #tpu.memory_space<any>>
    %c46_i32_235 = arith.constant 46 : i32
    %c0_i32_236 = arith.constant 0 : i32
    %237 = tpu.memref_slice %arg6[%c46_i32_235, %c0_i32_236] : memref<48x256xf32, #tpu.memory_space<vmem>> -> memref<1x256xf32, #tpu.memory_space<vmem>>
    tpu.wait_dma2 semaphore(%arg7 : memref<!tpu.dma_semaphore, #tpu.memory_space<semaphore_mem>>) src(%236 : memref<1x256xf32, #tpu.memory_space<any>>) dst(%237 : memref<1x256xf32, #tpu.memory_space<vmem>>)
    %c0_i32_237 = arith.constant 0 : i32
    %238 = tpu.memref_slice %arg2[%141, %c0_i32_237] : memref<1536x256xf32, #tpu.memory_space<any>> -> memref<1x256xf32, #tpu.memory_space<any>>
    %c47_i32_238 = arith.constant 47 : i32
    %c0_i32_239 = arith.constant 0 : i32
    %239 = tpu.memref_slice %arg6[%c47_i32_238, %c0_i32_239] : memref<48x256xf32, #tpu.memory_space<vmem>> -> memref<1x256xf32, #tpu.memory_space<vmem>>
    tpu.wait_dma2 semaphore(%arg7 : memref<!tpu.dma_semaphore, #tpu.memory_space<semaphore_mem>>) src(%238 : memref<1x256xf32, #tpu.memory_space<any>>) dst(%239 : memref<1x256xf32, #tpu.memory_space<vmem>>)
    %c0_240 = arith.constant 0 : index
    %c0_241 = arith.constant 0 : index
    %240 = vector.load %arg6[%c0_240, %c0_241] : memref<48x256xf32, #tpu.memory_space<vmem>>, vector<48x256xf32>
    %241 = vector.shape_cast %240 : vector<48x256xf32> to vector<6x8x256xf32>
    %cst = arith.constant dense<0.000000e+00> : vector<6x256xf32>
    %242 = vector.multi_reduction <add>, %241, %cst [1] : vector<6x8x256xf32> to vector<6x256xf32>
    %cst_242 = arith.constant 1.250000e-01 : f32
    %243 = vector.broadcast %cst_242 : f32 to vector<6x256xf32>
    %244 = arith.mulf %242, %243 : vector<6x256xf32>
    %c0_243 = arith.constant 0 : index
    %c0_244 = arith.constant 0 : index
    %245 = vector.load %arg3[%c0_243, %c0_244] : memref<256x256xf32, #tpu.memory_space<vmem>>, vector<256x256xf32>
    %cst_245 = arith.constant dense<0.000000e+00> : vector<6x256xf32>
    %246 = tpu.matmul %244, %245, %cst_245 {dimension_numbers = #tpu.dot_dimension_numbers<[1], [0], [0], [1], [0, 0, 1, 1], [], []>} : vector<6x256xf32>, vector<256x256xf32>, vector<6x256xf32> -> vector<6x256xf32>
    %c0_246 = arith.constant 0 : index
    %c0_247 = arith.constant 0 : index
    %247 = vector.load %arg4[%c0_246, %c0_247] : memref<1x256xf32, #tpu.memory_space<vmem>>, vector<1x256xf32>
    %248 = vector.broadcast %247 : vector<1x256xf32> to vector<6x256xf32>
    %249 = arith.addf %246, %248 : vector<6x256xf32>
    %250 = vector.extract_strided_slice %249 {offsets = [0, 0], sizes = [2, 256], strides = [1, 1]} : vector<6x256xf32> to vector<2x256xf32>
    %c0_248 = arith.constant 0 : index
    %c0_249 = arith.constant 0 : index
    %c0_250 = arith.constant 0 : index
    %251 = vector.load %arg5[%c0_248, %c0_249, %c0_250] : memref<2x3x256xf32, #tpu.memory_space<vmem>>, vector<2x1x256xf32>
    %252 = vector.shape_cast %251 : vector<2x1x256xf32> to vector<2x256xf32>
    %253 = vector.shape_cast %250 : vector<2x256xf32> to vector<2x1x256xf32>
    tpu.vector_store %arg5[%c0_248, %c0_249, %c0_250], %253 {strides = array<i32>} : memref<2x3x256xf32, #tpu.memory_space<vmem>>, vector<2x1x256xf32>,
    %254 = vector.extract_strided_slice %249 {offsets = [2, 0], sizes = [2, 256], strides = [1, 1]} : vector<6x256xf32> to vector<2x256xf32>
    %c0_251 = arith.constant 0 : index
    %c1_252 = arith.constant 1 : index
    %c0_253 = arith.constant 0 : index
    %255 = vector.load %arg5[%c0_251, %c1_252, %c0_253] : memref<2x3x256xf32, #tpu.memory_space<vmem>>, vector<2x1x256xf32>
    %256 = vector.shape_cast %255 : vector<2x1x256xf32> to vector<2x256xf32>
    %257 = vector.shape_cast %254 : vector<2x256xf32> to vector<2x1x256xf32>
    tpu.vector_store %arg5[%c0_251, %c1_252, %c0_253], %257 {strides = array<i32>} : memref<2x3x256xf32, #tpu.memory_space<vmem>>, vector<2x1x256xf32>,
    %258 = vector.extract_strided_slice %249 {offsets = [4, 0], sizes = [2, 256], strides = [1, 1]} : vector<6x256xf32> to vector<2x256xf32>
    %c0_254 = arith.constant 0 : index
    %c2_255 = arith.constant 2 : index
    %c0_256 = arith.constant 0 : index
    %259 = vector.load %arg5[%c0_254, %c2_255, %c0_256] : memref<2x3x256xf32, #tpu.memory_space<vmem>>, vector<2x1x256xf32>
    %260 = vector.shape_cast %259 : vector<2x1x256xf32> to vector<2x256xf32>
    %261 = vector.shape_cast %258 : vector<2x256xf32> to vector<2x1x256xf32>
    tpu.vector_store %arg5[%c0_254, %c2_255, %c0_256], %261 {strides = array<i32>} : memref<2x3x256xf32, #tpu.memory_space<vmem>>, vector<2x1x256xf32>,
    return
  }
  func.func @transform_1(%arg0: i32, %arg1: memref<48xi32, #tpu.memory_space<smem>>) -> (i32, i32) {
    %c0_i32 = arith.constant 0 : i32
    %c0_i32_0 = arith.constant 0 : i32
    %c0_i32_1 = arith.constant 0 : i32
    return %c0_i32, %c0_i32_0 : i32, i32
  }
  func.func @transform_2(%arg0: i32, %arg1: memref<48xi32, #tpu.memory_space<smem>>) -> (i32, i32) {
    %c0_i32 = arith.constant 0 : i32
    %c0_i32_0 = arith.constant 0 : i32
    %c0_i32_1 = arith.constant 0 : i32
    return %c0_i32, %c0_i32_0 : i32, i32
  }
  func.func @transform_3(%arg0: i32, %arg1: memref<48xi32, #tpu.memory_space<smem>>) -> (i32, i32, i32) {
    %c0_i32 = arith.constant 0 : i32
    %c0_i32_0 = arith.constant 0 : i32
    %c0_i32_1 = arith.constant 0 : i32
    %c0_i32_2 = arith.constant 0 : i32
    return %c0_i32, %c0_i32_0, %c0_i32_1 : i32, i32, i32
  }
}

</mosaic_0001>

<bundles_post_ra>
// kernel: tpu_custom_call.1
= control target key start
LH: loop header
LB: loop body
LE: loop exit
PB: predicated region body
PF: predicated region fallthrough
CT: control target
= control target key end

     0   :  { %s3811_s0 = inlined_call_operand.hbm [shape: s32[48], index: 0, kind: input, shape index: {}]   ;;  %s3812_s1 = inlined_call_operand.hbm [shape: f32[1536,256], index: 1, kind: input, shape index: {}]   ;;  %s3813_s2 = inlined_call_operand.hbm [shape: f32[256,256], index: 2, kind: input, shape index: {}]   ;;  %s3814_s3 = inlined_call_operand.hbm [shape: f32[1,256], index: 3, kind: input, shape index: {}]   ;;  %s3815_s4 = inlined_call_operand.vmem [shape: f32[2,3,256], index: 4, kind: output, shape index: {}]  }
   0x1   :  { %s1579_s17 = scalar_lea.hbm %s3811_s0, 16 }
   0x2   :  { %p1580_p0 = scmp.ne.s32.totalorder %s3811_s0, %s1579_s17  ;;  %p1583_p1 = scmp.lt.u32.totalorder %s1579_s17, %s3811_s0 }
   0x4   :  { %p1585_p2 = pnand %p1583_p1, %p1580_p0 }
   0x6   :  { %1588 = shalt.err (!%p1585_p2)  }
   0x7   :  { %s2793_s22 = smov [#allocation5]  }
   0x8   :  { %10 = dma.hbm_to_smem %s3811_s0, 16, %s2793_s22, [#allocation4] }
   0x9   :  { %2785 = dma.done.wait [#allocation4], 16 }
   0xa   :  { %2786 = vsyncadd [#allocation4], 4294967280 }
   0xb   :  { %12 = sfence }
   0xc   :  { %13 = vsyncpa [#allocation7], 0 }
   0xd   :  { %14 = vsyncpa [#allocation9], 0  ;;  %s2794_s25 = smov [#allocation6]   ;;  %s1589_s29 = scalar_lea.hbm %s3813_s2, 8192 }
   0xe   :  { %s20_s26 = sshll.u32 %s2794_s25, 4  ;;  %p1590_p3 = scmp.ne.s32.totalorder %s3813_s2, %s1589_s29  ;;  %s21_s26 = int_to_ptr.vmem [resolvable:$true] %s20_s26 }
   0xf   :  { %p1593_p4 = scmp.lt.u32.totalorder %s1589_s29, %s3813_s2 }
  0x11   :  { %p1595_p5 = pnand %p1593_p4, %p1590_p3 }
  0x13   :  { %1598 = shalt.err (!%p1595_p5)
}
  0x14   :  { %s1599_s0 = scalar_lea.vmem %s21_s26, 8192  ;;  %p1604_p7 = scmp.lt.s32.totalorder %s21_s26, %s21_s26 }
  0x15   :  { %p1600_p6 = scmp.ne.s32.totalorder %s21_s26, %s1599_s0  ;;  %p1605_p8 = scmp.lt.s32.totalorder %s1599_s0, %s1599_s0 }
  0x17   :  { %p1606_p9 = por %p1605_p8, %p1604_p7 }
  0x19   :  { %p1607_p10 = pnand %p1606_p9, %p1600_p6 }
  0x1b   :  { %1610 = shalt.err (!%p1607_p10)
}
  0x1c   :  { %s2795_s8 = smov 256   ;;  %s2796_s9 = smov 16  }
  0x1d   :  { %26 = dma.hbm_to_vmem [thread:$0]  %s3813_s2, 8192, %s21_s26, [#allocation7], %s2795_s8, %s2795_s8, %s2796_s9  }
  0x1e   :  { %s2797_s12 = smov [#allocation8]   ;;  %s1611_s16 = scalar_lea.hbm %s3814_s3, 32 }
  0x1f   :  { %s33_s13 = sshll.u32 %s2797_s12, 4  ;;  %p1612_p11 = scmp.ne.s32.totalorder %s3814_s3, %s1611_s16  ;;  %s34_s13 = int_to_ptr.vmem [resolvable:$true] %s33_s13 }
  0x20   :  { %p1615_p12 = scmp.lt.u32.totalorder %s1611_s16, %s3814_s3 }
  0x22   :  { %p1617_p13 = pnand %p1615_p12, %p1612_p11 }
  0x24   :  { %1620 = shalt.err (!%p1617_p13)
}
  0x25   :  { %s1621_s21 = scalar_lea.vmem %s34_s13, 32  ;;  %p1626_p1 = scmp.lt.s32.totalorder %s34_s13, %s34_s13 }
  0x26   :  { %p1622_p0 = scmp.ne.s32.totalorder %s34_s13, %s1621_s21  ;;  %p1627_p2 = scmp.lt.s32.totalorder %s1621_s21, %s1621_s21 }
  0x28   :  { %p1628_p3 = por %p1627_p2, %p1626_p1 }
  0x2a   :  { %p1629_p4 = pnand %p1628_p3, %p1622_p0 }
  0x2c   :  { %1632 = shalt.err (!%p1629_p4)
}
  0x2d   :  { %36 = dma.hbm_to_vmem [thread:$0]  %s3814_s3, 32, %s34_s13, [#allocation9]  }
  0x2e   :  { %2787 = dma.done.wait [#allocation7], 8192  }
  0x2f   :  { %2788 = vsyncadd [#allocation7], 4294959104 }
  0x30   :  { %2789 = dma.done.wait [#allocation9], 32  }
  0x31   :  { %2790 = vsyncadd [#allocation9], 4294967264  ;;  %s43_s23 = sld [smem:[#allocation5]]  ;;  %s2798_s24 = smov [#allocation2]  }
  0x32   :  { %s51_s25 = sshll.u32 %s2798_s24, 4  ;;  %s2912_s26 = sld [smem:[#allocation5 + $0x1]]  ;;  %s2910_s25 = int_to_ptr.vmem [resolvable:$true] %s51_s25 }
  0x33   :  { %s2799_s27 = smov [#allocation2 + $0x1]   ;;  %s2914_s29 = sld [smem:[#allocation5 + $0x2]] }
  0x34   :  { %s64_s28 = sshll.u32 %s2799_s27, 4  ;;  %s2800_s3 = smov [#allocation2 + $0x2]   ;;  %s2916_s28 = int_to_ptr.vmem [resolvable:$true] %s64_s28 }
  0x35   :  { %s77_s30 = sshll.u32 %s2800_s3, 4  ;;  %s2918_s5 = sld [smem:[#allocation5 + $0x3]]  ;;  %s2920_s30 = int_to_ptr.vmem [resolvable:$true] %s77_s30 }
  0x36   :  { %s2930_s19 = scalar_lea.hbm %s3812_s1, 49152 }
  0x37   :  { %s44_s6 = sshrl.u32 %s43_s23, 3  ;;  %s45_s7 = sand.u32 7, %s43_s23  }
  0x38   :  { %s1310_s0 = sshll.u32 %s44_s6, 4  ;;  %s56_s9 = sshrl.u32 %s2912_s26, 3 }
  0x39   :  { %s47_s8 = sadd.s32 %s1310_s0, %s45_s7  ;;  %s57_s11 = sand.u32 7, %s2912_s26  }
  0x3a   :  { %s1311_s10 = sshll.u32 %s47_s8, 4  ;;  %s1313_s15 = sshll.u32 %s56_s9, 4 }
  0x3b   :  { %s49_s14 = scalar_lea.hbm %s3812_s1, %s1311_s10 }
  0x3c   :  { %s1633_s16 = scalar_lea.hbm %s49_s14, 32  ;;  %p1636_p6 = scmp.lt.u32.totalorder %s49_s14, %s3812_s1 }
  0x3d   :  { %p1634_p5 = scmp.ne.s32.totalorder %s49_s14, %s1633_s16  ;;  %p1637_p7 = scmp.lt.u32.totalorder %s2930_s19, %s1633_s16 }
  0x3e   :  { %p1639_p9 = scmp.lt.u32.totalorder %s1633_s16, %s49_s14 }
  0x3f   :  { %p1638_p8 = por %p1637_p7, %p1636_p6 }
  0x41   :  { %p1640_p10 = por %p1639_p9, %p1638_p8 }
  0x43   :  { %p1641_p11 = pnand %p1640_p10, %p1634_p5 }
  0x45   :  { %1644 = shalt.err (!%p1641_p11)  }
  0x46   :  { %s1645_s2 = scalar_lea.vmem %s2910_s25, 32  ;;  %s2939_s22 = scalar_lea.vmem %s2910_s25, 1536 }
  0x47   :  { %p1646_p12 = scmp.ne.s32.totalorder %s2910_s25, %s1645_s2  ;;  %p1650_p13 = scmp.lt.s32.totalorder %s2910_s25, %s2910_s25 }
  0x48   :  { %p1651_p0 = scmp.lt.s32.totalorder %s2939_s22, %s1645_s2 }
  0x4a   :  { %p1652_p1 = por %p1651_p0, %p1650_p13 }
  0x4c   :  { %p1653_p2 = pnand %p1652_p1, %p1646_p12 }
  0x4e   :  { %1656 = shalt.err (!%p1653_p2)  }
  0x4f   :  { %s2801_s23 = smov 128   ;;  %s2802_s24 = smov 1  }
  0x50   :  { %54 = dma.hbm_to_vmem [thread:$0]  %s49_s14, 32, %s2910_s25, [#allocation3], %s2801_s23, %s2801_s23, %s2802_s24 }
  0x51   :  { %s59_s26 = sadd.s32 %s1313_s15, %s57_s11  ;;  %s69_s27 = sshrl.u32 %s2914_s29, 3 }
  0x52   :  { %s1314_s3 = sshll.u32 %s59_s26, 4  ;;  %s70_s6 = sand.u32 7, %s2914_s29  }
  0x53   :  { %s61_s8 = scalar_lea.hbm %s3812_s1, %s1314_s3  ;;  %s1316_s9 = sshll.u32 %s69_s27, 4 }
  0x54   :  { %s1657_s10 = scalar_lea.hbm %s61_s8, 32  ;;  %p1660_p4 = scmp.lt.u32.totalorder %s61_s8, %s3812_s1 }
  0x55   :  { %p1658_p3 = scmp.ne.s32.totalorder %s61_s8, %s1657_s10  ;;  %p1661_p5 = scmp.lt.u32.totalorder %s2930_s19, %s1657_s10 }
  0x56   :  { %p1663_p7 = scmp.lt.u32.totalorder %s1657_s10, %s61_s8 }
  0x57   :  { %p1662_p6 = por %p1661_p5, %p1660_p4 }
  0x59   :  { %p1664_p8 = por %p1663_p7, %p1662_p6 }
  0x5b   :  { %p1665_p9 = pnand %p1664_p8, %p1658_p3 }
  0x5d   :  { %1668 = shalt.err (!%p1665_p9)  }
  0x5e   :  { %s1669_s29 = scalar_lea.vmem %s2916_s28, 32  ;;  %p1674_p11 = scmp.lt.s32.totalorder %s2916_s28, %s2910_s25 }
  0x5f   :  { %p1670_p10 = scmp.ne.s32.totalorder %s2916_s28, %s1669_s29  ;;  %p1675_p12 = scmp.lt.s32.totalorder %s2939_s22, %s1669_s29 }
  0x61   :  { %p1676_p13 = por %p1675_p12, %p1674_p11 }
  0x63   :  { %p1677_p0 = pnand %p1676_p13, %p1670_p10 }
  0x65   :  { %1680 = shalt.err (!%p1677_p0)  }
  0x66   :  { %67 = dma.hbm_to_vmem [thread:$0]  %s61_s8, 32, %s2916_s28, [#allocation3], %s2801_s23, %s2801_s23, %s2802_s24 }
  0x67   :  { %s72_s11 = sadd.s32 %s1316_s9, %s70_s6  ;;  %s82_s14 = sshrl.u32 %s2918_s5, 3 }
  0x68   :  { %s1317_s15 = sshll.u32 %s72_s11, 4  ;;  %s83_s16 = sand.u32 7, %s2918_s5  }
  0x69   :  { %s74_s20 = scalar_lea.hbm %s3812_s1, %s1317_s15  ;;  %s1319_s21 = sshll.u32 %s82_s14, 4 }
  0x6a   :  { %s1681_s2 = scalar_lea.hbm %s74_s20, 32  ;;  %p1684_p2 = scmp.lt.u32.totalorder %s74_s20, %s3812_s1 }
  0x6b   :  { %p1682_p1 = scmp.ne.s32.totalorder %s74_s20, %s1681_s2  ;;  %p1685_p3 = scmp.lt.u32.totalorder %s2930_s19, %s1681_s2 }
  0x6c   :  { %p1687_p5 = scmp.lt.u32.totalorder %s1681_s2, %s74_s20 }
  0x6d   :  { %p1686_p4 = por %p1685_p3, %p1684_p2 }
  0x6f   :  { %p1688_p6 = por %p1687_p5, %p1686_p4 }
  0x71   :  { %p1689_p7 = pnand %p1688_p6, %p1682_p1 }
  0x73   :  { %1692 = shalt.err (!%p1689_p7)  }
  0x74   :  { %s1693_s28 = scalar_lea.vmem %s2920_s30, 32  ;;  %p1698_p9 = scmp.lt.s32.totalorder %s2920_s30, %s2910_s25 }
  0x75   :  { %p1694_p8 = scmp.ne.s32.totalorder %s2920_s30, %s1693_s28  ;;  %p1699_p10 = scmp.lt.s32.totalorder %s2939_s22, %s1693_s28 }
  0x77   :  { %p1700_p11 = por %p1699_p10, %p1698_p9 }
  0x79   :  { %p1701_p12 = pnand %p1700_p11, %p1694_p8 }
  0x7b   :  { %1704 = shalt.err (!%p1701_p12)  }
  0x7c   :  { %80 = dma.hbm_to_vmem [thread:$0]  %s74_s20, 32, %s2920_s30, [#allocation3], %s2801_s23, %s2801_s23, %s2802_s24 }
  0x7d   :  { %s85_s5 = sadd.s32 %s1319_s21, %s83_s16  ;;  %s2803_s6 = smov [#allocation2 + $0x3]  }
  0x7e   :  { %s1320_s3 = sshll.u32 %s85_s5, 4  ;;  %s90_s7 = sshll.u32 %s2803_s6, 4  ;;  %s91_s7 = int_to_ptr.vmem [resolvable:$true] %s90_s7 }
  0x7f   :  { %s87_s9 = scalar_lea.hbm %s3812_s1, %s1320_s3 }
  0x80   :  { %s1705_s10 = scalar_lea.hbm %s87_s9, 32  ;;  %p1708_p0 = scmp.lt.u32.totalorder %s87_s9, %s3812_s1 }
  0x81   :  { %p1706_p13 = scmp.ne.s32.totalorder %s87_s9, %s1705_s10  ;;  %p1709_p1 = scmp.lt.u32.totalorder %s2930_s19, %s1705_s10 }
  0x82   :  { %p1711_p3 = scmp.lt.u32.totalorder %s1705_s10, %s87_s9 }
  0x83   :  { %p1710_p2 = por %p1709_p1, %p1708_p0 }
  0x85   :  { %p1712_p4 = por %p1711_p3, %p1710_p2 }
  0x87   :  { %p1713_p5 = pnand %p1712_p4, %p1706_p13 }
  0x89   :  { %1716 = shalt.err (!%p1713_p5)  }
  0x8a   :  { %s1717_s30 = scalar_lea.vmem %s91_s7, 32  ;;  %p1722_p7 = scmp.lt.s32.totalorder %s91_s7, %s2910_s25 }
  0x8b   :  { %p1718_p6 = scmp.ne.s32.totalorder %s91_s7, %s1717_s30  ;;  %p1723_p8 = scmp.lt.s32.totalorder %s2939_s22, %s1717_s30 }
  0x8d   :  { %p1724_p9 = por %p1723_p8, %p1722_p7 }
  0x8f   :  { %p1725_p10 = pnand %p1724_p9, %p1718_p6 }
  0x91   :  { %1728 = shalt.err (!%p1725_p10)  }
  0x92   :  { %93 = dma.hbm_to_vmem [thread:$0]  %s87_s9, 32, %s91_s7, [#allocation3], %s2801_s23, %s2801_s23, %s2802_s24 }
  0x93   :  { %s1321_s29 = sld [smem:[#allocation5 + $0x4]]  ;;  %s2804_s11 = smov [#allocation2 + $0x4]  }
  0x94   :  { %s103_s14 = sshll.u32 %s2804_s11, 4  ;;  %s1324_s15 = sld [smem:[#allocation5 + $0x5]]  ;;  %s2996_s14 = int_to_ptr.vmem [resolvable:$true] %s103_s14 }
  0x95   :  { %s2805_s16 = smov [#allocation2 + $0x5]   ;;  %s2998_s18 = sld [smem:[#allocation5 + $0x6]] }
  0x96   :  { %s116_s17 = sshll.u32 %s2805_s16, 4  ;;  %s2806_s20 = smov [#allocation2 + $0x6]   ;;  %s3000_s17 = int_to_ptr.vmem [resolvable:$true] %s116_s17 }
  0x97   :  { %s3002_s21 = sshll.u32 %s2806_s20, 4  ;;  %s3004_s2 = sld [smem:[#allocation5 + $0x7]]  ;;  %s130_s21 = int_to_ptr.vmem [resolvable:$true] %s3002_s21 }
  0x99   :  { %s95_s26 = sshrl.u32 %s1321_s29, 3  ;;  %s96_s27 = sand.u32 7, %s1321_s29  }
  0x9a   :  { %s1322_s28 = sshll.u32 %s95_s26, 4  ;;  %s108_s5 = sshrl.u32 %s1324_s15, 3 }
  0x9b   :  { %s98_s3 = sadd.s32 %s1322_s28, %s96_s27  ;;  %s109_s6 = sand.u32 7, %s1324_s15  }
  0x9c   :  { %s1323_s7 = sshll.u32 %s98_s3, 4  ;;  %s1325_s0 = sshll.u32 %s108_s5, 4 }
  0x9d   :  { %s100_s10 = scalar_lea.hbm %s3812_s1, %s1323_s7  ;;  %s111_s12 = sadd.s32 %s1325_s0, %s109_s6 }
  0x9e   :  { %s1729_s13 = scalar_lea.hbm %s100_s10, 32  ;;  %p1732_p12 = scmp.lt.u32.totalorder %s100_s10, %s3812_s1 }
  0x9f   :  { %p1730_p11 = scmp.ne.s32.totalorder %s100_s10, %s1729_s13  ;;  %p1733_p13 = scmp.lt.u32.totalorder %s2930_s19, %s1729_s13 }
  0xa0   :  { %p1735_p1 = scmp.lt.u32.totalorder %s1729_s13, %s100_s10 }
  0xa1   :  { %p1734_p0 = por %p1733_p13, %p1732_p12 }
  0xa3   :  { %p1736_p2 = por %p1735_p1, %p1734_p0 }
  0xa5   :  { %p1737_p3 = pnand %p1736_p2, %p1730_p11 }
  0xa7   :  { %1740 = shalt.err (!%p1737_p3)  }
  0xa8   :  { %s1741_s29 = scalar_lea.vmem %s2996_s14, 32  ;;  %p1746_p5 = scmp.lt.s32.totalorder %s2996_s14, %s2910_s25 }
  0xa9   :  { %p1742_p4 = scmp.ne.s32.totalorder %s2996_s14, %s1741_s29  ;;  %p1747_p6 = scmp.lt.s32.totalorder %s2939_s22, %s1741_s29 }
  0xab   :  { %p1748_p7 = por %p1747_p6, %p1746_p5 }
  0xad   :  { %p1749_p8 = pnand %p1748_p7, %p1742_p4 }
  0xaf   :  { %1752 = shalt.err (!%p1749_p8)  }
  0xb0   :  { %106 = dma.hbm_to_vmem [thread:$0]  %s100_s10, 32, %s2996_s14, [#allocation3], %s2801_s23, %s2801_s23, %s2802_s24 }
  0xb1   :  { %s1326_s15 = sshll.u32 %s111_s12, 4  ;;  %s121_s16 = sshrl.u32 %s2998_s18, 3 }
  0xb2   :  { %s113_s27 = scalar_lea.hbm %s3812_s1, %s1326_s15  ;;  %s122_s28 = sand.u32 7, %s2998_s18  }
  0xb3   :  { %s1753_s5 = scalar_lea.hbm %s113_s27, 32  ;;  %p1756_p10 = scmp.lt.u32.totalorder %s113_s27, %s3812_s1 }
  0xb4   :  { %p1754_p9 = scmp.ne.s32.totalorder %s113_s27, %s1753_s5  ;;  %p1757_p11 = scmp.lt.u32.totalorder %s2930_s19, %s1753_s5 }
  0xb5   :  { %p1759_p13 = scmp.lt.u32.totalorder %s1753_s5, %s113_s27 }
  0xb6   :  { %p1758_p12 = por %p1757_p11, %p1756_p10 }
  0xb8   :  { %p1760_p0 = por %p1759_p13, %p1758_p12 }
  0xba   :  { %p1761_p1 = pnand %p1760_p0, %p1754_p9 }
  0xbc   :  { %1764 = shalt.err (!%p1761_p1)  }
  0xbd   :  { %s1765_s14 = scalar_lea.vmem %s3000_s17, 32  ;;  %p1770_p3 = scmp.lt.s32.totalorder %s3000_s17, %s2910_s25 }
  0xbe   :  { %p1766_p2 = scmp.ne.s32.totalorder %s3000_s17, %s1765_s14  ;;  %p1771_p4 = scmp.lt.s32.totalorder %s2939_s22, %s1765_s14 }
  0xc0   :  { %p1772_p5 = por %p1771_p4, %p1770_p3 }
  0xc2   :  { %p1773_p6 = pnand %p1772_p5, %p1766_p2 }
  0xc4   :  { %1776 = shalt.err (!%p1773_p6)  }
  0xc5   :  { %119 = dma.hbm_to_vmem [thread:$0]  %s113_s27, 32, %s3000_s17, [#allocation3], %s2801_s23, %s2801_s23, %s2802_s24 }
  0xc6   :  { %s1328_s18 = sshll.u32 %s121_s16, 4  ;;  %s134_s0 = sshrl.u32 %s3004_s2, 3 }
  0xc7   :  { %s124_s7 = sadd.s32 %s1328_s18, %s122_s28  ;;  %s135_s9 = sand.u32 7, %s3004_s2  }
  0xc8   :  { %s1329_s8 = sshll.u32 %s124_s7, 4  ;;  %s1331_s30 = sshll.u32 %s134_s0, 4 }
  0xc9   :  { %s126_s13 = scalar_lea.hbm %s3812_s1, %s1329_s8 }
  0xca   :  { %s1777_s11 = scalar_lea.hbm %s126_s13, 32  ;;  %p1780_p8 = scmp.lt.u32.totalorder %s126_s13, %s3812_s1 }
  0xcb   :  { %p1778_p7 = scmp.ne.s32.totalorder %s126_s13, %s1777_s11  ;;  %p1781_p9 = scmp.lt.u32.totalorder %s2930_s19, %s1777_s11 }
  0xcc   :  { %p1783_p11 = scmp.lt.u32.totalorder %s1777_s11, %s126_s13 }
  0xcd   :  { %p1782_p10 = por %p1781_p9, %p1780_p8 }
  0xcf   :  { %p1784_p12 = por %p1783_p11, %p1782_p10 }
  0xd1   :  { %p1785_p13 = pnand %p1784_p12, %p1778_p7 }
  0xd3   :  { %1788 = shalt.err (!%p1785_p13)  }
  0xd4   :  { %s1789_s17 = scalar_lea.vmem %s130_s21, 32  ;;  %p1794_p1 = scmp.lt.s32.totalorder %s130_s21, %s2910_s25 }
  0xd5   :  { %p1790_p0 = scmp.ne.s32.totalorder %s130_s21, %s1789_s17  ;;  %p1795_p2 = scmp.lt.s32.totalorder %s2939_s22, %s1789_s17 }
  0xd7   :  { %p1796_p3 = por %p1795_p2, %p1794_p1 }
  0xd9   :  { %p1797_p4 = pnand %p1796_p3, %p1790_p0 }
  0xdb   :  { %1800 = shalt.err (!%p1797_p4)  }
  0xdc   :  { %132 = dma.hbm_to_vmem [thread:$0]  %s126_s13, 32, %s130_s21, [#allocation3], %s2801_s23, %s2801_s23, %s2802_s24 }
  0xdd   :  { %s137_s2 = sadd.s32 %s1331_s30, %s135_s9  ;;  %s2807_s20 = smov [#allocation2 + $0x7]  }
  0xde   :  { %s1332_s16 = sshll.u32 %s137_s2, 4  ;;  %s142_s26 = sshll.u32 %s2807_s20, 4  ;;  %s143_s26 = int_to_ptr.vmem [resolvable:$true] %s142_s26 }
  0xdf   :  { %s139_s5 = scalar_lea.hbm %s3812_s1, %s1332_s16 }
  0xe0   :  { %s1801_s3 = scalar_lea.hbm %s139_s5, 32  ;;  %p1804_p6 = scmp.lt.u32.totalorder %s139_s5, %s3812_s1 }
  0xe1   :  { %p1802_p5 = scmp.ne.s32.totalorder %s139_s5, %s1801_s3  ;;  %p1805_p7 = scmp.lt.u32.totalorder %s2930_s19, %s1801_s3 }
  0xe2   :  { %p1807_p9 = scmp.lt.u32.totalorder %s1801_s3, %s139_s5 }
  0xe3   :  { %p1806_p8 = por %p1805_p7, %p1804_p6 }
  0xe5   :  { %p1808_p10 = por %p1807_p9, %p1806_p8 }
  0xe7   :  { %p1809_p11 = pnand %p1808_p10, %p1802_p5 }
  0xe9   :  { %1812 = shalt.err (!%p1809_p11)  }
  0xea   :  { %s1813_s21 = scalar_lea.vmem %s143_s26, 32  ;;  %p1818_p13 = scmp.lt.s32.totalorder %s143_s26, %s2910_s25 }
  0xeb   :  { %p1814_p12 = scmp.ne.s32.totalorder %s143_s26, %s1813_s21  ;;  %p1819_p0 = scmp.lt.s32.totalorder %s2939_s22, %s1813_s21 }
  0xed   :  { %p1820_p1 = por %p1819_p0, %p1818_p13 }
  0xef   :  { %p1821_p2 = pnand %p1820_p1, %p1814_p12 }
  0xf1   :  { %1824 = shalt.err (!%p1821_p2)  }
  0xf2   :  { %145 = dma.hbm_to_vmem [thread:$0]  %s139_s5, 32, %s143_s26, [#allocation3], %s2801_s23, %s2801_s23, %s2802_s24 }
  0xf3   :  { %s1333_s18 = sld [smem:[#allocation5 + $0x8]]  ;;  %s2808_s7 = smov [#allocation2 + $0x10]  }
  0xf4   :  { %s155_s0 = sshll.u32 %s2808_s7, 4  ;;  %s1336_s8 = sld [smem:[#allocation5 + $0x9]]  ;;  %s3067_s0 = int_to_ptr.vmem [resolvable:$true] %s155_s0 }
  0xf5   :  { %s2809_s9 = smov [#allocation2 + $0x11]   ;;  %s3069_s12 = sld [smem:[#allocation5 + $0xa]] }
  0xf6   :  { %s168_s10 = sshll.u32 %s2809_s9, 4  ;;  %s2810_s13 = smov [#allocation2 + $0x12]   ;;  %s3071_s10 = int_to_ptr.vmem [resolvable:$true] %s168_s10 }
  0xf7   :  { %s3073_s30 = sshll.u32 %s2810_s13, 4  ;;  %s3075_s11 = sld [smem:[#allocation5 + $0xb]]  ;;  %s182_s30 = int_to_ptr.vmem [resolvable:$true] %s3073_s30 }
  0xf9   :  { %s147_s29 = sshrl.u32 %s1333_s18, 3  ;;  %s148_s15 = sand.u32 7, %s1333_s18  }
  0xfa   :  { %s1334_s17 = sshll.u32 %s147_s29, 4  ;;  %s160_s2 = sshrl.u32 %s1336_s8, 3 }
  0xfb   :  { %s150_s16 = sadd.s32 %s1334_s17, %s148_s15  ;;  %s161_s20 = sand.u32 7, %s1336_s8  }
  0xfc   :  { %s1335_s26 = sshll.u32 %s150_s16, 4  ;;  %s1337_s27 = sshll.u32 %s160_s2, 4 }
  0xfd   :  { %s152_s3 = scalar_lea.hbm %s3812_s1, %s1335_s26  ;;  %s163_s6 = sadd.s32 %s1337_s27, %s161_s20 }
  0xfe   :  { %s1825_s14 = scalar_lea.hbm %s152_s3, 32  ;;  %p1828_p4 = scmp.lt.u32.totalorder %s152_s3, %s3812_s1 }
  0xff   :  { %p1826_p3 = scmp.ne.s32.totalorder %s152_s3, %s1825_s14  ;;  %p1829_p5 = scmp.lt.u32.totalorder %s2930_s19, %s1825_s14 }
 0x100   :  { %p1831_p7 = scmp.lt.u32.totalorder %s1825_s14, %s152_s3 }
 0x101   :  { %p1830_p6 = por %p1829_p5, %p1828_p4 }
 0x103   :  { %p1832_p8 = por %p1831_p7, %p1830_p6 }
 0x105   :  { %p1833_p9 = pnand %p1832_p8, %p1826_p3 }
 0x107   :  { %1836 = shalt.err (!%p1833_p9)  }
 0x108   :  { %s1837_s18 = scalar_lea.vmem %s3067_s0, 32  ;;  %p1842_p11 = scmp.lt.s32.totalorder %s3067_s0, %s2910_s25 }
 0x109   :  { %p1838_p10 = scmp.ne.s32.totalorder %s3067_s0, %s1837_s18  ;;  %p1843_p12 = scmp.lt.s32.totalorder %s2939_s22, %s1837_s18 }
 0x10b   :  { %p1844_p13 = por %p1843_p12, %p1842_p11 }
 0x10d   :  { %p1845_p0 = pnand %p1844_p13, %p1838_p10 }
 0x10f   :  { %1848 = shalt.err (!%p1845_p0)  }
 0x110   :  { %158 = dma.hbm_to_vmem [thread:$0]  %s152_s3, 32, %s3067_s0, [#allocation3], %s2801_s23, %s2801_s23, %s2802_s24 }
 0x111   :  { %s1338_s8 = sshll.u32 %s163_s6, 4  ;;  %s173_s9 = sshrl.u32 %s3069_s12, 3 }
 0x112   :  { %s165_s15 = scalar_lea.hbm %s3812_s1, %s1338_s8  ;;  %s174_s17 = sand.u32 7, %s3069_s12  }
 0x113   :  { %s1849_s2 = scalar_lea.hbm %s165_s15, 32  ;;  %p1852_p2 = scmp.lt.u32.totalorder %s165_s15, %s3812_s1 }
 0x114   :  { %p1850_p1 = scmp.ne.s32.totalorder %s165_s15, %s1849_s2  ;;  %p1853_p3 = scmp.lt.u32.totalorder %s2930_s19, %s1849_s2 }
 0x115   :  { %p1855_p5 = scmp.lt.u32.totalorder %s1849_s2, %s165_s15 }
 0x116   :  { %p1854_p4 = por %p1853_p3, %p1852_p2 }
 0x118   :  { %p1856_p6 = por %p1855_p5, %p1854_p4 }
 0x11a   :  { %p1857_p7 = pnand %p1856_p6, %p1850_p1 }
 0x11c   :  { %1860 = shalt.err (!%p1857_p7)  }
 0x11d   :  { %s1861_s0 = scalar_lea.vmem %s3071_s10, 32  ;;  %p1866_p9 = scmp.lt.s32.totalorder %s3071_s10, %s2910_s25 }
 0x11e   :  { %p1862_p8 = scmp.ne.s32.totalorder %s3071_s10, %s1861_s0  ;;  %p1867_p10 = scmp.lt.s32.totalorder %s2939_s22, %s1861_s0 }
 0x120   :  { %p1868_p11 = por %p1867_p10, %p1866_p9 }
 0x122   :  { %p1869_p12 = pnand %p1868_p11, %p1862_p8 }
 0x124   :  { %1872 = shalt.err (!%p1869_p12)  }
 0x125   :  { %171 = dma.hbm_to_vmem [thread:$0]  %s165_s15, 32, %s3071_s10, [#allocation3], %s2801_s23, %s2801_s23, %s2802_s24 }
 0x126   :  { %s1340_s12 = sshll.u32 %s173_s9, 4  ;;  %s186_s27 = sshrl.u32 %s3075_s11, 3 }
 0x127   :  { %s176_s26 = sadd.s32 %s1340_s12, %s174_s17  ;;  %s187_s5 = sand.u32 7, %s3075_s11  }
 0x128   :  { %s1341_s28 = sshll.u32 %s176_s26, 4  ;;  %s1343_s21 = sshll.u32 %s186_s27, 4 }
 0x129   :  { %s178_s14 = scalar_lea.hbm %s3812_s1, %s1341_s28 }
 0x12a   :  { %s1873_s7 = scalar_lea.hbm %s178_s14, 32  ;;  %p1876_p0 = scmp.lt.u32.totalorder %s178_s14, %s3812_s1 }
 0x12b   :  { %p1874_p13 = scmp.ne.s32.totalorder %s178_s14, %s1873_s7  ;;  %p1877_p1 = scmp.lt.u32.totalorder %s2930_s19, %s1873_s7 }
 0x12c   :  { %p1879_p3 = scmp.lt.u32.totalorder %s1873_s7, %s178_s14 }
 0x12d   :  { %p1878_p2 = por %p1877_p1, %p1876_p0 }
 0x12f   :  { %p1880_p4 = por %p1879_p3, %p1878_p2 }
 0x131   :  { %p1881_p5 = pnand %p1880_p4, %p1874_p13 }
 0x133   :  { %1884 = shalt.err (!%p1881_p5)  }
 0x134   :  { %s1885_s10 = scalar_lea.vmem %s182_s30, 32  ;;  %p1890_p7 = scmp.lt.s32.totalorder %s182_s30, %s2910_s25 }
 0x135   :  { %p1886_p6 = scmp.ne.s32.totalorder %s182_s30, %s1885_s10  ;;  %p1891_p8 = scmp.lt.s32.totalorder %s2939_s22, %s1885_s10 }
 0x137   :  { %p1892_p9 = por %p1891_p8, %p1890_p7 }
 0x139   :  { %p1893_p10 = pnand %p1892_p9, %p1886_p6 }
 0x13b   :  { %1896 = shalt.err (!%p1893_p10)  }
 0x13c   :  { %184 = dma.hbm_to_vmem [thread:$0]  %s178_s14, 32, %s182_s30, [#allocation3], %s2801_s23, %s2801_s23, %s2802_s24 }
 0x13d   :  { %s189_s11 = sadd.s32 %s1343_s21, %s187_s5  ;;  %s2811_s13 = smov [#allocation2 + $0x13]  }
 0x13e   :  { %s1344_s9 = sshll.u32 %s189_s11, 4  ;;  %s194_s29 = sshll.u32 %s2811_s13, 4  ;;  %s195_s29 = int_to_ptr.vmem [resolvable:$true] %s194_s29 }
 0x13f   :  { %s191_s2 = scalar_lea.hbm %s3812_s1, %s1344_s9 }
 0x140   :  { %s1897_s16 = scalar_lea.hbm %s191_s2, 32  ;;  %p1900_p12 = scmp.lt.u32.totalorder %s191_s2, %s3812_s1 }
 0x141   :  { %p1898_p11 = scmp.ne.s32.totalorder %s191_s2, %s1897_s16  ;;  %p1901_p13 = scmp.lt.u32.totalorder %s2930_s19, %s1897_s16 }
 0x142   :  { %p1903_p1 = scmp.lt.u32.totalorder %s1897_s16, %s191_s2 }
 0x143   :  { %p1902_p0 = por %p1901_p13, %p1900_p12 }
 0x145   :  { %p1904_p2 = por %p1903_p1, %p1902_p0 }
 0x147   :  { %p1905_p3 = pnand %p1904_p2, %p1898_p11 }
 0x149   :  { %1908 = shalt.err (!%p1905_p3)  }
 0x14a   :  { %s1909_s30 = scalar_lea.vmem %s195_s29, 32  ;;  %p1914_p5 = scmp.lt.s32.totalorder %s195_s29, %s2910_s25 }
 0x14b   :  { %p1910_p4 = scmp.ne.s32.totalorder %s195_s29, %s1909_s30  ;;  %p1915_p6 = scmp.lt.s32.totalorder %s2939_s22, %s1909_s30 }
 0x14d   :  { %p1916_p7 = por %p1915_p6, %p1914_p5 }
 0x14f   :  { %p1917_p8 = pnand %p1916_p7, %p1910_p4 }
 0x151   :  { %1920 = shalt.err (!%p1917_p8)  }
 0x152   :  { %197 = dma.hbm_to_vmem [thread:$0]  %s191_s2, 32, %s195_s29, [#allocation3], %s2801_s23, %s2801_s23, %s2802_s24 }
 0x153   :  { %s1345_s12 = sld [smem:[#allocation5 + $0xc]]  ;;  %s2812_s26 = smov [#allocation2 + $0x14]  }
 0x154   :  { %s207_s27 = sshll.u32 %s2812_s26, 4  ;;  %s1348_s28 = sld [smem:[#allocation5 + $0xd]]  ;;  %s3138_s27 = int_to_ptr.vmem [resolvable:$true] %s207_s27 }
 0x155   :  { %s2813_s5 = smov [#allocation2 + $0x15]   ;;  %s3140_s6 = sld [smem:[#allocation5 + $0xe]] }
 0x156   :  { %s220_s3 = sshll.u32 %s2813_s5, 4  ;;  %s2814_s14 = smov [#allocation2 + $0x16]   ;;  %s3142_s3 = int_to_ptr.vmem [resolvable:$true] %s220_s3 }
 0x157   :  { %s3144_s21 = sshll.u32 %s2814_s14, 4  ;;  %s3146_s7 = sld [smem:[#allocation5 + $0xf]]  ;;  %s234_s21 = int_to_ptr.vmem [resolvable:$true] %s3144_s21 }
 0x159   :  { %s199_s18 = sshrl.u32 %s1345_s12, 3  ;;  %s200_s8 = sand.u32 7, %s1345_s12  }
 0x15a   :  { %s1346_s10 = sshll.u32 %s199_s18, 4  ;;  %s212_s11 = sshrl.u32 %s1348_s28, 3 }
 0x15b   :  { %s202_s9 = sadd.s32 %s1346_s10, %s200_s8  ;;  %s213_s13 = sand.u32 7, %s1348_s28  }
 0x15c   :  { %s1347_s29 = sshll.u32 %s202_s9, 4  ;;  %s1349_s15 = sshll.u32 %s212_s11, 4 }
 0x15d   :  { %s204_s16 = scalar_lea.hbm %s3812_s1, %s1347_s29  ;;  %s215_s20 = sadd.s32 %s1349_s15, %s213_s13 }
 0x15e   :  { %s1921_s0 = scalar_lea.hbm %s204_s16, 32  ;;  %p1924_p10 = scmp.lt.u32.totalorder %s204_s16, %s3812_s1 }
 0x15f   :  { %p1922_p9 = scmp.ne.s32.totalorder %s204_s16, %s1921_s0  ;;  %p1925_p11 = scmp.lt.u32.totalorder %s2930_s19, %s1921_s0 }
 0x160   :  { %p1927_p13 = scmp.lt.u32.totalorder %s1921_s0, %s204_s16 }
 0x161   :  { %p1926_p12 = por %p1925_p11, %p1924_p10 }
 0x163   :  { %p1928_p0 = por %p1927_p13, %p1926_p12 }
 0x165   :  { %p1929_p1 = pnand %p1928_p0, %p1922_p9 }
 0x167   :  { %1932 = shalt.err (!%p1929_p1)  }
 0x168   :  { %s1933_s12 = scalar_lea.vmem %s3138_s27, 32  ;;  %p1938_p3 = scmp.lt.s32.totalorder %s3138_s27, %s2910_s25 }
 0x169   :  { %p1934_p2 = scmp.ne.s32.totalorder %s3138_s27, %s1933_s12  ;;  %p1939_p4 = scmp.lt.s32.totalorder %s2939_s22, %s1933_s12 }
 0x16b   :  { %p1940_p5 = por %p1939_p4, %p1938_p3 }
 0x16d   :  { %p1941_p6 = pnand %p1940_p5, %p1934_p2 }
 0x16f   :  { %1944 = shalt.err (!%p1941_p6)  }
 0x170   :  { %210 = dma.hbm_to_vmem [thread:$0]  %s204_s16, 32, %s3138_s27, [#allocation3], %s2801_s23, %s2801_s23, %s2802_s24 }
 0x171   :  { %s1350_s28 = sshll.u32 %s215_s20, 4  ;;  %s225_s5 = sshrl.u32 %s3140_s6, 3 }
 0x172   :  { %s217_s8 = scalar_lea.hbm %s3812_s1, %s1350_s28  ;;  %s226_s10 = sand.u32 7, %s3140_s6  }
 0x173   :  { %s1945_s11 = scalar_lea.hbm %s217_s8, 32  ;;  %p1948_p8 = scmp.lt.u32.totalorder %s217_s8, %s3812_s1 }
 0x174   :  { %p1946_p7 = scmp.ne.s32.totalorder %s217_s8, %s1945_s11  ;;  %p1949_p9 = scmp.lt.u32.totalorder %s2930_s19, %s1945_s11 }
 0x175   :  { %p1951_p11 = scmp.lt.u32.totalorder %s1945_s11, %s217_s8 }
 0x176   :  { %p1950_p10 = por %p1949_p9, %p1948_p8 }
 0x178   :  { %p1952_p12 = por %p1951_p11, %p1950_p10 }
 0x17a   :  { %p1953_p13 = pnand %p1952_p12, %p1946_p7 }
 0x17c   :  { %1956 = shalt.err (!%p1953_p13)  }
 0x17d   :  { %s1957_s27 = scalar_lea.vmem %s3142_s3, 32  ;;  %p1962_p1 = scmp.lt.s32.totalorder %s3142_s3, %s2910_s25 }
 0x17e   :  { %p1958_p0 = scmp.ne.s32.totalorder %s3142_s3, %s1957_s27  ;;  %p1963_p2 = scmp.lt.s32.totalorder %s2939_s22, %s1957_s27 }
 0x180   :  { %p1964_p3 = por %p1963_p2, %p1962_p1 }
 0x182   :  { %p1965_p4 = pnand %p1964_p3, %p1958_p0 }
 0x184   :  { %1968 = shalt.err (!%p1965_p4)  }
 0x185   :  { %223 = dma.hbm_to_vmem [thread:$0]  %s217_s8, 32, %s3142_s3, [#allocation3], %s2801_s23, %s2801_s23, %s2802_s24 }
 0x186   :  { %s1352_s6 = sshll.u32 %s225_s5, 4  ;;  %s238_s15 = sshrl.u32 %s3146_s7, 3 }
 0x187   :  { %s228_s29 = sadd.s32 %s1352_s6, %s226_s10  ;;  %s239_s2 = sand.u32 7, %s3146_s7  }
 0x188   :  { %s1353_s17 = sshll.u32 %s228_s29, 4  ;;  %s1355_s30 = sshll.u32 %s238_s15, 4 }
 0x189   :  { %s230_s0 = scalar_lea.hbm %s3812_s1, %s1353_s17 }
 0x18a   :  { %s1969_s26 = scalar_lea.hbm %s230_s0, 32  ;;  %p1972_p6 = scmp.lt.u32.totalorder %s230_s0, %s3812_s1 }
 0x18b   :  { %p1970_p5 = scmp.ne.s32.totalorder %s230_s0, %s1969_s26  ;;  %p1973_p7 = scmp.lt.u32.totalorder %s2930_s19, %s1969_s26 }
 0x18c   :  { %p1975_p9 = scmp.lt.u32.totalorder %s1969_s26, %s230_s0 }
 0x18d   :  { %p1974_p8 = por %p1973_p7, %p1972_p6 }
 0x18f   :  { %p1976_p10 = por %p1975_p9, %p1974_p8 }
 0x191   :  { %p1977_p11 = pnand %p1976_p10, %p1970_p5 }
 0x193   :  { %1980 = shalt.err (!%p1977_p11)  }
 0x194   :  { %s1981_s3 = scalar_lea.vmem %s234_s21, 32  ;;  %p1986_p13 = scmp.lt.s32.totalorder %s234_s21, %s2910_s25 }
 0x195   :  { %p1982_p12 = scmp.ne.s32.totalorder %s234_s21, %s1981_s3  ;;  %p1987_p0 = scmp.lt.s32.totalorder %s2939_s22, %s1981_s3 }
 0x197   :  { %p1988_p1 = por %p1987_p0, %p1986_p13 }
 0x199   :  { %p1989_p2 = pnand %p1988_p1, %p1982_p12 }
 0x19b   :  { %1992 = shalt.err (!%p1989_p2)  }
 0x19c   :  { %236 = dma.hbm_to_vmem [thread:$0]  %s230_s0, 32, %s234_s21, [#allocation3], %s2801_s23, %s2801_s23, %s2802_s24 }
 0x19d   :  { %s241_s7 = sadd.s32 %s1355_s30, %s239_s2  ;;  %s2815_s14 = smov [#allocation2 + $0x17]  }
 0x19e   :  { %s1356_s5 = sshll.u32 %s241_s7, 4  ;;  %s246_s18 = sshll.u32 %s2815_s14, 4  ;;  %s247_s18 = int_to_ptr.vmem [resolvable:$true] %s246_s18 }
 0x19f   :  { %s243_s11 = scalar_lea.hbm %s3812_s1, %s1356_s5 }
 0x1a0   :  { %s1993_s9 = scalar_lea.hbm %s243_s11, 32  ;;  %p1996_p4 = scmp.lt.u32.totalorder %s243_s11, %s3812_s1 }
 0x1a1   :  { %p1994_p3 = scmp.ne.s32.totalorder %s243_s11, %s1993_s9  ;;  %p1997_p5 = scmp.lt.u32.totalorder %s2930_s19, %s1993_s9 }
 0x1a2   :  { %p1999_p7 = scmp.lt.u32.totalorder %s1993_s9, %s243_s11 }
 0x1a3   :  { %p1998_p6 = por %p1997_p5, %p1996_p4 }
 0x1a5   :  { %p2000_p8 = por %p1999_p7, %p1998_p6 }
 0x1a7   :  { %p2001_p9 = pnand %p2000_p8, %p1994_p3 }
 0x1a9   :  { %2004 = shalt.err (!%p2001_p9)  }
 0x1aa   :  { %s2005_s21 = scalar_lea.vmem %s247_s18, 32  ;;  %p2010_p11 = scmp.lt.s32.totalorder %s247_s18, %s2910_s25 }
 0x1ab   :  { %p2006_p10 = scmp.ne.s32.totalorder %s247_s18, %s2005_s21  ;;  %p2011_p12 = scmp.lt.s32.totalorder %s2939_s22, %s2005_s21 }
 0x1ad   :  { %p2012_p13 = por %p2011_p12, %p2010_p11 }
 0x1af   :  { %p2013_p0 = pnand %p2012_p13, %p2006_p10 }
 0x1b1   :  { %2016 = shalt.err (!%p2013_p0)  }
 0x1b2   :  { %249 = dma.hbm_to_vmem [thread:$0]  %s243_s11, 32, %s247_s18, [#allocation3], %s2801_s23, %s2801_s23, %s2802_s24 }
 0x1b3   :  { %s1357_s6 = sld [smem:[#allocation5 + $0x10]]  ;;  %s2816_s29 = smov [#allocation2 + $0x20]  }
 0x1b4   :  { %s259_s15 = sshll.u32 %s2816_s29, 4  ;;  %s1360_s17 = sld [smem:[#allocation5 + $0x11]]  ;;  %s3209_s15 = int_to_ptr.vmem [resolvable:$true] %s259_s15 }
 0x1b5   :  { %s2817_s2 = smov [#allocation2 + $0x21]   ;;  %s3211_s20 = sld [smem:[#allocation5 + $0x12]] }
 0x1b6   :  { %s272_s16 = sshll.u32 %s2817_s2, 4  ;;  %s2818_s0 = smov [#allocation2 + $0x22]   ;;  %s3213_s16 = int_to_ptr.vmem [resolvable:$true] %s272_s16 }
 0x1b7   :  { %s3215_s30 = sshll.u32 %s2818_s0, 4  ;;  %s3217_s26 = sld [smem:[#allocation5 + $0x13]]  ;;  %s286_s30 = int_to_ptr.vmem [resolvable:$true] %s3215_s30 }
 0x1b9   :  { %s251_s12 = sshrl.u32 %s1357_s6, 3  ;;  %s252_s28 = sand.u32 7, %s1357_s6  }
 0x1ba   :  { %s1358_s3 = sshll.u32 %s251_s12, 4  ;;  %s264_s7 = sshrl.u32 %s1360_s17, 3 }
 0x1bb   :  { %s254_s5 = sadd.s32 %s1358_s3, %s252_s28  ;;  %s265_s14 = sand.u32 7, %s1360_s17  }
 0x1bc   :  { %s1359_s18 = sshll.u32 %s254_s5, 4  ;;  %s1361_s8 = sshll.u32 %s264_s7, 4 }
 0x1bd   :  { %s256_s9 = scalar_lea.hbm %s3812_s1, %s1359_s18  ;;  %s267_s13 = sadd.s32 %s1361_s8, %s265_s14 }
 0x1be   :  { %s2017_s27 = scalar_lea.hbm %s256_s9, 32  ;;  %p2020_p2 = scmp.lt.u32.totalorder %s256_s9, %s3812_s1 }
 0x1bf   :  { %p2018_p1 = scmp.ne.s32.totalorder %s256_s9, %s2017_s27  ;;  %p2021_p3 = scmp.lt.u32.totalorder %s2930_s19, %s2017_s27 }
 0x1c0   :  { %p2023_p5 = scmp.lt.u32.totalorder %s2017_s27, %s256_s9 }
 0x1c1   :  { %p2022_p4 = por %p2021_p3, %p2020_p2 }
 0x1c3   :  { %p2024_p6 = por %p2023_p5, %p2022_p4 }
 0x1c5   :  { %p2025_p7 = pnand %p2024_p6, %p2018_p1 }
 0x1c7   :  { %2028 = shalt.err (!%p2025_p7)  }
 0x1c8   :  { %s2029_s6 = scalar_lea.vmem %s3209_s15, 32  ;;  %p2034_p9 = scmp.lt.s32.totalorder %s3209_s15, %s2910_s25 }
 0x1c9   :  { %p2030_p8 = scmp.ne.s32.totalorder %s3209_s15, %s2029_s6  ;;  %p2035_p10 = scmp.lt.s32.totalorder %s2939_s22, %s2029_s6 }
 0x1cb   :  { %p2036_p11 = por %p2035_p10, %p2034_p9 }
 0x1cd   :  { %p2037_p12 = pnand %p2036_p11, %p2030_p8 }
 0x1cf   :  { %2040 = shalt.err (!%p2037_p12)  }
 0x1d0   :  { %262 = dma.hbm_to_vmem [thread:$0]  %s256_s9, 32, %s3209_s15, [#allocation3], %s2801_s23, %s2801_s23, %s2802_s24 }
 0x1d1   :  { %s1362_s17 = sshll.u32 %s267_s13, 4  ;;  %s277_s2 = sshrl.u32 %s3211_s20, 3 }
 0x1d2   :  { %s269_s28 = scalar_lea.hbm %s3812_s1, %s1362_s17  ;;  %s278_s3 = sand.u32 7, %s3211_s20  }
 0x1d3   :  { %s2041_s7 = scalar_lea.hbm %s269_s28, 32  ;;  %p2044_p0 = scmp.lt.u32.totalorder %s269_s28, %s3812_s1 }
 0x1d4   :  { %p2042_p13 = scmp.ne.s32.totalorder %s269_s28, %s2041_s7  ;;  %p2045_p1 = scmp.lt.u32.totalorder %s2930_s19, %s2041_s7 }
 0x1d5   :  { %p2047_p3 = scmp.lt.u32.totalorder %s2041_s7, %s269_s28 }
 0x1d6   :  { %p2046_p2 = por %p2045_p1, %p2044_p0 }
 0x1d8   :  { %p2048_p4 = por %p2047_p3, %p2046_p2 }
 0x1da   :  { %p2049_p5 = pnand %p2048_p4, %p2042_p13 }
 0x1dc   :  { %2052 = shalt.err (!%p2049_p5)  }
 0x1dd   :  { %s2053_s15 = scalar_lea.vmem %s3213_s16, 32  ;;  %p2058_p7 = scmp.lt.s32.totalorder %s3213_s16, %s2910_s25 }
 0x1de   :  { %p2054_p6 = scmp.ne.s32.totalorder %s3213_s16, %s2053_s15  ;;  %p2059_p8 = scmp.lt.s32.totalorder %s2939_s22, %s2053_s15 }
 0x1e0   :  { %p2060_p9 = por %p2059_p8, %p2058_p7 }
 0x1e2   :  { %p2061_p10 = pnand %p2060_p9, %p2054_p6 }
 0x1e4   :  { %2064 = shalt.err (!%p2061_p10)  }
 0x1e5   :  { %275 = dma.hbm_to_vmem [thread:$0]  %s269_s28, 32, %s3213_s16, [#allocation3], %s2801_s23, %s2801_s23, %s2802_s24 }
 0x1e6   :  { %s1364_s20 = sshll.u32 %s277_s2, 4  ;;  %s290_s8 = sshrl.u32 %s3217_s26, 3 }
 0x1e7   :  { %s280_s18 = sadd.s32 %s1364_s20, %s278_s3  ;;  %s291_s11 = sand.u32 7, %s3217_s26  }
 0x1e8   :  { %s1365_s10 = sshll.u32 %s280_s18, 4  ;;  %s1367_s21 = sshll.u32 %s290_s8, 4 }
 0x1e9   :  { %s282_s27 = scalar_lea.hbm %s3812_s1, %s1365_s10 }
 0x1ea   :  { %s2065_s29 = scalar_lea.hbm %s282_s27, 32  ;;  %p2068_p12 = scmp.lt.u32.totalorder %s282_s27, %s3812_s1 }
 0x1eb   :  { %p2066_p11 = scmp.ne.s32.totalorder %s282_s27, %s2065_s29  ;;  %p2069_p13 = scmp.lt.u32.totalorder %s2930_s19, %s2065_s29 }
 0x1ec   :  { %p2071_p1 = scmp.lt.u32.totalorder %s2065_s29, %s282_s27 }
 0x1ed   :  { %p2070_p0 = por %p2069_p13, %p2068_p12 }
 0x1ef   :  { %p2072_p2 = por %p2071_p1, %p2070_p0 }
 0x1f1   :  { %p2073_p3 = pnand %p2072_p2, %p2066_p11 }
 0x1f3   :  { %2076 = shalt.err (!%p2073_p3)  }
 0x1f4   :  { %s2077_s16 = scalar_lea.vmem %s286_s30, 32  ;;  %p2082_p5 = scmp.lt.s32.totalorder %s286_s30, %s2910_s25 }
 0x1f5   :  { %p2078_p4 = scmp.ne.s32.totalorder %s286_s30, %s2077_s16  ;;  %p2083_p6 = scmp.lt.s32.totalorder %s2939_s22, %s2077_s16 }
 0x1f7   :  { %p2084_p7 = por %p2083_p6, %p2082_p5 }
 0x1f9   :  { %p2085_p8 = pnand %p2084_p7, %p2078_p4 }
 0x1fb   :  { %2088 = shalt.err (!%p2085_p8)  }
 0x1fc   :  { %288 = dma.hbm_to_vmem [thread:$0]  %s282_s27, 32, %s286_s30, [#allocation3], %s2801_s23, %s2801_s23, %s2802_s24 }
 0x1fd   :  { %s293_s26 = sadd.s32 %s1367_s21, %s291_s11  ;;  %s2819_s0 = smov [#allocation2 + $0x23]  }
 0x1fe   :  { %s1368_s2 = sshll.u32 %s293_s26, 4  ;;  %s298_s12 = sshll.u32 %s2819_s0, 4  ;;  %s299_s12 = int_to_ptr.vmem [resolvable:$true] %s298_s12 }
 0x1ff   :  { %s295_s7 = scalar_lea.hbm %s3812_s1, %s1368_s2 }
 0x200   :  { %s2089_s5 = scalar_lea.hbm %s295_s7, 32  ;;  %p2092_p10 = scmp.lt.u32.totalorder %s295_s7, %s3812_s1 }
 0x201   :  { %p2090_p9 = scmp.ne.s32.totalorder %s295_s7, %s2089_s5  ;;  %p2093_p11 = scmp.lt.u32.totalorder %s2930_s19, %s2089_s5 }
 0x202   :  { %p2095_p13 = scmp.lt.u32.totalorder %s2089_s5, %s295_s7 }
 0x203   :  { %p2094_p12 = por %p2093_p11, %p2092_p10 }
 0x205   :  { %p2096_p0 = por %p2095_p13, %p2094_p12 }
 0x207   :  { %p2097_p1 = pnand %p2096_p0, %p2090_p9 }
 0x209   :  { %2100 = shalt.err (!%p2097_p1)  }
 0x20a   :  { %s2101_s30 = scalar_lea.vmem %s299_s12, 32  ;;  %p2106_p3 = scmp.lt.s32.totalorder %s299_s12, %s2910_s25 }
 0x20b   :  { %p2102_p2 = scmp.ne.s32.totalorder %s299_s12, %s2101_s30  ;;  %p2107_p4 = scmp.lt.s32.totalorder %s2939_s22, %s2101_s30 }
 0x20d   :  { %p2108_p5 = por %p2107_p4, %p2106_p3 }
 0x20f   :  { %p2109_p6 = pnand %p2108_p5, %p2102_p2 }
 0x211   :  { %2112 = shalt.err (!%p2109_p6)  }
 0x212   :  { %301 = dma.hbm_to_vmem [thread:$0]  %s295_s7, 32, %s299_s12, [#allocation3], %s2801_s23, %s2801_s23, %s2802_s24 }
 0x213   :  { %s1369_s20 = sld [smem:[#allocation5 + $0x14]]  ;;  %s2820_s18 = smov [#allocation2 + $0x24]  }
 0x214   :  { %s311_s8 = sshll.u32 %s2820_s18, 4  ;;  %s1372_s10 = sld [smem:[#allocation5 + $0x15]]  ;;  %s3280_s8 = int_to_ptr.vmem [resolvable:$true] %s311_s8 }
 0x215   :  { %s2821_s11 = smov [#allocation2 + $0x25]   ;;  %s3282_s13 = sld [smem:[#allocation5 + $0x16]] }
 0x216   :  { %s324_s9 = sshll.u32 %s2821_s11, 4  ;;  %s2822_s27 = smov [#allocation2 + $0x26]   ;;  %s3284_s9 = int_to_ptr.vmem [resolvable:$true] %s324_s9 }
 0x217   :  { %s3286_s21 = sshll.u32 %s2822_s27, 4  ;;  %s3288_s29 = sld [smem:[#allocation5 + $0x17]]  ;;  %s338_s21 = int_to_ptr.vmem [resolvable:$true] %s3286_s21 }
 0x219   :  { %s303_s6 = sshrl.u32 %s1369_s20, 3  ;;  %s304_s17 = sand.u32 7, %s1369_s20  }
 0x21a   :  { %s1370_s16 = sshll.u32 %s303_s6, 4  ;;  %s316_s26 = sshrl.u32 %s1372_s10, 3 }
 0x21b   :  { %s306_s2 = sadd.s32 %s1370_s16, %s304_s17  ;;  %s317_s0 = sand.u32 7, %s1372_s10  }
 0x21c   :  { %s1371_s12 = sshll.u32 %s306_s2, 4  ;;  %s1373_s28 = sshll.u32 %s316_s26, 4 }
 0x21d   :  { %s308_s5 = scalar_lea.hbm %s3812_s1, %s1371_s12  ;;  %s319_s14 = sadd.s32 %s1373_s28, %s317_s0 }
 0x21e   :  { %s2113_s15 = scalar_lea.hbm %s308_s5, 32  ;;  %p2116_p8 = scmp.lt.u32.totalorder %s308_s5, %s3812_s1 }
 0x21f   :  { %p2114_p7 = scmp.ne.s32.totalorder %s308_s5, %s2113_s15  ;;  %p2117_p9 = scmp.lt.u32.totalorder %s2930_s19, %s2113_s15 }
 0x220   :  { %p2119_p11 = scmp.lt.u32.totalorder %s2113_s15, %s308_s5 }
 0x221   :  { %p2118_p10 = por %p2117_p9, %p2116_p8 }
 0x223   :  { %p2120_p12 = por %p2119_p11, %p2118_p10 }
 0x225   :  { %p2121_p13 = pnand %p2120_p12, %p2114_p7 }
 0x227   :  { %2124 = shalt.err (!%p2121_p13)  }
 0x228   :  { %s2125_s20 = scalar_lea.vmem %s3280_s8, 32  ;;  %p2130_p1 = scmp.lt.s32.totalorder %s3280_s8, %s2910_s25 }
 0x229   :  { %p2126_p0 = scmp.ne.s32.totalorder %s3280_s8, %s2125_s20  ;;  %p2131_p2 = scmp.lt.s32.totalorder %s2939_s22, %s2125_s20 }
 0x22b   :  { %p2132_p3 = por %p2131_p2, %p2130_p1 }
 0x22d   :  { %p2133_p4 = pnand %p2132_p3, %p2126_p0 }
 0x22f   :  { %2136 = shalt.err (!%p2133_p4)  }
 0x230   :  { %314 = dma.hbm_to_vmem [thread:$0]  %s308_s5, 32, %s3280_s8, [#allocation3], %s2801_s23, %s2801_s23, %s2802_s24 }
 0x231   :  { %s1374_s10 = sshll.u32 %s319_s14, 4  ;;  %s329_s11 = sshrl.u32 %s3282_s13, 3 }
 0x232   :  { %s321_s17 = scalar_lea.hbm %s3812_s1, %s1374_s10  ;;  %s330_s16 = sand.u32 7, %s3282_s13  }
 0x233   :  { %s2137_s26 = scalar_lea.hbm %s321_s17, 32  ;;  %p2140_p6 = scmp.lt.u32.totalorder %s321_s17, %s3812_s1 }
 0x234   :  { %p2138_p5 = scmp.ne.s32.totalorder %s321_s17, %s2137_s26  ;;  %p2141_p7 = scmp.lt.u32.totalorder %s2930_s19, %s2137_s26 }
 0x235   :  { %p2143_p9 = scmp.lt.u32.totalorder %s2137_s26, %s321_s17 }
 0x236   :  { %p2142_p8 = por %p2141_p7, %p2140_p6 }
 0x238   :  { %p2144_p10 = por %p2143_p9, %p2142_p8 }
 0x23a   :  { %p2145_p11 = pnand %p2144_p10, %p2138_p5 }
 0x23c   :  { %2148 = shalt.err (!%p2145_p11)  }
 0x23d   :  { %s2149_s8 = scalar_lea.vmem %s3284_s9, 32  ;;  %p2154_p13 = scmp.lt.s32.totalorder %s3284_s9, %s2910_s25 }
 0x23e   :  { %p2150_p12 = scmp.ne.s32.totalorder %s3284_s9, %s2149_s8  ;;  %p2155_p0 = scmp.lt.s32.totalorder %s2939_s22, %s2149_s8 }
 0x240   :  { %p2156_p1 = por %p2155_p0, %p2154_p13 }
 0x242   :  { %p2157_p2 = pnand %p2156_p1, %p2150_p12 }
 0x244   :  { %2160 = shalt.err (!%p2157_p2)  }
 0x245   :  { %327 = dma.hbm_to_vmem [thread:$0]  %s321_s17, 32, %s3284_s9, [#allocation3], %s2801_s23, %s2801_s23, %s2802_s24 }
 0x246   :  { %s1376_s13 = sshll.u32 %s329_s11, 4  ;;  %s342_s28 = sshrl.u32 %s3288_s29, 3 }
 0x247   :  { %s332_s12 = sadd.s32 %s1376_s13, %s330_s16  ;;  %s343_s7 = sand.u32 7, %s3288_s29  }
 0x248   :  { %s1377_s3 = sshll.u32 %s332_s12, 4  ;;  %s1379_s30 = sshll.u32 %s342_s28, 4 }
 0x249   :  { %s334_s15 = scalar_lea.hbm %s3812_s1, %s1377_s3 }
 0x24a   :  { %s2161_s18 = scalar_lea.hbm %s334_s15, 32  ;;  %p2164_p4 = scmp.lt.u32.totalorder %s334_s15, %s3812_s1 }
 0x24b   :  { %p2162_p3 = scmp.ne.s32.totalorder %s334_s15, %s2161_s18  ;;  %p2165_p5 = scmp.lt.u32.totalorder %s2930_s19, %s2161_s18 }
 0x24c   :  { %p2167_p7 = scmp.lt.u32.totalorder %s2161_s18, %s334_s15 }
 0x24d   :  { %p2166_p6 = por %p2165_p5, %p2164_p4 }
 0x24f   :  { %p2168_p8 = por %p2167_p7, %p2166_p6 }
 0x251   :  { %p2169_p9 = pnand %p2168_p8, %p2162_p3 }
 0x253   :  { %2172 = shalt.err (!%p2169_p9)  }
 0x254   :  { %s2173_s9 = scalar_lea.vmem %s338_s21, 32  ;;  %p2178_p11 = scmp.lt.s32.totalorder %s338_s21, %s2910_s25 }
 0x255   :  { %p2174_p10 = scmp.ne.s32.totalorder %s338_s21, %s2173_s9  ;;  %p2179_p12 = scmp.lt.s32.totalorder %s2939_s22, %s2173_s9 }
 0x257   :  { %p2180_p13 = por %p2179_p12, %p2178_p11 }
 0x259   :  { %p2181_p0 = pnand %p2180_p13, %p2174_p10 }
 0x25b   :  { %2184 = shalt.err (!%p2181_p0)  }
 0x25c   :  { %340 = dma.hbm_to_vmem [thread:$0]  %s334_s15, 32, %s338_s21, [#allocation3], %s2801_s23, %s2801_s23, %s2802_s24 }
 0x25d   :  { %s345_s29 = sadd.s32 %s1379_s30, %s343_s7  ;;  %s2823_s27 = smov [#allocation2 + $0x27]  }
 0x25e   :  { %s1380_s11 = sshll.u32 %s345_s29, 4  ;;  %s350_s6 = sshll.u32 %s2823_s27, 4  ;;  %s351_s6 = int_to_ptr.vmem [resolvable:$true] %s350_s6 }
 0x25f   :  { %s347_s26 = scalar_lea.hbm %s3812_s1, %s1380_s11 }
 0x260   :  { %s2185_s2 = scalar_lea.hbm %s347_s26, 32  ;;  %p2188_p2 = scmp.lt.u32.totalorder %s347_s26, %s3812_s1 }
 0x261   :  { %p2186_p1 = scmp.ne.s32.totalorder %s347_s26, %s2185_s2  ;;  %p2189_p3 = scmp.lt.u32.totalorder %s2930_s19, %s2185_s2 }
 0x262   :  { %p2191_p5 = scmp.lt.u32.totalorder %s2185_s2, %s347_s26 }
 0x263   :  { %p2190_p4 = por %p2189_p3, %p2188_p2 }
 0x265   :  { %p2192_p6 = por %p2191_p5, %p2190_p4 }
 0x267   :  { %p2193_p7 = pnand %p2192_p6, %p2186_p1 }
 0x269   :  { %2196 = shalt.err (!%p2193_p7)  }
 0x26a   :  { %s2197_s21 = scalar_lea.vmem %s351_s6, 32  ;;  %p2202_p9 = scmp.lt.s32.totalorder %s351_s6, %s2910_s25 }
 0x26b   :  { %p2198_p8 = scmp.ne.s32.totalorder %s351_s6, %s2197_s21  ;;  %p2203_p10 = scmp.lt.s32.totalorder %s2939_s22, %s2197_s21 }
 0x26d   :  { %p2204_p11 = por %p2203_p10, %p2202_p9 }
 0x26f   :  { %p2205_p12 = pnand %p2204_p11, %p2198_p8 }
 0x271   :  { %2208 = shalt.err (!%p2205_p12)  }
 0x272   :  { %353 = dma.hbm_to_vmem [thread:$0]  %s347_s26, 32, %s351_s6, [#allocation3], %s2801_s23, %s2801_s23, %s2802_s24 }
 0x273   :  { %s1381_s13 = sld [smem:[#allocation5 + $0x18]]  ;;  %s2824_s12 = smov [#allocation2 + $0x30]  }
 0x274   :  { %s363_s28 = sshll.u32 %s2824_s12, 4  ;;  %s1384_s3 = sld [smem:[#allocation5 + $0x19]]  ;;  %s3351_s28 = int_to_ptr.vmem [resolvable:$true] %s363_s28 }
 0x275   :  { %s2825_s7 = smov [#allocation2 + $0x31]   ;;  %s3353_s14 = sld [smem:[#allocation5 + $0x1a]] }
 0x276   :  { %s376_s5 = sshll.u32 %s2825_s7, 4  ;;  %s2826_s15 = smov [#allocation2 + $0x32]   ;;  %s3355_s5 = int_to_ptr.vmem [resolvable:$true] %s376_s5 }
 0x277   :  { %s3357_s30 = sshll.u32 %s2826_s15, 4  ;;  %s3359_s18 = sld [smem:[#allocation5 + $0x1b]]  ;;  %s390_s30 = int_to_ptr.vmem [resolvable:$true] %s3357_s30 }
 0x279   :  { %s355_s20 = sshrl.u32 %s1381_s13, 3  ;;  %s356_s10 = sand.u32 7, %s1381_s13  }
 0x27a   :  { %s1382_s9 = sshll.u32 %s355_s20, 4  ;;  %s368_s29 = sshrl.u32 %s1384_s3, 3 }
 0x27b   :  { %s358_s11 = sadd.s32 %s1382_s9, %s356_s10  ;;  %s369_s27 = sand.u32 7, %s1384_s3  }
 0x27c   :  { %s1383_s6 = sshll.u32 %s358_s11, 4  ;;  %s1385_s17 = sshll.u32 %s368_s29, 4 }
 0x27d   :  { %s360_s2 = scalar_lea.hbm %s3812_s1, %s1383_s6  ;;  %s371_s0 = sadd.s32 %s1385_s17, %s369_s27 }
 0x27e   :  { %s2209_s8 = scalar_lea.hbm %s360_s2, 32  ;;  %p2212_p0 = scmp.lt.u32.totalorder %s360_s2, %s3812_s1 }
 0x27f   :  { %p2210_p13 = scmp.ne.s32.totalorder %s360_s2, %s2209_s8  ;;  %p2213_p1 = scmp.lt.u32.totalorder %s2930_s19, %s2209_s8 }
 0x280   :  { %p2215_p3 = scmp.lt.u32.totalorder %s2209_s8, %s360_s2 }
 0x281   :  { %p2214_p2 = por %p2213_p1, %p2212_p0 }
 0x283   :  { %p2216_p4 = por %p2215_p3, %p2214_p2 }
 0x285   :  { %p2217_p5 = pnand %p2216_p4, %p2210_p13 }
 0x287   :  { %2220 = shalt.err (!%p2217_p5)  }
 0x288   :  { %s2221_s13 = scalar_lea.vmem %s3351_s28, 32  ;;  %p2226_p7 = scmp.lt.s32.totalorder %s3351_s28, %s2910_s25 }
 0x289   :  { %p2222_p6 = scmp.ne.s32.totalorder %s3351_s28, %s2221_s13  ;;  %p2227_p8 = scmp.lt.s32.totalorder %s2939_s22, %s2221_s13 }
 0x28b   :  { %p2228_p9 = por %p2227_p8, %p2226_p7 }
 0x28d   :  { %p2229_p10 = pnand %p2228_p9, %p2222_p6 }
 0x28f   :  { %2232 = shalt.err (!%p2229_p10)  }
 0x290   :  { %366 = dma.hbm_to_vmem [thread:$0]  %s360_s2, 32, %s3351_s28, [#allocation3], %s2801_s23, %s2801_s23, %s2802_s24 }
 0x291   :  { %s1386_s3 = sshll.u32 %s371_s0, 4  ;;  %s381_s7 = sshrl.u32 %s3353_s14, 3 }
 0x292   :  { %s373_s10 = scalar_lea.hbm %s3812_s1, %s1386_s3  ;;  %s382_s9 = sand.u32 7, %s3353_s14  }
 0x293   :  { %s2233_s29 = scalar_lea.hbm %s373_s10, 32  ;;  %p2236_p12 = scmp.lt.u32.totalorder %s373_s10, %s3812_s1 }
 0x294   :  { %p2234_p11 = scmp.ne.s32.totalorder %s373_s10, %s2233_s29  ;;  %p2237_p13 = scmp.lt.u32.totalorder %s2930_s19, %s2233_s29 }
 0x295   :  { %p2239_p1 = scmp.lt.u32.totalorder %s2233_s29, %s373_s10 }
 0x296   :  { %p2238_p0 = por %p2237_p13, %p2236_p12 }
 0x298   :  { %p2240_p2 = por %p2239_p1, %p2238_p0 }
 0x29a   :  { %p2241_p3 = pnand %p2240_p2, %p2234_p11 }
 0x29c   :  { %2244 = shalt.err (!%p2241_p3)  }
 0x29d   :  { %s2245_s28 = scalar_lea.vmem %s3355_s5, 32  ;;  %p2250_p5 = scmp.lt.s32.totalorder %s3355_s5, %s2910_s25 }
 0x29e   :  { %p2246_p4 = scmp.ne.s32.totalorder %s3355_s5, %s2245_s28  ;;  %p2251_p6 = scmp.lt.s32.totalorder %s2939_s22, %s2245_s28 }
 0x2a0   :  { %p2252_p7 = por %p2251_p6, %p2250_p5 }
 0x2a2   :  { %p2253_p8 = pnand %p2252_p7, %p2246_p4 }
 0x2a4   :  { %2256 = shalt.err (!%p2253_p8)  }
 0x2a5   :  { %379 = dma.hbm_to_vmem [thread:$0]  %s373_s10, 32, %s3355_s5, [#allocation3], %s2801_s23, %s2801_s23, %s2802_s24 }
 0x2a6   :  { %s1388_s14 = sshll.u32 %s381_s7, 4  ;;  %s394_s17 = sshrl.u32 %s3359_s18, 3 }
 0x2a7   :  { %s384_s6 = sadd.s32 %s1388_s14, %s382_s9  ;;  %s395_s26 = sand.u32 7, %s3359_s18  }
 0x2a8   :  { %s1389_s16 = sshll.u32 %s384_s6, 4  ;;  %s1391_s21 = sshll.u32 %s394_s17, 4 }
 0x2a9   :  { %s386_s8 = scalar_lea.hbm %s3812_s1, %s1389_s16 }
 0x2aa   :  { %s2257_s12 = scalar_lea.hbm %s386_s8, 32  ;;  %p2260_p10 = scmp.lt.u32.totalorder %s386_s8, %s3812_s1 }
 0x2ab   :  { %p2258_p9 = scmp.ne.s32.totalorder %s386_s8, %s2257_s12  ;;  %p2261_p11 = scmp.lt.u32.totalorder %s2930_s19, %s2257_s12 }
 0x2ac   :  { %p2263_p13 = scmp.lt.u32.totalorder %s2257_s12, %s386_s8 }
 0x2ad   :  { %p2262_p12 = por %p2261_p11, %p2260_p10 }
 0x2af   :  { %p2264_p0 = por %p2263_p13, %p2262_p12 }
 0x2b1   :  { %p2265_p1 = pnand %p2264_p0, %p2258_p9 }
 0x2b3   :  { %2268 = shalt.err (!%p2265_p1)  }
 0x2b4   :  { %s2269_s5 = scalar_lea.vmem %s390_s30, 32  ;;  %p2274_p3 = scmp.lt.s32.totalorder %s390_s30, %s2910_s25 }
 0x2b5   :  { %p2270_p2 = scmp.ne.s32.totalorder %s390_s30, %s2269_s5  ;;  %p2275_p4 = scmp.lt.s32.totalorder %s2939_s22, %s2269_s5 }
 0x2b7   :  { %p2276_p5 = por %p2275_p4, %p2274_p3 }
 0x2b9   :  { %p2277_p6 = pnand %p2276_p5, %p2270_p2 }
 0x2bb   :  { %2280 = shalt.err (!%p2277_p6)  }
 0x2bc   :  { %392 = dma.hbm_to_vmem [thread:$0]  %s386_s8, 32, %s390_s30, [#allocation3], %s2801_s23, %s2801_s23, %s2802_s24 }
 0x2bd   :  { %s397_s18 = sadd.s32 %s1391_s21, %s395_s26  ;;  %s2827_s15 = smov [#allocation2 + $0x33]  }
 0x2be   :  { %s1392_s7 = sshll.u32 %s397_s18, 4  ;;  %s402_s20 = sshll.u32 %s2827_s15, 4  ;;  %s403_s20 = int_to_ptr.vmem [resolvable:$true] %s402_s20 }
 0x2bf   :  { %s399_s29 = scalar_lea.hbm %s3812_s1, %s1392_s7 }
 0x2c0   :  { %s2281_s11 = scalar_lea.hbm %s399_s29, 32  ;;  %p2284_p8 = scmp.lt.u32.totalorder %s399_s29, %s3812_s1 }
 0x2c1   :  { %p2282_p7 = scmp.ne.s32.totalorder %s399_s29, %s2281_s11  ;;  %p2285_p9 = scmp.lt.u32.totalorder %s2930_s19, %s2281_s11 }
 0x2c2   :  { %p2287_p11 = scmp.lt.u32.totalorder %s2281_s11, %s399_s29 }
 0x2c3   :  { %p2286_p10 = por %p2285_p9, %p2284_p8 }
 0x2c5   :  { %p2288_p12 = por %p2287_p11, %p2286_p10 }
 0x2c7   :  { %p2289_p13 = pnand %p2288_p12, %p2282_p7 }
 0x2c9   :  { %2292 = shalt.err (!%p2289_p13)  }
 0x2ca   :  { %s2293_s30 = scalar_lea.vmem %s403_s20, 32  ;;  %p2298_p1 = scmp.lt.s32.totalorder %s403_s20, %s2910_s25 }
 0x2cb   :  { %p2294_p0 = scmp.ne.s32.totalorder %s403_s20, %s2293_s30  ;;  %p2299_p2 = scmp.lt.s32.totalorder %s2939_s22, %s2293_s30 }
 0x2cd   :  { %p2300_p3 = por %p2299_p2, %p2298_p1 }
 0x2cf   :  { %p2301_p4 = pnand %p2300_p3, %p2294_p0 }
 0x2d1   :  { %2304 = shalt.err (!%p2301_p4)  }
 0x2d2   :  { %405 = dma.hbm_to_vmem [thread:$0]  %s399_s29, 32, %s403_s20, [#allocation3], %s2801_s23, %s2801_s23, %s2802_s24 }
 0x2d3   :  { %s1393_s14 = sld [smem:[#allocation5 + $0x1c]]  ;;  %s2828_s6 = smov [#allocation2 + $0x34]  }
 0x2d4   :  { %s415_s17 = sshll.u32 %s2828_s6, 4  ;;  %s1396_s16 = sld [smem:[#allocation5 + $0x1d]]  ;;  %s3422_s17 = int_to_ptr.vmem [resolvable:$true] %s415_s17 }
 0x2d5   :  { %s2829_s26 = smov [#allocation2 + $0x35]   ;;  %s3424_s0 = sld [smem:[#allocation5 + $0x1e]] }
 0x2d6   :  { %s428_s2 = sshll.u32 %s2829_s26, 4  ;;  %s2830_s8 = smov [#allocation2 + $0x36]   ;;  %s3426_s2 = int_to_ptr.vmem [resolvable:$true] %s428_s2 }
 0x2d7   :  { %s3428_s21 = sshll.u32 %s2830_s8, 4  ;;  %s3430_s12 = sld [smem:[#allocation5 + $0x1f]]  ;;  %s442_s21 = int_to_ptr.vmem [resolvable:$true] %s3428_s21 }
 0x2d9   :  { %s407_s13 = sshrl.u32 %s1393_s14, 3  ;;  %s408_s3 = sand.u32 7, %s1393_s14  }
 0x2da   :  { %s1394_s5 = sshll.u32 %s407_s13, 4  ;;  %s420_s18 = sshrl.u32 %s1396_s16, 3 }
 0x2db   :  { %s410_s7 = sadd.s32 %s1394_s5, %s408_s3  ;;  %s421_s15 = sand.u32 7, %s1396_s16  }
 0x2dc   :  { %s1395_s20 = sshll.u32 %s410_s7, 4  ;;  %s1397_s10 = sshll.u32 %s420_s18, 4 }
 0x2dd   :  { %s412_s11 = scalar_lea.hbm %s3812_s1, %s1395_s20  ;;  %s423_s27 = sadd.s32 %s1397_s10, %s421_s15 }
 0x2de   :  { %s2305_s28 = scalar_lea.hbm %s412_s11, 32  ;;  %p2308_p6 = scmp.lt.u32.totalorder %s412_s11, %s3812_s1 }
 0x2df   :  { %p2306_p5 = scmp.ne.s32.totalorder %s412_s11, %s2305_s28  ;;  %p2309_p7 = scmp.lt.u32.totalorder %s2930_s19, %s2305_s28 }
 0x2e0   :  { %p2311_p9 = scmp.lt.u32.totalorder %s2305_s28, %s412_s11 }
 0x2e1   :  { %p2310_p8 = por %p2309_p7, %p2308_p6 }
 0x2e3   :  { %p2312_p10 = por %p2311_p9, %p2310_p8 }
 0x2e5   :  { %p2313_p11 = pnand %p2312_p10, %p2306_p5 }
 0x2e7   :  { %2316 = shalt.err (!%p2313_p11)  }
 0x2e8   :  { %s2317_s14 = scalar_lea.vmem %s3422_s17, 32  ;;  %p2322_p13 = scmp.lt.s32.totalorder %s3422_s17, %s2910_s25 }
 0x2e9   :  { %p2318_p12 = scmp.ne.s32.totalorder %s3422_s17, %s2317_s14  ;;  %p2323_p0 = scmp.lt.s32.totalorder %s2939_s22, %s2317_s14 }
 0x2eb   :  { %p2324_p1 = por %p2323_p0, %p2322_p13 }
 0x2ed   :  { %p2325_p2 = pnand %p2324_p1, %p2318_p12 }
 0x2ef   :  { %2328 = shalt.err (!%p2325_p2)  }
 0x2f0   :  { %418 = dma.hbm_to_vmem [thread:$0]  %s412_s11, 32, %s3422_s17, [#allocation3], %s2801_s23, %s2801_s23, %s2802_s24 }
 0x2f1   :  { %s1398_s16 = sshll.u32 %s423_s27, 4  ;;  %s433_s26 = sshrl.u32 %s3424_s0, 3 }
 0x2f2   :  { %s425_s3 = scalar_lea.hbm %s3812_s1, %s1398_s16  ;;  %s434_s5 = sand.u32 7, %s3424_s0  }
 0x2f3   :  { %s2329_s18 = scalar_lea.hbm %s425_s3, 32  ;;  %p2332_p4 = scmp.lt.u32.totalorder %s425_s3, %s3812_s1 }
 0x2f4   :  { %p2330_p3 = scmp.ne.s32.totalorder %s425_s3, %s2329_s18  ;;  %p2333_p5 = scmp.lt.u32.totalorder %s2930_s19, %s2329_s18 }
 0x2f5   :  { %p2335_p7 = scmp.lt.u32.totalorder %s2329_s18, %s425_s3 }
 0x2f6   :  { %p2334_p6 = por %p2333_p5, %p2332_p4 }
 0x2f8   :  { %p2336_p8 = por %p2335_p7, %p2334_p6 }
 0x2fa   :  { %p2337_p9 = pnand %p2336_p8, %p2330_p3 }
 0x2fc   :  { %2340 = shalt.err (!%p2337_p9)  }
 0x2fd   :  { %s2341_s17 = scalar_lea.vmem %s3426_s2, 32  ;;  %p2346_p11 = scmp.lt.s32.totalorder %s3426_s2, %s2910_s25 }
 0x2fe   :  { %p2342_p10 = scmp.ne.s32.totalorder %s3426_s2, %s2341_s17  ;;  %p2347_p12 = scmp.lt.s32.totalorder %s2939_s22, %s2341_s17 }
 0x300   :  { %p2348_p13 = por %p2347_p12, %p2346_p11 }
 0x302   :  { %p2349_p0 = pnand %p2348_p13, %p2342_p10 }
 0x304   :  { %2352 = shalt.err (!%p2349_p0)  }
 0x305   :  { %431 = dma.hbm_to_vmem [thread:$0]  %s425_s3, 32, %s3426_s2, [#allocation3], %s2801_s23, %s2801_s23, %s2802_s24 }
 0x306   :  { %s1400_s0 = sshll.u32 %s433_s26, 4  ;;  %s446_s10 = sshrl.u32 %s3430_s12, 3 }
 0x307   :  { %s436_s20 = sadd.s32 %s1400_s0, %s434_s5  ;;  %s447_s29 = sand.u32 7, %s3430_s12  }
 0x308   :  { %s1401_s9 = sshll.u32 %s436_s20, 4  ;;  %s1403_s30 = sshll.u32 %s446_s10, 4 }
 0x309   :  { %s438_s28 = scalar_lea.hbm %s3812_s1, %s1401_s9 }
 0x30a   :  { %s2353_s6 = scalar_lea.hbm %s438_s28, 32  ;;  %p2356_p2 = scmp.lt.u32.totalorder %s438_s28, %s3812_s1 }
 0x30b   :  { %p2354_p1 = scmp.ne.s32.totalorder %s438_s28, %s2353_s6  ;;  %p2357_p3 = scmp.lt.u32.totalorder %s2930_s19, %s2353_s6 }
 0x30c   :  { %p2359_p5 = scmp.lt.u32.totalorder %s2353_s6, %s438_s28 }
 0x30d   :  { %p2358_p4 = por %p2357_p3, %p2356_p2 }
 0x30f   :  { %p2360_p6 = por %p2359_p5, %p2358_p4 }
 0x311   :  { %p2361_p7 = pnand %p2360_p6, %p2354_p1 }
 0x313   :  { %2364 = shalt.err (!%p2361_p7)  }
 0x314   :  { %s2365_s2 = scalar_lea.vmem %s442_s21, 32  ;;  %p2370_p9 = scmp.lt.s32.totalorder %s442_s21, %s2910_s25 }
 0x315   :  { %p2366_p8 = scmp.ne.s32.totalorder %s442_s21, %s2365_s2  ;;  %p2371_p10 = scmp.lt.s32.totalorder %s2939_s22, %s2365_s2 }
 0x317   :  { %p2372_p11 = por %p2371_p10, %p2370_p9 }
 0x319   :  { %p2373_p12 = pnand %p2372_p11, %p2366_p8 }
 0x31b   :  { %2376 = shalt.err (!%p2373_p12)  }
 0x31c   :  { %444 = dma.hbm_to_vmem [thread:$0]  %s438_s28, 32, %s442_s21, [#allocation3], %s2801_s23, %s2801_s23, %s2802_s24 }
 0x31d   :  { %s449_s12 = sadd.s32 %s1403_s30, %s447_s29  ;;  %s2831_s8 = smov [#allocation2 + $0x37]  }
 0x31e   :  { %s1404_s26 = sshll.u32 %s449_s12, 4  ;;  %s454_s13 = sshll.u32 %s2831_s8, 4  ;;  %s455_s13 = int_to_ptr.vmem [resolvable:$true] %s454_s13 }
 0x31f   :  { %s451_s18 = scalar_lea.hbm %s3812_s1, %s1404_s26 }
 0x320   :  { %s2377_s7 = scalar_lea.hbm %s451_s18, 32  ;;  %p2380_p0 = scmp.lt.u32.totalorder %s451_s18, %s3812_s1 }
 0x321   :  { %p2378_p13 = scmp.ne.s32.totalorder %s451_s18, %s2377_s7  ;;  %p2381_p1 = scmp.lt.u32.totalorder %s2930_s19, %s2377_s7 }
 0x322   :  { %p2383_p3 = scmp.lt.u32.totalorder %s2377_s7, %s451_s18 }
 0x323   :  { %p2382_p2 = por %p2381_p1, %p2380_p0 }
 0x325   :  { %p2384_p4 = por %p2383_p3, %p2382_p2 }
 0x327   :  { %p2385_p5 = pnand %p2384_p4, %p2378_p13 }
 0x329   :  { %2388 = shalt.err (!%p2385_p5)  }
 0x32a   :  { %s2389_s21 = scalar_lea.vmem %s455_s13, 32  ;;  %p2394_p7 = scmp.lt.s32.totalorder %s455_s13, %s2910_s25 }
 0x32b   :  { %p2390_p6 = scmp.ne.s32.totalorder %s455_s13, %s2389_s21  ;;  %p2395_p8 = scmp.lt.s32.totalorder %s2939_s22, %s2389_s21 }
 0x32d   :  { %p2396_p9 = por %p2395_p8, %p2394_p7 }
 0x32f   :  { %p2397_p10 = pnand %p2396_p9, %p2390_p6 }
 0x331   :  { %2400 = shalt.err (!%p2397_p10)  }
 0x332   :  { %457 = dma.hbm_to_vmem [thread:$0]  %s451_s18, 32, %s455_s13, [#allocation3], %s2801_s23, %s2801_s23, %s2802_s24 }
 0x333   :  { %s1405_s0 = sld [smem:[#allocation5 + $0x20]]  ;;  %s2832_s20 = smov [#allocation2 + $0x40]  }
 0x334   :  { %s467_s10 = sshll.u32 %s2832_s20, 4  ;;  %s1408_s9 = sld [smem:[#allocation5 + $0x21]]  ;;  %s3493_s10 = int_to_ptr.vmem [resolvable:$true] %s467_s10 }
 0x335   :  { %s2833_s29 = smov [#allocation2 + $0x41]   ;;  %s3495_s27 = sld [smem:[#allocation5 + $0x22]] }
 0x336   :  { %s480_s11 = sshll.u32 %s2833_s29, 4  ;;  %s2834_s28 = smov [#allocation2 + $0x42]   ;;  %s3497_s11 = int_to_ptr.vmem [resolvable:$true] %s480_s11 }
 0x337   :  { %s3499_s30 = sshll.u32 %s2834_s28, 4  ;;  %s3501_s6 = sld [smem:[#allocation5 + $0x23]]  ;;  %s494_s30 = int_to_ptr.vmem [resolvable:$true] %s3499_s30 }
 0x339   :  { %s459_s14 = sshrl.u32 %s1405_s0, 3  ;;  %s460_s16 = sand.u32 7, %s1405_s0  }
 0x33a   :  { %s1406_s2 = sshll.u32 %s459_s14, 4  ;;  %s472_s12 = sshrl.u32 %s1408_s9, 3 }
 0x33b   :  { %s462_s26 = sadd.s32 %s1406_s2, %s460_s16  ;;  %s473_s8 = sand.u32 7, %s1408_s9  }
 0x33c   :  { %s1407_s13 = sshll.u32 %s462_s26, 4  ;;  %s1409_s3 = sshll.u32 %s472_s12, 4 }
 0x33d   :  { %s464_s7 = scalar_lea.hbm %s3812_s1, %s1407_s13  ;;  %s475_s15 = sadd.s32 %s1409_s3, %s473_s8 }
 0x33e   :  { %s2401_s17 = scalar_lea.hbm %s464_s7, 32  ;;  %p2404_p12 = scmp.lt.u32.totalorder %s464_s7, %s3812_s1 }
 0x33f   :  { %p2402_p11 = scmp.ne.s32.totalorder %s464_s7, %s2401_s17  ;;  %p2405_p13 = scmp.lt.u32.totalorder %s2930_s19, %s2401_s17 }
 0x340   :  { %p2407_p1 = scmp.lt.u32.totalorder %s2401_s17, %s464_s7 }
 0x341   :  { %p2406_p0 = por %p2405_p13, %p2404_p12 }
 0x343   :  { %p2408_p2 = por %p2407_p1, %p2406_p0 }
 0x345   :  { %p2409_p3 = pnand %p2408_p2, %p2402_p11 }
 0x347   :  { %2412 = shalt.err (!%p2409_p3)  }
 0x348   :  { %s2413_s0 = scalar_lea.vmem %s3493_s10, 32  ;;  %p2418_p5 = scmp.lt.s32.totalorder %s3493_s10, %s2910_s25 }
 0x349   :  { %p2414_p4 = scmp.ne.s32.totalorder %s3493_s10, %s2413_s0  ;;  %p2419_p6 = scmp.lt.s32.totalorder %s2939_s22, %s2413_s0 }
 0x34b   :  { %p2420_p7 = por %p2419_p6, %p2418_p5 }
 0x34d   :  { %p2421_p8 = pnand %p2420_p7, %p2414_p4 }
 0x34f   :  { %2424 = shalt.err (!%p2421_p8)  }
 0x350   :  { %470 = dma.hbm_to_vmem [thread:$0]  %s464_s7, 32, %s3493_s10, [#allocation3], %s2801_s23, %s2801_s23, %s2802_s24 }
 0x351   :  { %s1410_s9 = sshll.u32 %s475_s15, 4  ;;  %s485_s29 = sshrl.u32 %s3495_s27, 3 }
 0x352   :  { %s477_s16 = scalar_lea.hbm %s3812_s1, %s1410_s9  ;;  %s486_s2 = sand.u32 7, %s3495_s27  }
 0x353   :  { %s2425_s12 = scalar_lea.hbm %s477_s16, 32  ;;  %p2428_p10 = scmp.lt.u32.totalorder %s477_s16, %s3812_s1 }
 0x354   :  { %p2426_p9 = scmp.ne.s32.totalorder %s477_s16, %s2425_s12  ;;  %p2429_p11 = scmp.lt.u32.totalorder %s2930_s19, %s2425_s12 }
 0x355   :  { %p2431_p13 = scmp.lt.u32.totalorder %s2425_s12, %s477_s16 }
 0x356   :  { %p2430_p12 = por %p2429_p11, %p2428_p10 }
 0x358   :  { %p2432_p0 = por %p2431_p13, %p2430_p12 }
 0x35a   :  { %p2433_p1 = pnand %p2432_p0, %p2426_p9 }
 0x35c   :  { %2436 = shalt.err (!%p2433_p1)  }
 0x35d   :  { %s2437_s10 = scalar_lea.vmem %s3497_s11, 32  ;;  %p2442_p3 = scmp.lt.s32.totalorder %s3497_s11, %s2910_s25 }
 0x35e   :  { %p2438_p2 = scmp.ne.s32.totalorder %s3497_s11, %s2437_s10  ;;  %p2443_p4 = scmp.lt.s32.totalorder %s2939_s22, %s2437_s10 }
 0x360   :  { %p2444_p5 = por %p2443_p4, %p2442_p3 }
 0x362   :  { %p2445_p6 = pnand %p2444_p5, %p2438_p2 }
 0x364   :  { %2448 = shalt.err (!%p2445_p6)  }
 0x365   :  { %483 = dma.hbm_to_vmem [thread:$0]  %s477_s16, 32, %s3497_s11, [#allocation3], %s2801_s23, %s2801_s23, %s2802_s24 }
 0x366   :  { %s1412_s27 = sshll.u32 %s485_s29, 4  ;;  %s498_s3 = sshrl.u32 %s3501_s6, 3 }
 0x367   :  { %s488_s13 = sadd.s32 %s1412_s27, %s486_s2  ;;  %s499_s18 = sand.u32 7, %s3501_s6  }
 0x368   :  { %s1413_s5 = sshll.u32 %s488_s13, 4  ;;  %s1415_s21 = sshll.u32 %s498_s3, 4 }
 0x369   :  { %s490_s17 = scalar_lea.hbm %s3812_s1, %s1413_s5 }
 0x36a   :  { %s2449_s20 = scalar_lea.hbm %s490_s17, 32  ;;  %p2452_p8 = scmp.lt.u32.totalorder %s490_s17, %s3812_s1 }
 0x36b   :  { %p2450_p7 = scmp.ne.s32.totalorder %s490_s17, %s2449_s20  ;;  %p2453_p9 = scmp.lt.u32.totalorder %s2930_s19, %s2449_s20 }
 0x36c   :  { %p2455_p11 = scmp.lt.u32.totalorder %s2449_s20, %s490_s17 }
 0x36d   :  { %p2454_p10 = por %p2453_p9, %p2452_p8 }
 0x36f   :  { %p2456_p12 = por %p2455_p11, %p2454_p10 }
 0x371   :  { %p2457_p13 = pnand %p2456_p12, %p2450_p7 }
 0x373   :  { %2460 = shalt.err (!%p2457_p13)  }
 0x374   :  { %s2461_s11 = scalar_lea.vmem %s494_s30, 32  ;;  %p2466_p1 = scmp.lt.s32.totalorder %s494_s30, %s2910_s25 }
 0x375   :  { %p2462_p0 = scmp.ne.s32.totalorder %s494_s30, %s2461_s11  ;;  %p2467_p2 = scmp.lt.s32.totalorder %s2939_s22, %s2461_s11 }
 0x377   :  { %p2468_p3 = por %p2467_p2, %p2466_p1 }
 0x379   :  { %p2469_p4 = pnand %p2468_p3, %p2462_p0 }
 0x37b   :  { %2472 = shalt.err (!%p2469_p4)  }
 0x37c   :  { %496 = dma.hbm_to_vmem [thread:$0]  %s490_s17, 32, %s494_s30, [#allocation3], %s2801_s23, %s2801_s23, %s2802_s24 }
 0x37d   :  { %s501_s6 = sadd.s32 %s1415_s21, %s499_s18  ;;  %s2835_s28 = smov [#allocation2 + $0x43]  }
 0x37e   :  { %s1416_s29 = sshll.u32 %s501_s6, 4  ;;  %s506_s14 = sshll.u32 %s2835_s28, 4  ;;  %s507_s14 = int_to_ptr.vmem [resolvable:$true] %s506_s14 }
 0x37f   :  { %s503_s12 = scalar_lea.hbm %s3812_s1, %s1416_s29 }
 0x380   :  { %s2473_s26 = scalar_lea.hbm %s503_s12, 32  ;;  %p2476_p6 = scmp.lt.u32.totalorder %s503_s12, %s3812_s1 }
 0x381   :  { %p2474_p5 = scmp.ne.s32.totalorder %s503_s12, %s2473_s26  ;;  %p2477_p7 = scmp.lt.u32.totalorder %s2930_s19, %s2473_s26 }
 0x382   :  { %p2479_p9 = scmp.lt.u32.totalorder %s2473_s26, %s503_s12 }
 0x383   :  { %p2478_p8 = por %p2477_p7, %p2476_p6 }
 0x385   :  { %p2480_p10 = por %p2479_p9, %p2478_p8 }
 0x387   :  { %p2481_p11 = pnand %p2480_p10, %p2474_p5 }
 0x389   :  { %2484 = shalt.err (!%p2481_p11)  }
 0x38a   :  { %s2485_s30 = scalar_lea.vmem %s507_s14, 32  ;;  %p2490_p13 = scmp.lt.s32.totalorder %s507_s14, %s2910_s25 }
 0x38b   :  { %p2486_p12 = scmp.ne.s32.totalorder %s507_s14, %s2485_s30  ;;  %p2491_p0 = scmp.lt.s32.totalorder %s2939_s22, %s2485_s30 }
 0x38d   :  { %p2492_p1 = por %p2491_p0, %p2490_p13 }
 0x38f   :  { %p2493_p2 = pnand %p2492_p1, %p2486_p12 }
 0x391   :  { %2496 = shalt.err (!%p2493_p2)  }
 0x392   :  { %509 = dma.hbm_to_vmem [thread:$0]  %s503_s12, 32, %s507_s14, [#allocation3], %s2801_s23, %s2801_s23, %s2802_s24 }
 0x393   :  { %s1417_s27 = sld [smem:[#allocation5 + $0x24]]  ;;  %s2836_s13 = smov [#allocation2 + $0x44]  }
 0x394   :  { %s519_s3 = sshll.u32 %s2836_s13, 4  ;;  %s1420_s5 = sld [smem:[#allocation5 + $0x25]]  ;;  %s3564_s3 = int_to_ptr.vmem [resolvable:$true] %s519_s3 }
 0x395   :  { %s2837_s18 = smov [#allocation2 + $0x45]   ;;  %s3566_s15 = sld [smem:[#allocation5 + $0x26]] }
 0x396   :  { %s532_s7 = sshll.u32 %s2837_s18, 4  ;;  %s2838_s17 = smov [#allocation2 + $0x46]   ;;  %s3568_s7 = int_to_ptr.vmem [resolvable:$true] %s532_s7 }
 0x397   :  { %s3570_s21 = sshll.u32 %s2838_s17, 4  ;;  %s3572_s20 = sld [smem:[#allocation5 + $0x27]]  ;;  %s546_s21 = int_to_ptr.vmem [resolvable:$true] %s3570_s21 }
 0x399   :  { %s511_s0 = sshrl.u32 %s1417_s27, 3  ;;  %s512_s9 = sand.u32 7, %s1417_s27  }
 0x39a   :  { %s1418_s11 = sshll.u32 %s511_s0, 4  ;;  %s524_s6 = sshrl.u32 %s1420_s5, 3 }
 0x39b   :  { %s514_s29 = sadd.s32 %s1418_s11, %s512_s9  ;;  %s525_s28 = sand.u32 7, %s1420_s5  }
 0x39c   :  { %s1419_s14 = sshll.u32 %s514_s29, 4  ;;  %s1421_s16 = sshll.u32 %s524_s6, 4 }
 0x39d   :  { %s516_s26 = scalar_lea.hbm %s3812_s1, %s1419_s14  ;;  %s527_s8 = sadd.s32 %s1421_s16, %s525_s28 }
 0x39e   :  { %s2497_s10 = scalar_lea.hbm %s516_s26, 32  ;;  %p2500_p4 = scmp.lt.u32.totalorder %s516_s26, %s3812_s1 }
 0x39f   :  { %p2498_p3 = scmp.ne.s32.totalorder %s516_s26, %s2497_s10  ;;  %p2501_p5 = scmp.lt.u32.totalorder %s2930_s19, %s2497_s10 }
 0x3a0   :  { %p2503_p7 = scmp.lt.u32.totalorder %s2497_s10, %s516_s26 }
 0x3a1   :  { %p2502_p6 = por %p2501_p5, %p2500_p4 }
 0x3a3   :  { %p2504_p8 = por %p2503_p7, %p2502_p6 }
 0x3a5   :  { %p2505_p9 = pnand %p2504_p8, %p2498_p3 }
 0x3a7   :  { %2508 = shalt.err (!%p2505_p9)  }
 0x3a8   :  { %s2509_s27 = scalar_lea.vmem %s3564_s3, 32  ;;  %p2514_p11 = scmp.lt.s32.totalorder %s3564_s3, %s2910_s25 }
 0x3a9   :  { %p2510_p10 = scmp.ne.s32.totalorder %s3564_s3, %s2509_s27  ;;  %p2515_p12 = scmp.lt.s32.totalorder %s2939_s22, %s2509_s27 }
 0x3ab   :  { %p2516_p13 = por %p2515_p12, %p2514_p11 }
 0x3ad   :  { %p2517_p0 = pnand %p2516_p13, %p2510_p10 }
 0x3af   :  { %2520 = shalt.err (!%p2517_p0)  }
 0x3b0   :  { %522 = dma.hbm_to_vmem [thread:$0]  %s516_s26, 32, %s3564_s3, [#allocation3], %s2801_s23, %s2801_s23, %s2802_s24 }
 0x3b1   :  { %s1422_s5 = sshll.u32 %s527_s8, 4  ;;  %s537_s18 = sshrl.u32 %s3566_s15, 3 }
 0x3b2   :  { %s529_s9 = scalar_lea.hbm %s3812_s1, %s1422_s5  ;;  %s538_s11 = sand.u32 7, %s3566_s15  }
 0x3b3   :  { %s2521_s6 = scalar_lea.hbm %s529_s9, 32  ;;  %p2524_p2 = scmp.lt.u32.totalorder %s529_s9, %s3812_s1 }
 0x3b4   :  { %p2522_p1 = scmp.ne.s32.totalorder %s529_s9, %s2521_s6  ;;  %p2525_p3 = scmp.lt.u32.totalorder %s2930_s19, %s2521_s6 }
 0x3b5   :  { %p2527_p5 = scmp.lt.u32.totalorder %s2521_s6, %s529_s9 }
 0x3b6   :  { %p2526_p4 = por %p2525_p3, %p2524_p2 }
 0x3b8   :  { %p2528_p6 = por %p2527_p5, %p2526_p4 }
 0x3ba   :  { %p2529_p7 = pnand %p2528_p6, %p2522_p1 }
 0x3bc   :  { %2532 = shalt.err (!%p2529_p7)  }
 0x3bd   :  { %s2533_s3 = scalar_lea.vmem %s3568_s7, 32  ;;  %p2538_p9 = scmp.lt.s32.totalorder %s3568_s7, %s2910_s25 }
 0x3be   :  { %p2534_p8 = scmp.ne.s32.totalorder %s3568_s7, %s2533_s3  ;;  %p2539_p10 = scmp.lt.s32.totalorder %s2939_s22, %s2533_s3 }
 0x3c0   :  { %p2540_p11 = por %p2539_p10, %p2538_p9 }
 0x3c2   :  { %p2541_p12 = pnand %p2540_p11, %p2534_p8 }
 0x3c4   :  { %2544 = shalt.err (!%p2541_p12)  }
 0x3c5   :  { %535 = dma.hbm_to_vmem [thread:$0]  %s529_s9, 32, %s3568_s7, [#allocation3], %s2801_s23, %s2801_s23, %s2802_s24 }
 0x3c6   :  { %s1424_s15 = sshll.u32 %s537_s18, 4  ;;  %s550_s16 = sshrl.u32 %s3572_s20, 3 }
 0x3c7   :  { %s540_s14 = sadd.s32 %s1424_s15, %s538_s11  ;;  %s551_s12 = sand.u32 7, %s3572_s20  }
 0x3c8   :  { %s1425_s2 = sshll.u32 %s540_s14, 4  ;;  %s1427_s30 = sshll.u32 %s550_s16, 4 }
 0x3c9   :  { %s542_s10 = scalar_lea.hbm %s3812_s1, %s1425_s2 }
 0x3ca   :  { %s2545_s13 = scalar_lea.hbm %s542_s10, 32  ;;  %p2548_p0 = scmp.lt.u32.totalorder %s542_s10, %s3812_s1 }
 0x3cb   :  { %p2546_p13 = scmp.ne.s32.totalorder %s542_s10, %s2545_s13  ;;  %p2549_p1 = scmp.lt.u32.totalorder %s2930_s19, %s2545_s13 }
 0x3cc   :  { %p2551_p3 = scmp.lt.u32.totalorder %s2545_s13, %s542_s10 }
 0x3cd   :  { %p2550_p2 = por %p2549_p1, %p2548_p0 }
 0x3cf   :  { %p2552_p4 = por %p2551_p3, %p2550_p2 }
 0x3d1   :  { %p2553_p5 = pnand %p2552_p4, %p2546_p13 }
 0x3d3   :  { %2556 = shalt.err (!%p2553_p5)  }
 0x3d4   :  { %s2557_s7 = scalar_lea.vmem %s546_s21, 32  ;;  %p2562_p7 = scmp.lt.s32.totalorder %s546_s21, %s2910_s25 }
 0x3d5   :  { %p2558_p6 = scmp.ne.s32.totalorder %s546_s21, %s2557_s7  ;;  %p2563_p8 = scmp.lt.s32.totalorder %s2939_s22, %s2557_s7 }
 0x3d7   :  { %p2564_p9 = por %p2563_p8, %p2562_p7 }
 0x3d9   :  { %p2565_p10 = pnand %p2564_p9, %p2558_p6 }
 0x3db   :  { %2568 = shalt.err (!%p2565_p10)  }
 0x3dc   :  { %548 = dma.hbm_to_vmem [thread:$0]  %s542_s10, 32, %s546_s21, [#allocation3], %s2801_s23, %s2801_s23, %s2802_s24 }
 0x3dd   :  { %s553_s20 = sadd.s32 %s1427_s30, %s551_s12  ;;  %s2839_s17 = smov [#allocation2 + $0x47]  }
 0x3de   :  { %s1428_s18 = sshll.u32 %s553_s20, 4  ;;  %s558_s0 = sshll.u32 %s2839_s17, 4  ;;  %s559_s0 = int_to_ptr.vmem [resolvable:$true] %s558_s0 }
 0x3df   :  { %s555_s6 = scalar_lea.hbm %s3812_s1, %s1428_s18 }
 0x3e0   :  { %s2569_s29 = scalar_lea.hbm %s555_s6, 32  ;;  %p2572_p12 = scmp.lt.u32.totalorder %s555_s6, %s3812_s1 }
 0x3e1   :  { %p2570_p11 = scmp.ne.s32.totalorder %s555_s6, %s2569_s29  ;;  %p2573_p13 = scmp.lt.u32.totalorder %s2930_s19, %s2569_s29 }
 0x3e2   :  { %p2575_p1 = scmp.lt.u32.totalorder %s2569_s29, %s555_s6 }
 0x3e3   :  { %p2574_p0 = por %p2573_p13, %p2572_p12 }
 0x3e5   :  { %p2576_p2 = por %p2575_p1, %p2574_p0 }
 0x3e7   :  { %p2577_p3 = pnand %p2576_p2, %p2570_p11 }
 0x3e9   :  { %2580 = shalt.err (!%p2577_p3)  }
 0x3ea   :  { %s2581_s21 = scalar_lea.vmem %s559_s0, 32  ;;  %p2586_p5 = scmp.lt.s32.totalorder %s559_s0, %s2910_s25 }
 0x3eb   :  { %p2582_p4 = scmp.ne.s32.totalorder %s559_s0, %s2581_s21  ;;  %p2587_p6 = scmp.lt.s32.totalorder %s2939_s22, %s2581_s21 }
 0x3ed   :  { %p2588_p7 = por %p2587_p6, %p2586_p5 }
 0x3ef   :  { %p2589_p8 = pnand %p2588_p7, %p2582_p4 }
 0x3f1   :  { %2592 = shalt.err (!%p2589_p8)  }
 0x3f2   :  { %561 = dma.hbm_to_vmem [thread:$0]  %s555_s6, 32, %s559_s0, [#allocation3], %s2801_s23, %s2801_s23, %s2802_s24 }
 0x3f3   :  { %s1429_s15 = sld [smem:[#allocation5 + $0x28]]  ;;  %s2840_s14 = smov [#allocation2 + $0x50]  }
 0x3f4   :  { %s571_s16 = sshll.u32 %s2840_s14, 4  ;;  %s1432_s2 = sld [smem:[#allocation5 + $0x29]]  ;;  %s3635_s16 = int_to_ptr.vmem [resolvable:$true] %s571_s16 }
 0x3f5   :  { %s2841_s12 = smov [#allocation2 + $0x51]   ;;  %s3637_s8 = sld [smem:[#allocation5 + $0x2a]] }
 0x3f6   :  { %s584_s26 = sshll.u32 %s2841_s12, 4  ;;  %s2842_s10 = smov [#allocation2 + $0x52]   ;;  %s3639_s26 = int_to_ptr.vmem [resolvable:$true] %s584_s26 }
 0x3f7   :  { %s3641_s30 = sshll.u32 %s2842_s10, 4  ;;  %s3643_s13 = sld [smem:[#allocation5 + $0x2b]]  ;;  %s598_s30 = int_to_ptr.vmem [resolvable:$true] %s3641_s30 }
 0x3f9   :  { %s563_s27 = sshrl.u32 %s1429_s15, 3  ;;  %s564_s5 = sand.u32 7, %s1429_s15  }
 0x3fa   :  { %s1430_s7 = sshll.u32 %s563_s27, 4  ;;  %s576_s20 = sshrl.u32 %s1432_s2, 3 }
 0x3fb   :  { %s566_s18 = sadd.s32 %s1430_s7, %s564_s5  ;;  %s577_s17 = sand.u32 7, %s1432_s2  }
 0x3fc   :  { %s1431_s0 = sshll.u32 %s566_s18, 4  ;;  %s1433_s9 = sshll.u32 %s576_s20, 4 }
 0x3fd   :  { %s568_s29 = scalar_lea.hbm %s3812_s1, %s1431_s0  ;;  %s579_s28 = sadd.s32 %s1433_s9, %s577_s17 }
 0x3fe   :  { %s2593_s3 = scalar_lea.hbm %s568_s29, 32  ;;  %p2596_p10 = scmp.lt.u32.totalorder %s568_s29, %s3812_s1 }
 0x3ff   :  { %p2594_p9 = scmp.ne.s32.totalorder %s568_s29, %s2593_s3  ;;  %p2597_p11 = scmp.lt.u32.totalorder %s2930_s19, %s2593_s3 }
 0x400   :  { %p2599_p13 = scmp.lt.u32.totalorder %s2593_s3, %s568_s29 }
 0x401   :  { %p2598_p12 = por %p2597_p11, %p2596_p10 }
 0x403   :  { %p2600_p0 = por %p2599_p13, %p2598_p12 }
 0x405   :  { %p2601_p1 = pnand %p2600_p0, %p2594_p9 }
 0x407   :  { %2604 = shalt.err (!%p2601_p1)  }
 0x408   :  { %s2605_s15 = scalar_lea.vmem %s3635_s16, 32  ;;  %p2610_p3 = scmp.lt.s32.totalorder %s3635_s16, %s2910_s25 }
 0x409   :  { %p2606_p2 = scmp.ne.s32.totalorder %s3635_s16, %s2605_s15  ;;  %p2611_p4 = scmp.lt.s32.totalorder %s2939_s22, %s2605_s15 }
 0x40b   :  { %p2612_p5 = por %p2611_p4, %p2610_p3 }
 0x40d   :  { %p2613_p6 = pnand %p2612_p5, %p2606_p2 }
 0x40f   :  { %2616 = shalt.err (!%p2613_p6)  }
 0x410   :  { %574 = dma.hbm_to_vmem [thread:$0]  %s568_s29, 32, %s3635_s16, [#allocation3], %s2801_s23, %s2801_s23, %s2802_s24 }
 0x411   :  { %s1434_s2 = sshll.u32 %s579_s28, 4  ;;  %s589_s12 = sshrl.u32 %s3637_s8, 3 }
 0x412   :  { %s581_s5 = scalar_lea.hbm %s3812_s1, %s1434_s2  ;;  %s590_s7 = sand.u32 7, %s3637_s8  }
 0x413   :  { %s2617_s20 = scalar_lea.hbm %s581_s5, 32  ;;  %p2620_p8 = scmp.lt.u32.totalorder %s581_s5, %s3812_s1 }
 0x414   :  { %p2618_p7 = scmp.ne.s32.totalorder %s581_s5, %s2617_s20  ;;  %p2621_p9 = scmp.lt.u32.totalorder %s2930_s19, %s2617_s20 }
 0x415   :  { %p2623_p11 = scmp.lt.u32.totalorder %s2617_s20, %s581_s5 }
 0x416   :  { %p2622_p10 = por %p2621_p9, %p2620_p8 }
 0x418   :  { %p2624_p12 = por %p2623_p11, %p2622_p10 }
 0x41a   :  { %p2625_p13 = pnand %p2624_p12, %p2618_p7 }
 0x41c   :  { %2628 = shalt.err (!%p2625_p13)  }
 0x41d   :  { %s2629_s16 = scalar_lea.vmem %s3639_s26, 32  ;;  %p2634_p1 = scmp.lt.s32.totalorder %s3639_s26, %s2910_s25 }
 0x41e   :  { %p2630_p0 = scmp.ne.s32.totalorder %s3639_s26, %s2629_s16  ;;  %p2635_p2 = scmp.lt.s32.totalorder %s2939_s22, %s2629_s16 }
 0x420   :  { %p2636_p3 = por %p2635_p2, %p2634_p1 }
 0x422   :  { %p2637_p4 = pnand %p2636_p3, %p2630_p0 }
 0x424   :  { %2640 = shalt.err (!%p2637_p4)  }
 0x425   :  { %587 = dma.hbm_to_vmem [thread:$0]  %s581_s5, 32, %s3639_s26, [#allocation3], %s2801_s23, %s2801_s23, %s2802_s24 }
 0x426   :  { %s1436_s8 = sshll.u32 %s589_s12, 4  ;;  %s602_s9 = sshrl.u32 %s3643_s13, 3 }
 0x427   :  { %s592_s0 = sadd.s32 %s1436_s8, %s590_s7  ;;  %s603_s6 = sand.u32 7, %s3643_s13  }
 0x428   :  { %s1437_s11 = sshll.u32 %s592_s0, 4  ;;  %s1439_s21 = sshll.u32 %s602_s9, 4 }
 0x429   :  { %s594_s3 = scalar_lea.hbm %s3812_s1, %s1437_s11 }
 0x42a   :  { %s2641_s14 = scalar_lea.hbm %s594_s3, 32  ;;  %p2644_p6 = scmp.lt.u32.totalorder %s594_s3, %s3812_s1 }
 0x42b   :  { %p2642_p5 = scmp.ne.s32.totalorder %s594_s3, %s2641_s14  ;;  %p2645_p7 = scmp.lt.u32.totalorder %s2930_s19, %s2641_s14 }
 0x42c   :  { %p2647_p9 = scmp.lt.u32.totalorder %s2641_s14, %s594_s3 }
 0x42d   :  { %p2646_p8 = por %p2645_p7, %p2644_p6 }
 0x42f   :  { %p2648_p10 = por %p2647_p9, %p2646_p8 }
 0x431   :  { %p2649_p11 = pnand %p2648_p10, %p2642_p5 }
 0x433   :  { %2652 = shalt.err (!%p2649_p11)  }
 0x434   :  { %s2653_s26 = scalar_lea.vmem %s598_s30, 32  ;;  %p2658_p13 = scmp.lt.s32.totalorder %s598_s30, %s2910_s25 }
 0x435   :  { %p2654_p12 = scmp.ne.s32.totalorder %s598_s30, %s2653_s26  ;;  %p2659_p0 = scmp.lt.s32.totalorder %s2939_s22, %s2653_s26 }
 0x437   :  { %p2660_p1 = por %p2659_p0, %p2658_p13 }
 0x439   :  { %p2661_p2 = pnand %p2660_p1, %p2654_p12 }
 0x43b   :  { %2664 = shalt.err (!%p2661_p2)  }
 0x43c   :  { %600 = dma.hbm_to_vmem [thread:$0]  %s594_s3, 32, %s598_s30, [#allocation3], %s2801_s23, %s2801_s23, %s2802_s24 }
 0x43d   :  { %s605_s13 = sadd.s32 %s1439_s21, %s603_s6  ;;  %s2843_s10 = smov [#allocation2 + $0x53]  }
 0x43e   :  { %s1440_s12 = sshll.u32 %s605_s13, 4  ;;  %s610_s27 = sshll.u32 %s2843_s10, 4  ;;  %s611_s27 = int_to_ptr.vmem [resolvable:$true] %s610_s27 }
 0x43f   :  { %s607_s20 = scalar_lea.hbm %s3812_s1, %s1440_s12 }
 0x440   :  { %s2665_s18 = scalar_lea.hbm %s607_s20, 32  ;;  %p2668_p4 = scmp.lt.u32.totalorder %s607_s20, %s3812_s1 }
 0x441   :  { %p2666_p3 = scmp.ne.s32.totalorder %s607_s20, %s2665_s18  ;;  %p2669_p5 = scmp.lt.u32.totalorder %s2930_s19, %s2665_s18 }
 0x442   :  { %p2671_p7 = scmp.lt.u32.totalorder %s2665_s18, %s607_s20 }
 0x443   :  { %p2670_p6 = por %p2669_p5, %p2668_p4 }
 0x445   :  { %p2672_p8 = por %p2671_p7, %p2670_p6 }
 0x447   :  { %p2673_p9 = pnand %p2672_p8, %p2666_p3 }
 0x449   :  { %2676 = shalt.err (!%p2673_p9)  }
 0x44a   :  { %s2677_s30 = scalar_lea.vmem %s611_s27, 32  ;;  %p2682_p11 = scmp.lt.s32.totalorder %s611_s27, %s2910_s25 }
 0x44b   :  { %p2678_p10 = scmp.ne.s32.totalorder %s611_s27, %s2677_s30  ;;  %p2683_p12 = scmp.lt.s32.totalorder %s2939_s22, %s2677_s30 }
 0x44d   :  { %p2684_p13 = por %p2683_p12, %p2682_p11 }
 0x44f   :  { %p2685_p0 = pnand %p2684_p13, %p2678_p10 }
 0x451   :  { %2688 = shalt.err (!%p2685_p0)  }
 0x452   :  { %613 = dma.hbm_to_vmem [thread:$0]  %s607_s20, 32, %s611_s27, [#allocation3], %s2801_s23, %s2801_s23, %s2802_s24 }
 0x453   :  { %s1441_s8 = sld [smem:[#allocation5 + $0x2c]]  ;;  %s2844_s0 = smov [#allocation2 + $0x54]  }
 0x454   :  { %s623_s9 = sshll.u32 %s2844_s0, 4  ;;  %s1444_s11 = sld [smem:[#allocation5 + $0x2d]]  ;;  %s3706_s9 = int_to_ptr.vmem [resolvable:$true] %s623_s9 }
 0x455   :  { %s2845_s6 = smov [#allocation2 + $0x55]   ;;  %s3708_s28 = sld [smem:[#allocation5 + $0x2e]] }
 0x456   :  { %s636_s29 = sshll.u32 %s2845_s6, 4  ;;  %s2846_s3 = smov [#allocation2 + $0x56]   ;;  %s3710_s29 = int_to_ptr.vmem [resolvable:$true] %s636_s29 }
 0x457   :  { %s3712_s21 = sshll.u32 %s2846_s3, 4  ;;  %s3714_s14 = sld [smem:[#allocation5 + $0x2f]]  ;;  %s650_s21 = int_to_ptr.vmem [resolvable:$true] %s3712_s21 }
 0x459   :  { %s615_s15 = sshrl.u32 %s1441_s8, 3  ;;  %s616_s2 = sand.u32 7, %s1441_s8  }
 0x45a   :  { %s1442_s26 = sshll.u32 %s615_s15, 4  ;;  %s628_s13 = sshrl.u32 %s1444_s11, 3 }
 0x45b   :  { %s618_s12 = sadd.s32 %s1442_s26, %s616_s2  ;;  %s629_s10 = sand.u32 7, %s1444_s11  }
 0x45c   :  { %s1443_s27 = sshll.u32 %s618_s12, 4  ;;  %s1445_s5 = sshll.u32 %s628_s13, 4 }
 0x45d   :  { %s620_s18 = scalar_lea.hbm %s3812_s1, %s1443_s27  ;;  %s631_s17 = sadd.s32 %s1445_s5, %s629_s10 }
 0x45e   :  { %s2689_s16 = scalar_lea.hbm %s620_s18, 32  ;;  %p2692_p2 = scmp.lt.u32.totalorder %s620_s18, %s3812_s1 }
 0x45f   :  { %p2690_p1 = scmp.ne.s32.totalorder %s620_s18, %s2689_s16  ;;  %p2693_p3 = scmp.lt.u32.totalorder %s2930_s19, %s2689_s16 }
 0x460   :  { %p2695_p5 = scmp.lt.u32.totalorder %s2689_s16, %s620_s18 }
 0x461   :  { %p2694_p4 = por %p2693_p3, %p2692_p2 }
 0x463   :  { %p2696_p6 = por %p2695_p5, %p2694_p4 }
 0x465   :  { %p2697_p7 = pnand %p2696_p6, %p2690_p1 }
 0x467   :  { %2700 = shalt.err (!%p2697_p7)  }
 0x468   :  { %s2701_s8 = scalar_lea.vmem %s3706_s9, 32  ;;  %p2706_p9 = scmp.lt.s32.totalorder %s3706_s9, %s2910_s25 }
 0x469   :  { %p2702_p8 = scmp.ne.s32.totalorder %s3706_s9, %s2701_s8  ;;  %p2707_p10 = scmp.lt.s32.totalorder %s2939_s22, %s2701_s8 }
 0x46b   :  { %p2708_p11 = por %p2707_p10, %p2706_p9 }
 0x46d   :  { %p2709_p12 = pnand %p2708_p11, %p2702_p8 }
 0x46f   :  { %2712 = shalt.err (!%p2709_p12)  }
 0x470   :  { %626 = dma.hbm_to_vmem [thread:$0]  %s620_s18, 32, %s3706_s9, [#allocation3], %s2801_s23, %s2801_s23, %s2802_s24 }
 0x471   :  { %s1446_s11 = sshll.u32 %s631_s17, 4  ;;  %s641_s6 = sshrl.u32 %s3708_s28, 3 }
 0x472   :  { %s633_s2 = scalar_lea.hbm %s3812_s1, %s1446_s11  ;;  %s642_s26 = sand.u32 7, %s3708_s28  }
 0x473   :  { %s2713_s13 = scalar_lea.hbm %s633_s2, 32  ;;  %p2716_p0 = scmp.lt.u32.totalorder %s633_s2, %s3812_s1 }
 0x474   :  { %p2714_p13 = scmp.ne.s32.totalorder %s633_s2, %s2713_s13  ;;  %p2717_p1 = scmp.lt.u32.totalorder %s2930_s19, %s2713_s13 }
 0x475   :  { %p2719_p3 = scmp.lt.u32.totalorder %s2713_s13, %s633_s2 }
 0x476   :  { %p2718_p2 = por %p2717_p1, %p2716_p0 }
 0x478   :  { %p2720_p4 = por %p2719_p3, %p2718_p2 }
 0x47a   :  { %p2721_p5 = pnand %p2720_p4, %p2714_p13 }
 0x47c   :  { %2724 = shalt.err (!%p2721_p5)  }
 0x47d   :  { %s2725_s9 = scalar_lea.vmem %s3710_s29, 32  ;;  %p2730_p7 = scmp.lt.s32.totalorder %s3710_s29, %s2910_s25 }
 0x47e   :  { %p2726_p6 = scmp.ne.s32.totalorder %s3710_s29, %s2725_s9  ;;  %p2731_p8 = scmp.lt.s32.totalorder %s2939_s22, %s2725_s9 }
 0x480   :  { %p2732_p9 = por %p2731_p8, %p2730_p7 }
 0x482   :  { %p2733_p10 = pnand %p2732_p9, %p2726_p6 }
 0x484   :  { %2736 = shalt.err (!%p2733_p10)  }
 0x485   :  { %639 = dma.hbm_to_vmem [thread:$0]  %s633_s2, 32, %s3710_s29, [#allocation3], %s2801_s23, %s2801_s23, %s2802_s24 }
 0x486   :  { %s1448_s28 = sshll.u32 %s641_s6, 4  ;;  %s654_s5 = sshrl.u32 %s3714_s14, 3 }
 0x487   :  { %s644_s27 = sadd.s32 %s1448_s28, %s642_s26  ;;  %s655_s20 = sand.u32 7, %s3714_s14  }
 0x488   :  { %s1449_s7 = sshll.u32 %s644_s27, 4  ;;  %s1451_s30 = sshll.u32 %s654_s5, 4 }
 0x489   :  { %s646_s16 = scalar_lea.hbm %s3812_s1, %s1449_s7 }
 0x48a   :  { %s2737_s0 = scalar_lea.hbm %s646_s16, 32  ;;  %p2740_p12 = scmp.lt.u32.totalorder %s646_s16, %s3812_s1 }
 0x48b   :  { %p2738_p11 = scmp.ne.s32.totalorder %s646_s16, %s2737_s0  ;;  %p2741_p13 = scmp.lt.u32.totalorder %s2930_s19, %s2737_s0 }
 0x48c   :  { %p2743_p1 = scmp.lt.u32.totalorder %s2737_s0, %s646_s16 }
 0x48d   :  { %p2742_p0 = por %p2741_p13, %p2740_p12 }
 0x48f   :  { %p2744_p2 = por %p2743_p1, %p2742_p0 }
 0x491   :  { %p2745_p3 = pnand %p2744_p2, %p2738_p11 }
 0x493   :  { %2748 = shalt.err (!%p2745_p3)  }
 0x494   :  { %s2749_s29 = scalar_lea.vmem %s650_s21, 32  ;;  %p2754_p5 = scmp.lt.s32.totalorder %s650_s21, %s2910_s25 }
 0x495   :  { %p2750_p4 = scmp.ne.s32.totalorder %s650_s21, %s2749_s29  ;;  %p2755_p6 = scmp.lt.s32.totalorder %s2939_s22, %s2749_s29 }
 0x497   :  { %p2756_p7 = por %p2755_p6, %p2754_p5 }
 0x499   :  { %p2757_p8 = pnand %p2756_p7, %p2750_p4 }
 0x49b   :  { %2760 = shalt.err (!%p2757_p8)  }
 0x49c   :  { %652 = dma.hbm_to_vmem [thread:$0]  %s646_s16, 32, %s650_s21, [#allocation3], %s2801_s23, %s2801_s23, %s2802_s24 }
 0x49d   :  { %s657_s14 = sadd.s32 %s1451_s30, %s655_s20  ;;  %s2847_s3 = smov [#allocation2 + $0x57]  }
 0x49e   :  { %s1452_s6 = sshll.u32 %s657_s14, 4  ;;  %s662_s15 = sshll.u32 %s2847_s3, 4  ;;  %s663_s15 = int_to_ptr.vmem [resolvable:$true] %s662_s15 }
 0x49f   :  { %s659_s13 = scalar_lea.hbm %s3812_s1, %s1452_s6 }
 0x4a0   :  { %s2761_s12 = scalar_lea.hbm %s659_s13, 32  ;;  %p2764_p10 = scmp.lt.u32.totalorder %s659_s13, %s3812_s1 }
 0x4a1   :  { %p2762_p9 = scmp.ne.s32.totalorder %s659_s13, %s2761_s12  ;;  %p2765_p11 = scmp.lt.u32.totalorder %s2930_s19, %s2761_s12 }
 0x4a2   :  { %p2767_p13 = scmp.lt.u32.totalorder %s2761_s12, %s659_s13 }
 0x4a3   :  { %p2766_p12 = por %p2765_p11, %p2764_p10 }
 0x4a5   :  { %p2768_p0 = por %p2767_p13, %p2766_p12 }
 0x4a7   :  { %p2769_p1 = pnand %p2768_p0, %p2762_p9 }
 0x4a9   :  { %2772 = shalt.err (!%p2769_p1)  }
 0x4aa   :  { %s2773_s21 = scalar_lea.vmem %s663_s15, 32  ;;  %p2778_p3 = scmp.lt.s32.totalorder %s663_s15, %s2910_s25 }
 0x4ab   :  { %p2774_p2 = scmp.ne.s32.totalorder %s663_s15, %s2773_s21  ;;  %p2779_p4 = scmp.lt.s32.totalorder %s2939_s22, %s2773_s21 }
 0x4ad   :  { %p2780_p5 = por %p2779_p4, %p2778_p3 }
 0x4af   :  { %p2781_p6 = pnand %p2780_p5, %p2774_p2 }
 0x4b1   :  { %2784 = shalt.err (!%p2781_p6)  }
 0x4b2   :  { %665 = dma.hbm_to_vmem [thread:$0]  %s659_s13, 32, %s663_s15, [#allocation3], %s2801_s23, %s2801_s23, %s2802_s24 }
 0x4b3   :  { %2791 = dma.done.wait [#allocation3], 1536 }
 0x4b4   :  { %2792 = vsyncadd [#allocation3], 4294965760  ;;  %v860_v0 = vld [vmem:[#allocation6 + $0x8] sm:$0xff]  ;;  %v862_v1 = vld [vmem:[#allocation6 + $0x18] sm:$0xff]  ;;  %vm947_vm0 = vcmask 1041409   ;;  %vm949_vm1 = vcmask 1042434  }
 0x4b5   :  { %v859_v2 = vld [vmem:[#allocation6] sm:$0xff]  ;;  %v1459_v3 = vpack.c.bf16 %v862_v1, %v860_v0  ;;  %v861_v4 = vld [vmem:[#allocation6 + $0x10] sm:$0xff]  ;;  %v864_v5 = vld [vmem:[#allocation6 + $0x28] sm:$0xff]  ;;  %vm951_vm2 = vcmask 1043459   ;;  %vm953_vm3 = vcmask 1044484   ;;  %vm955_vm4 = vcmask 1045509  }
 0x4b6   :  { %v866_v6 = vld [vmem:[#allocation6 + $0x38] sm:$0xff]  ;;  %v1461_v7 = vpack.c.bf16 %v861_v4, %v859_v2  ;;  %v863_v9 = vld [vmem:[#allocation6 + $0x20] sm:$0xff]  ;;  %v865_v10 = vld [vmem:[#allocation6 + $0x30] sm:$0xff] }
 0x4b7   :  { %v1463_v8 = vpack.c.bf16 %v866_v6, %v864_v5  ;;  %v868_v11 = vld [vmem:[#allocation6 + $0x48] sm:$0xff]  ;;  %1460 = vmatprep.subr.bf16.mxu0 %v1459_v3  ;;  %v870_v12 = vld [vmem:[#allocation6 + $0x58] sm:$0xff]  ;;  %v1465_v13 = vpack.c.bf16 %v865_v10, %v863_v9  ;;  %v867_v15 = vld [vmem:[#allocation6 + $0x40] sm:$0xff] }
 0x4b8   :  { %1462 = vmatpush1.bf16.msra.mxu0 %v1461_v7  ;;  %v1467_v14 = vpack.c.bf16 %v870_v12, %v868_v11  ;;  %v869_v16 = vld [vmem:[#allocation6 + $0x50] sm:$0xff]  ;;  %v872_v17 = vld [vmem:[#allocation6 + $0x68] sm:$0xff]  ;;  %v874_v18 = vld [vmem:[#allocation6 + $0x78] sm:$0xff] }
 0x4b9   :  { %1464 = vmatprep.subr.bf16.mxu0 %v1463_v8  ;;  %v1469_v19 = vpack.c.bf16 %v869_v16, %v867_v15  ;;  %v1471_v20 = vpack.c.bf16 %v874_v18, %v872_v17  ;;  %v871_v21 = vld [vmem:[#allocation6 + $0x60] sm:$0xff]  ;;  %v873_v22 = vld [vmem:[#allocation6 + $0x70] sm:$0xff]  ;;  %v876_v23 = vld [vmem:[#allocation6 + $0x88] sm:$0xff] }
 0x4ba   :  { %v878_v24 = vld [vmem:[#allocation6 + $0x98] sm:$0xff]  ;;  %v1473_v25 = vpack.c.bf16 %v873_v22, %v871_v21  ;;  %v875_v27 = vld [vmem:[#allocation6 + $0x80] sm:$0xff]  ;;  %v877_v28 = vld [vmem:[#allocation6 + $0x90] sm:$0xff] }
 0x4bb   :  { %v1475_v26 = vpack.c.bf16 %v878_v24, %v876_v23  ;;  %v880_v29 = vld [vmem:[#allocation6 + $0xa8] sm:$0xff]  ;;  %v882_v30 = vld [vmem:[#allocation6 + $0xb8] sm:$0xff]  ;;  %v1477_v31 = vpack.c.bf16 %v877_v28, %v875_v27  ;;  %v879_v33 = vld [vmem:[#allocation6 + $0xa0] sm:$0xff] }
 0x4bc   :  { %1466 = vmatpush1.bf16.msra.mxu0 %v1465_v13  ;;  %v1479_v32 = vpack.c.bf16 %v882_v30, %v880_v29  ;;  %v881_v34 = vld [vmem:[#allocation6 + $0xb0] sm:$0xff]  ;;  %v884_v35 = vld [vmem:[#allocation6 + $0xc8] sm:$0xff]  ;;  %v886_v36 = vld [vmem:[#allocation6 + $0xd8] sm:$0xff] }
 0x4bd   :  { %1468 = vmatprep.subr.bf16.mxu0 %v1467_v14  ;;  %v883_v37 = vld [vmem:[#allocation6 + $0xc0] sm:$0xff]  ;;  %v885_v38 = vld [vmem:[#allocation6 + $0xd0] sm:$0xff]  ;;  %v888_v39 = vld [vmem:[#allocation6 + $0xe8] sm:$0xff]  ;;  %v1481_v41 = vpack.c.bf16 %v881_v34, %v879_v33  ;;  %v1483_v44 = vpack.c.bf16 %v886_v36, %v884_v35 }
 0x4be   :  { %v890_v40 = vld [vmem:[#allocation6 + $0xf8] sm:$0xff]  ;;  %v3777_v42 = vld [vmem:[#allocation6 + $0xe0] sm:$0xff]  ;;  %v3779_v43 = vld [vmem:[#allocation6 + $0xf0] sm:$0xff]  ;;  %v1485_v47 = vpack.c.bf16 %v885_v38, %v883_v37 }
 0x4bf   :  { %v764_v45 = vld [vmem:[#allocation2 + $0x8] sm:$0xff]  ;;  %v766_v46 = vld [vmem:[#allocation2 + $0x18] sm:$0xff]  ;;  %v1487_v48 = vpack.c.bf16 %v890_v40, %v888_v39  ;;  %v1489_v54 = vpack.c.bf16 %v3779_v43, %v3777_v42  ;;  %v763_v59 = vld [vmem:[#allocation2] sm:$0xff] }
 0x4c0   :  { %1470 = vmatpush1.bf16.msra.mxu0 %v1469_v19  ;;  %v768_v49 = vld [vmem:[#allocation2 + $0x28] sm:$0xff]  ;;  %v770_v50 = vld [vmem:[#allocation2 + $0x38] sm:$0xff]  ;;  %v781_v52 = vrot.slane %v764_v45, 4  ;;  %v793_v53 = vrot.slane %v766_v46, 4  ;;  %v765_v60 = vld [vmem:[#allocation2 + $0x10] sm:$0xff]  ;;  %v775_v0 = vrot.slane %v763_v59, 4 }
 0x4c1   :  { %1472 = vmatprep.subr.bf16.mxu0 %v1471_v20  ;;  %v772_v51 = vld [vmem:[#allocation2 + $0x48] sm:$0xff]  ;;  %v774_v55 = vld [vmem:[#allocation2 + $0x58] sm:$0xff]  ;;  %v805_v56 = vrot.slane %v768_v49, 4  ;;  %v817_v57 = vrot.slane %v770_v50, 4  ;;  %v787_v6 = vrot.slane %v765_v60, 4  ;;  %v891_v7 = vld [vmem:[#allocation6 + $0x100] sm:$0xff] }
 0x4c2   :  { %v829_v58 = vrot.slane %v772_v51, 4  ;;  %v782_v61 = vadd.f32 %v781_v52, %v764_v45  ;;  %v794_v62 = vadd.f32 %v793_v53, %v766_v46  ;;  %v841_v63 = vrot.slane %v774_v55, 4  ;;  %v892_v1 = vld [vmem:[#allocation6 + $0x108] sm:$0xff]  ;;  %v894_v2 = vld [vmem:[#allocation6 + $0x118] sm:$0xff]  ;;  %v893_v8 = vld [vmem:[#allocation6 + $0x110] sm:$0xff] }
 0x4c3   :  { %v806_v3 = vadd.f32 %v805_v56, %v768_v49  ;;  %v818_v4 = vadd.f32 %v817_v57, %v770_v50  ;;  %v776_v12 = vadd.f32 %v775_v0, %v763_v59  ;;  %v788_v16 = vadd.f32 %v787_v6, %v765_v60  ;;  %v896_v22 = vld [vmem:[#allocation6 + $0x128] sm:$0xff]  ;;  %v898_v23 = vld [vmem:[#allocation6 + $0x138] sm:$0xff]  ;;  %v895_v27 = vld [vmem:[#allocation6 + $0x120] sm:$0xff] }
 0x4c4   :  { %1474 = vmatpush1.bf16.msra.mxu0 %v1473_v25  ;;  %v830_v5 = vadd.f32 %v829_v58, %v772_v51  ;;  %v783_v9 = vrot.slane %v782_v61, 2  ;;  %v795_v10 = vrot.slane %v794_v62, 2  ;;  %v842_v11 = vadd.f32 %v841_v63, %v774_v55  ;;  %v897_v28 = vld [vmem:[#allocation6 + $0x130] sm:$0xff]  ;;  %v900_v42 = vld [vmem:[#allocation6 + $0x148] sm:$0xff]  ;;  %v767_v46 = vld [vmem:[#allocation2 + $0x20] sm:$0xff] }
 0x4c5   :  { %1476 = vmatprep.subr.bf16.mxu0 %v1475_v26  ;;  %v807_v13 = vrot.slane %v806_v3, 2  ;;  %v819_v14 = vrot.slane %v818_v4, 2  ;;  %v1491_v17 = vpack.c.bf16 %v894_v2, %v892_v1  ;;  %v1493_v21 = vpack.c.bf16 %v893_v8, %v891_v7  ;;  %v771_v52 = vld [vmem:[#allocation2 + $0x40] sm:$0xff]  ;;  %v773_v53 = vld [vmem:[#allocation2 + $0x50] sm:$0xff]  ;;  %v904_v6 = vld [vmem:[#allocation6 + $0x168] sm:$0xff] }
 0x4c6   :  { %v831_v15 = vrot.slane %v830_v5, 2  ;;  %v784_v18 = vadd.f32 %v783_v9, %v782_v61  ;;  %v796_v19 = vadd.f32 %v795_v10, %v794_v62  ;;  %v843_v20 = vrot.slane %v842_v11, 2  ;;  %v901_v56 = vld [vmem:[#allocation6 + $0x150] sm:$0xff]  ;;  %v906_v7 = vld [vmem:[#allocation6 + $0x178] sm:$0xff] }
 0x4c7   :  { %v808_v24 = vadd.f32 %v807_v13, %v806_v3  ;;  %v820_v25 = vadd.f32 %v819_v14, %v818_v4  ;;  %v789_v36 = vrot.slane %v788_v16, 2  ;;  %v1495_v37 = vpack.c.bf16 %v898_v23, %v896_v22  ;;  %v908_v23 = vld [vmem:[#allocation6 + $0x188] sm:$0xff] }
 0x4c8   :  { %1478 = vmatpush1.bf16.msra.mxu0 %v1477_v31  ;;  %v832_v26 = vadd.f32 %v831_v15, %v830_v5  ;;  %v785_v29 = vrot.slane %v784_v18, 1  ;;  %v797_v30 = vrot.slane %v796_v19, 1  ;;  %v844_v31 = vadd.f32 %v843_v20, %v842_v11  ;;  %v903_v15 = vld [vmem:[#allocation6 + $0x160] sm:$0xff] }
 0x4c9   :  { %1480 = vmatprep.subr.bf16.mxu0 %v1479_v32  ;;  %v777_v32 = vrot.slane %v776_v12, 2  ;;  %v809_v33 = vrot.slane %v808_v24, 1  ;;  %v821_v34 = vrot.slane %v820_v25, 1  ;;  %v790_v60 = vadd.f32 %v789_v36, %v788_v16  ;;  %v905_v16 = vld [vmem:[#allocation6 + $0x170] sm:$0xff]  ;;  %v912_v36 = vld [vmem:[#allocation6 + $0x1a8] sm:$0xff] }
 0x4ca   :  { %v833_v35 = vrot.slane %v832_v26, 1  ;;  %v786_v38 = vadd.f32 %v785_v29, %v784_v18  ;;  %v798_v39 = vadd.f32 %v797_v30, %v796_v19  ;;  %v845_v40 = vrot.slane %v844_v31, 1 }
 0x4cb   :  { %v810_v43 = vadd.f32 %v809_v33, %v808_v24  ;;  %v778_v55 = vadd.f32 %v777_v32, %v776_v12  ;;  %v799_v63 = vrot.slane %v767_v46, 4  ;;  %v823_v3 = vrot.slane %v771_v52, 4  ;;  %v910_v24 = vld [vmem:[#allocation6 + $0x198] sm:$0xff]  ;;  %v907_v33 = vld [vmem:[#allocation6 + $0x180] sm:$0xff] }
 0x4cc   :  { %1482 = vmatpush1.bf16.msra.mxu0 %v1481_v41  ;;  %v1497_v41 = vpack.c.bf16 %v897_v28, %v895_v27  ;;  %v834_v45 = vadd.f32 %v833_v35, %v832_v26  ;;  %v846_v49 = vadd.f32 %v845_v40, %v844_v31  ;;  %v848_v50 = vmul.f32 0.125, %v786_v38 }
 0x4cd   :  { %1484 = vmatprep.subr.bf16.mxu0 %v1483_v44  ;;  %v822_v44 = vadd.f32 %v821_v34, %v820_v25  ;;  %v850_v51 = vmul.f32 0.125, %v798_v39  ;;  %v852_v57 = vmul.f32 0.125, %v810_v43  ;;  %v835_v4 = vrot.slane %v773_v53, 4  ;;  %v909_v34 = vld [vmem:[#allocation6 + $0x190] sm:$0xff] }
 0x4ce   :  { %v856_v59 = vmul.f32 0.125, %v834_v45  ;;  %v858_v61 = vmul.f32 0.125, %v846_v49  ;;  %v800_v9 = vadd.f32 %v799_v63, %v767_v46  ;;  %v779_v12 = vrot.slane %v778_v55, 1  ;;  %v911_v45 = vld [vmem:[#allocation6 + $0x1a0] sm:$0xff]  ;;  %v913_v46 = vld [vmem:[#allocation6 + $0x1b0] sm:$0xff]  ;;  %v918_v49 = vld [vmem:[#allocation6 + $0x1d8] sm:$0xff] }
 0x4cf   :  { %v854_v58 = vmul.f32 0.125, %v822_v44  ;;  %v957_v62 = vsel %vm947_vm0, %v850_v51, %v848_v50  ;;  %v791_v13 = vrot.slane %v790_v60, 1  ;;  %v824_v14 = vadd.f32 %v823_v3, %v771_v52  ;;  %v921_v3 = vld [vmem:[#allocation6 + $0x1f0] sm:$0xff] }
 0x4d0   :  { %1486 = vmatpush1.bf16.msra.mxu0 %v1485_v47  ;;  %v769_v47 = vld [vmem:[#allocation2 + $0x30] sm:$0xff]  ;;  %v958_v2 = vsel %vm949_vm1, %v852_v57, %v957_v62  ;;  %v801_v18 = vrot.slane %v800_v9, 2  ;;  %v836_v20 = vadd.f32 %v835_v4, %v773_v53  ;;  %v1505_v27 = vpack.c.bf16 %v905_v16, %v903_v15 }
 0x4d1   :  { %1488 = vmatprep.subr.bf16.mxu0 %v1487_v48  ;;  %v902_v48 = vld [vmem:[#allocation6 + $0x158] sm:$0xff]  ;;  %v811_v0 = vrot.slane %v769_v47, 4  ;;  %v959_v8 = vsel %vm951_vm2, %v854_v58, %v958_v2  ;;  %v825_v22 = vrot.slane %v824_v14, 2  ;;  %v780_v28 = vadd.f32 %v779_v12, %v778_v55  ;;  %v917_v57 = vld [vmem:[#allocation6 + $0x1d0] sm:$0xff]  ;;  %v919_v2 = vld [vmem:[#allocation6 + $0x1e0] sm:$0xff] }
 0x4d2   :  { %v1499_v1 = vpack.c.bf16 %v902_v48, %v900_v42  ;;  %v960_v11 = vsel %vm953_vm3, %v856_v59, %v959_v8  ;;  %v802_v25 = vadd.f32 %v801_v18, %v800_v9  ;;  %v792_v29 = vadd.f32 %v791_v13, %v790_v60  ;;  %v916_v48 = vld [vmem:[#allocation6 + $0x1c8] sm:$0xff]  ;;  %v922_v60 = vld [vmem:[#allocation6 + $0x1f8] sm:$0xff]  ;;  %v923_v13 = vld [vmem:[#allocation8] sm:$0x3] }
 0x4d3   :  { %v812_v10 = vadd.f32 %v811_v0, %v769_v47  ;;  %v837_v31 = vrot.slane %v836_v20, 2  ;;  %v1507_v32 = vpack.c.bf16 %v910_v24, %v908_v23  ;;  %v826_v35 = vadd.f32 %v825_v22, %v824_v14  ;;  %v920_v59 = vld [vmem:[#allocation6 + $0x1e8] sm:$0xff] }
 0x4d4   :  { %1490 = vmatpush1.bf16.msra.mxu0 %v1489_v54  ;;  %v899_v54 = vld [vmem:[#allocation6 + $0x140] sm:$0xff]  ;;  %v803_v30 = vrot.slane %v802_v25, 1  ;;  %v1509_v40 = vpack.c.bf16 %v909_v34, %v907_v33  ;;  %v847_v42 = vmul.f32 0.125, %v780_v28  ;;  %v849_v43 = vmul.f32 0.125, %v792_v29 }
 0x4d5   :  { %1492 = vmatprep.subr.bf16.mxu0 %v1491_v17  ;;  %v1501_v5 = vpack.c.bf16 %v901_v56, %v899_v54  ;;  %v961_v17 = vsel %vm955_vm4, %v858_v61, %v960_v11  ;;  %v813_v19 = vrot.slane %v812_v10, 2  ;;  %v827_v47 = vrot.slane %v826_v35, 1  ;;  %v915_v56 = vld [vmem:[#allocation6 + $0x1c0] sm:$0xff] }
 0x4d6   :  { %1028 = vmatprep.mubr.f32.mxu0 %v961_v17  ;;  %v804_v39 = vadd.f32 %v803_v30, %v802_v25  ;;  %v1513_v52 = vpack.c.bf16 %v913_v46, %v911_v45  ;;  %v948_v55 = vsel %vm947_vm0, %v849_v43, %v847_v42  ;;  %v1515_v54 = vpack.c.bf16 %v918_v49, %v916_v48 }
 0x4d7   :  { %v814_v26 = vadd.f32 %v813_v19, %v812_v10  ;;  %v828_v58 = vadd.f32 %v827_v47, %v826_v35  ;;  %v1517_v63 = vpack.c.bf16 %v917_v57, %v915_v56  ;;  %v925_v10 = vlaneseq }
 0x4d8   :  { %1494 = vmatpush1.bf16.msra.mxu0 %v1493_v21  ;;  %v1503_v21 = vpack.c.bf16 %v906_v7, %v904_v6  ;;  %v851_v51 = vmul.f32 0.125, %v804_v39  ;;  %v1521_v6 = vpack.c.bf16 %v921_v3, %v919_v2  ;;  %v2848_v14 = vmov 1966171168  }
 0x4d9   :  { %1496 = vmatprep.subr.bf16.mxu0 %v1495_v37  ;;  %v914_v37 = vld [vmem:[#allocation6 + $0x1b8] sm:$0xff]  ;;  %v815_v38 = vrot.slane %v814_v26, 1  ;;  %v855_v4 = vmul.f32 0.125, %v828_v58  ;;  %v926_v11 = vshrl.u32 %v925_v10, 7  ;;  %v1039_v15 = vunpack.c.l.s4 %v2848_v14 }
 0x4da   :  { %v1511_v44 = vpack.c.bf16 %v914_v37, %v912_v36  ;;  %v950_v62 = vsel %vm949_vm1, %v851_v51, %v948_v55  ;;  %vm1064_vm5 = vcmp.lt.s32.totalorder %v925_v10, 256 }
 0x4db   :  { %v816_v50 = vadd.f32 %v815_v38, %v814_v26  ;;  %v927_v12 = vsub.s32 0, %v926_v11  ;;  %v931_v16 = vsub.s32 1, %v926_v11  ;;  %v1040_v18 = vunpack.c.0.s8 %v1039_v15 }
 0x4dc   :  { %1498 = vmatpush1.bf16.msra.mxu0 %v1497_v41  ;;  %v838_v41 = vadd.f32 %v837_v31, %v836_v20 }
 0x4dd   :  { %1500 = vmatprep.subr.bf16.mxu0 %v1499_v1  ;;  %v853_v61 = vmul.f32 0.125, %v816_v50  ;;  %v1519_v1 = vpack.c.bf16 %v922_v60, %v920_v59  ;;  %v928_v17 = vrot.slane %v923_v13, %v927_v12  ;;  %v932_v19 = vrot.slane %v923_v13, %v931_v16 }
 0x4de   :  { %v839_v53 = vrot.slane %v838_v41, 1  ;;  %v1043_v23 = vsub.s32 %v1040_v18, %v926_v11 }
 0x4e0   :  { %1502 = vmatpush1.bf16.msra.mxu0 %v1501_v5  ;;  %v840_v0 = vadd.f32 %v839_v53, %v838_v41  ;;  %v952_v5 = vsel %vm951_vm2, %v853_v61, %v950_v62 }
 0x4e1   :  { %1504 = vmatprep.subr.bf16.mxu0 %v1503_v21  ;;  %v954_v8 = vsel %vm953_vm3, %v855_v4, %v952_v5 }
 0x4e2   :  { %v857_v7 = vmul.f32 0.125, %v840_v0 }
 0x4e4   :  { %1506 = vmatpush1.bf16.msra.mxu0 %v1505_v27  ;;  %v956_v9 = vsel %vm955_vm4, %v857_v7, %v954_v8 }
 0x4e5   :  { %1508 = vmatprep.subr.bf16.mxu0 %v1507_v32 }
 0x4e8   :  { %1510 = vmatpush1.bf16.msra.mxu0 %v1509_v40 }
 0x4e9   :  { %1512 = vmatprep.subr.bf16.mxu0 %v1511_v44 }
 0x4ec   :  { %1514 = vmatpush1.bf16.msra.mxu0 %v1513_v52 }
 0x4ed   :  { %1516 = vmatprep.subr.bf16.mxu0 %v1515_v54 }
 0x4f0   :  { %1518 = vmatpush1.bf16.msra.mxu0 %v1517_v63 }
 0x4f1   :  { %1520 = vmatprep.subr.bf16.mxu0 %v1519_v1 }
 0x4f4   :  { %1522 = vmatpush1.bf16.msra.mxu0 %v1521_v6 }
 0x4f7   :  { %1029 = vmatmul.mubr.f32.vlgmr.msra.gmra.mrb[0].mxu0 %v956_v9 }
 0x5ca   :  { %v1030_v20 = vpop.f32.mrb[0].mxu0 }
 0x5cb   :  { %v1031_v21 = vadd.f32 %v1030_v20, %v928_v17  ;;  %v1032_v22 = vpop.f32.mrb[1].mxu0 }
 0x5cc   :  { %v1033_v24 = vadd.f32 %v1032_v22, %v932_v19 }
 0x5ce   :  { %v1037_v25 = vcombine.low %v1031_v21, %v1033_v24  ;;  %v1077_v26 = vcombine.high %v1031_v21, %v1033_v24 }
 0x5d0   :  { %v1044_v27 = vrot.slane %v1037_v25, %v1043_v23  ;;  %v1084_v28 = vrot.slane %v1077_v26, %v1043_v23 }
 0x5d2   :  { %v1045_v29 = vcombine.high %v1044_v27, %v1044_v27  ;;  %v1052_v30 = vrot.slane %v1044_v27, %v1043_v23  ;;  %v1085_v31 = vcombine.high %v1084_v28, %v1084_v28  ;;  %v1092_v32 = vrot.slane %v1084_v28, %v1043_v23 }
 0x5d4   :  { %v1059_v33 = vrot.slane %v1045_v29, %v1043_v23  ;;  %1066 = vst.msk [vmem:[%s3815_s4] ss:$4 sm:$0x3] %vm1064_vm5, %v1052_v30  ;;  %v1069_v34 = vcombine.high %v1052_v30, %v1052_v30  ;;  %v1099_v35 = vrot.slane %v1085_v31, %v1043_v23  ;;  %1456 = vst.msk [vmem:[%s3815_s4 + $0x2] ss:$4 sm:$0x3] %vm1064_vm5, %v1092_v32 }
 0x5d6   :  { %1453 = vst.msk [vmem:[%s3815_s4 + $0x8] ss:$4 sm:$0x3] %vm1064_vm5, %v1059_v33  ;;  %v1070_v36 = vcombine.high %v1059_v33, %v1059_v33  ;;  %1454 = vst.msk [vmem:[%s3815_s4 + $0x1] ss:$4 sm:$0x3] %vm1064_vm5, %v1069_v34 }
 0x5d7   :  { %1457 = vst.msk [vmem:[%s3815_s4 + $0xa] ss:$4 sm:$0x3] %vm1064_vm5, %v1099_v35 }
 0x5d8   :  { %1455 = vst.msk [vmem:[%s3815_s4 + $0x9] ss:$4 sm:$0x3] %vm1064_vm5, %v1070_v36 }
 0x5d9   :  { %1110 = vsyncpa [#allocation7], 1 }
 0x5da   :  { %1111 = vsyncpa [#allocation9], 1 }
 0x5db   :  { %1112 = vsyncmov [#allocation3] }
 0x5de   :  { %s1113_s17 = vpop.sfrf %1112 }
 0x5df   :  { %p1458_p7 = scmp.ne.s32.totalorder %s1113_s17, 0 }
 0x5e1   :  { %1117 = shalt.err (%p1458_p7)  }

</bundles_post_ra>
